<compile_context>
chip_gen: v5e
topology: v5e:2x2
jax: 0.10.0
libtpu: 0.0.40
codegen_flags: <defaults>
</compile_context>

<pallas_src>
import jax
import jax.numpy as jnp
from jax.experimental import pallas as pl
from jax.experimental.pallas import tpu as pltpu

# ---------------- dimensions (small but module-consistent) ----------------
A, B, C, E = 2, 8, 16, 128          # batch, channels ('b'), 'c'/'d', 'e'
RANKS = (4, 8, 16)                   # Tucker ranks for a (B, C, E) tensor
KH = KW = 5
PAD = 2
LEAK = 0.2
ROW0 = 8                             # sublane-aligned row offset of y in scratch


# ---------------- Tucker reconstruction (parameter glue) ----------------
# TODO(synk): Tucker.fit_transform (HOSVD/HOOI fitting of a random tensor) has
# no clean Pallas equivalent; we synthesize random core+factors directly and
# reproduce to_tensor() semantics here.
def tucker_to_tensor(core, factors):
    # full[a, b, c] = sum_{i,j,k} core[i,j,k] U0[a,i] U1[b,j] U2[c,k]
    return jnp.einsum("ijk,ai,bj,ck->abc", core, factors[0], factors[1],
                      factors[2])


# ---------------- fused kernel: einsum x2 + leaky relu + bias + 5x5 conv ----
def _fused_kernel(x_ref, w1_ref, w2_ref, bias_ref, cw_ref, cb_ref,
                  out_ref, ypad_ref):
    # Per grid step a:
    #   x_ref    (B, C, C)  VMEM      w1_ref/w2_ref (B, C, E) VMEM (resident)
    #   bias_ref (B, E, E)  VMEM      cw_ref (B*KH*KW,) SMEM  cb_ref (1,) SMEM
    #   out_ref  (E, E)     VMEM      ypad_ref (E + 2*ROW0, E) VMEM scratch
    ypad_ref[...] = jnp.zeros_like(ypad_ref)   # zero the row halo (rest is overwritten)

    # Column-validity masks for the 5 kw taps (hoisted out of the channel loop).
    col_ids = jax.lax.broadcasted_iota(jnp.int32, (E, E), 1)
    col_ok = []
    for kw in range(KW):
        dw = kw - PAD
        if dw < 0:
            col_ok.append(col_ids >= -dw)
        elif dw > 0:
            col_ok.append(col_ids < E - dw)
        else:
            col_ok.append(None)

    dn = (((0,), (0,)), ((), ()))   # contract dim 0 of lhs with dim 0 of rhs

    def body(bi, acc):
        # ---- stage 1 for channel bi: 'abcd,bce->abde' twice + leaky + bias --
        # t1[d, e] = sum_c x[c, d] * w1[c, e]
        t1 = jax.lax.dot_general(x_ref[bi], w1_ref[bi], dn,
                                 preferred_element_type=jnp.float32)
        t1 = jnp.where(t1 > 0, t1, LEAK * t1)
        # t2[d, e] = sum_c t1[c, d] * w2[c, e]
        t2 = jax.lax.dot_general(t1, w2_ref[bi], dn,
                                 preferred_element_type=jnp.float32)
        t2 = jnp.where(t2 > 0, t2, LEAK * t2)
        # write y_b into the row-padded scratch (aligned store at row ROW0)
        ypad_ref[ROW0:ROW0 + E, :] = t2 + bias_ref[bi]

        # ---- 5x5 'same' conv contribution of channel bi -----------------
        for kh in range(KH):
            r0 = ROW0 - PAD + kh
            rows = ypad_ref[r0:r0 + E, :]          # row-shifted slab, halo = 0
            for kw in range(KW):
                dw = kw - PAD
                w = cw_ref[bi * (KH * KW) + kh * KW + kw]
                if dw == 0:
                    term = rows
                else:
                    shifted = pltpu.roll(rows, (-dw) % E, axis=1)  # lane shift (XLU)
                    term = jnp.where(col_ok[kw], shifted, 0.0)
                acc = acc + w * term
        return acc

    acc = jnp.full((E, E), cb_ref[0], dtype=jnp.float32)
    acc = jax.lax.fori_loop(0, B, body, acc)
    out_ref[...] = acc


def hrtnn_fused(x, w1, w2, bparam, conv_w, conv_b):
    cw_flat = conv_w.reshape(-1).astype(jnp.float32)     # OIHW with O=1 -> (B*25,)
    flops = (A * B * (2 * C * C * E + 2 * C * E * E)     # two matmuls per (a,b)
             + A * B * KH * KW * 2 * E * E)              # conv FMAs
    bytes_accessed = 4 * (x.size + w1.size + w2.size + bparam.size
                          + cw_flat.size + conv_b.size + A * E * E)
    return pl.pallas_call(
        _fused_kernel,
        out_shape=jax.ShapeDtypeStruct((A, 1, E, E), jnp.float32),
        grid_spec=pltpu.PrefetchScalarGridSpec(
            num_scalar_prefetch=0,
            grid=(A,),
            in_specs=[
                pl.BlockSpec((None, B, C, C), lambda a: (a, 0, 0, 0)),   # x
                pl.BlockSpec((B, C, E), lambda a: (0, 0, 0)),            # w1 (resident)
                pl.BlockSpec((B, C, E), lambda a: (0, 0, 0)),            # w2 (resident)
                pl.BlockSpec((None, B, E, E), lambda a: (a, 0, 0, 0)),   # bias
                pl.BlockSpec(memory_space=pltpu.MemorySpace.SMEM),       # conv_w flat
                pl.BlockSpec(memory_space=pltpu.MemorySpace.SMEM),       # conv_b
            ],
            out_specs=pl.BlockSpec((None, None, E, E), lambda a: (a, 0, 0, 0)),
            scratch_shapes=[pltpu.VMEM((E + 2 * ROW0, E), jnp.float32)],
        ),
        compiler_params=pltpu.CompilerParams(
            dimension_semantics=("parallel",)),
        cost_estimate=pl.CostEstimate(flops=int(flops), transcendentals=0,
                                      bytes_accessed=int(bytes_accessed)),
    )(x, w1, w2, bparam, cw_flat, conv_b)


# ---------------- full forward ----------------
@jax.jit
def hrtnn_forward(x, params):
    w1 = tucker_to_tensor(params["core1"], params["factors1"])
    w2 = tucker_to_tensor(params["core2"], params["factors2"])
    return hrtnn_fused(x, w1, w2, params["b"], params["conv_w"],
                       params["conv_b"])


# ---------------- pure-JAX reference (for verification) ----------------
@jax.jit
def reference_forward(x, params):
    w1 = tucker_to_tensor(params["core1"], params["factors1"])
    w2 = tucker_to_tensor(params["core2"], params["factors2"])
    t1 = jnp.einsum("abcd,bce->abde", x, w1)
    t1 = jnp.where(t1 > 0, t1, LEAK * t1)
    t2 = jnp.einsum("abcd,bce->abde", t1, w2)
    t2 = jnp.where(t2 > 0, t2, LEAK * t2)
    y = t2 + params["b"]
    out = jax.lax.conv_general_dilated(
        y, params["conv_w"], (1, 1), ((PAD, PAD), (PAD, PAD)),
        dimension_numbers=("NCHW", "OIHW", "NCHW"))
    return out + params["conv_b"].reshape(1, 1, 1, 1)


if __name__ == "__main__":
    key = jax.random.PRNGKey(0)
    ks = jax.random.split(key, 12)
    r0, r1, r2 = RANKS
    k_bound = 1.0 / jnp.sqrt(float(B * KH * KW))   # torch Conv2d default init
    params = {
        "core1": jax.random.uniform(ks[0], (r0, r1, r2), jnp.float32),
        "factors1": (jax.random.uniform(ks[1], (B, r0), jnp.float32),
                     jax.random.uniform(ks[2], (C, r1), jnp.float32),
                     jax.random.uniform(ks[3], (E, r2), jnp.float32)),
        "core2": jax.random.uniform(ks[4], (r0, r1, r2), jnp.float32),
        "factors2": (jax.random.uniform(ks[5], (B, r0), jnp.float32),
                     jax.random.uniform(ks[6], (C, r1), jnp.float32),
                     jax.random.uniform(ks[7], (E, r2), jnp.float32)),
        "b": jax.random.uniform(ks[8], (A, B, E, E), jnp.float32),
        "conv_w": jax.random.uniform(ks[9], (1, B, KH, KW), jnp.float32,
                                     minval=-k_bound, maxval=k_bound),
        "conv_b": jax.random.uniform(ks[10], (1,), jnp.float32,
                                     minval=-k_bound, maxval=k_bound),
    }
    x = jax.random.uniform(ks[11], (A, B, C, C), jnp.float32)

    out = jax.block_until_ready(hrtnn_forward(x, params))
    ref = jax.block_until_ready(reference_forward(x, params))

    assert out.shape == (A, 1, E, E), out.shape
    rel_err = float(jnp.max(jnp.abs(out - ref)) /
                    (jnp.max(jnp.abs(ref)) + 1e-30))
    assert rel_err < 1e-3, f"relative error too large: {rel_err}"
    print("KERNEL_OK")
</pallas_src>

<mosaic_0001>
module attributes {stable_mosaic.version = 11 : i64} {
  func.func @_fused_kernel(%arg0: i32, %arg1: memref<1x8x16x16xf32, #tpu.memory_space<vmem>>, %arg2: memref<8x16x128xf32, #tpu.memory_space<vmem>>, %arg3: memref<8x16x128xf32, #tpu.memory_space<vmem>>, %arg4: memref<1x8x128x128xf32, #tpu.memory_space<vmem>>, %arg5: memref<200xf32, #tpu.memory_space<smem>>, %arg6: memref<1xf32, #tpu.memory_space<smem>>, %arg7: memref<1x1x128x128xf32, #tpu.memory_space<vmem>>, %arg8: memref<144x128xf32, #tpu.memory_space<vmem>>) attributes {dimension_semantics = [#tpu.dimension_semantics<parallel>], iteration_bounds = array<i64: 2>, scalar_prefetch = 0 : i64, scratch_operands = 1 : i64, tpu.core_type = #tpu.core_type<tc>, window_params = [{transform_indices = @transform_0, window_bounds = array<i64: 1, 8, 16, 16>}, {pipeline_mode = #tpu.pipeline_mode<synchronous>, transform_indices = @transform_1, window_bounds = array<i64: 8, 16, 128>}, {pipeline_mode = #tpu.pipeline_mode<synchronous>, transform_indices = @transform_2, window_bounds = array<i64: 8, 16, 128>}, {transform_indices = @transform_3, window_bounds = array<i64: 1, 8, 128, 128>}, {transform_indices = @transform_4, window_bounds = array<i64: 200>}, {transform_indices = @transform_5, window_bounds = array<i64: 1>}, {transform_indices = @transform_6, window_bounds = array<i64: 1, 1, 128, 128>}]} {
    %cst = arith.constant 0.000000e+00 : f32
    %0 = vector.broadcast %cst : f32 to vector<144x128xf32>
    %c0 = arith.constant 0 : index
    %c0_0 = arith.constant 0 : index
    %1 = vector.load %arg8[%c0, %c0_0] : memref<144x128xf32, #tpu.memory_space<vmem>>, vector<144x128xf32>
    tpu.vector_store %arg8[%c0, %c0_0], %0 {strides = array<i32>} : memref<144x128xf32, #tpu.memory_space<vmem>>, vector<144x128xf32>,
    %2 = tpu.iota {dimensions = array<i32: 1>} : vector<128x128xi32>
    %c2_i32 = arith.constant 2 : i32
    %3 = vector.broadcast %c2_i32 : i32 to vector<128x128xi32>
    %4 = arith.cmpi sge, %2, %3 : vector<128x128xi32>
    %c1_i32 = arith.constant 1 : i32
    %5 = vector.broadcast %c1_i32 : i32 to vector<128x128xi32>
    %6 = arith.cmpi sge, %2, %5 : vector<128x128xi32>
    %c127_i32 = arith.constant 127 : i32
    %7 = vector.broadcast %c127_i32 : i32 to vector<128x128xi32>
    %8 = arith.cmpi slt, %2, %7 : vector<128x128xi32>
    %c126_i32 = arith.constant 126 : i32
    %9 = vector.broadcast %c126_i32 : i32 to vector<128x128xi32>
    %10 = arith.cmpi slt, %2, %9 : vector<128x128xi32>
    %c0_1 = arith.constant 0 : index
    %11 = memref.load %arg6[%c0_1] : memref<1xf32, #tpu.memory_space<smem>>
    %12 = vector.broadcast %11 : f32 to vector<128x128xf32>
    %c0_i32 = arith.constant 0 : i32
    %c8_i32 = arith.constant 8 : i32
    %13 = arith.addi %c0_i32, %c8_i32 : i32
    %c1_i32_2 = arith.constant 1 : i32
    %14 = scf.for %arg9 = %c0_i32 to %13 step %c1_i32_2 iter_args(%arg10 = %12) -> (vector<128x128xf32>)  : i32 {
      %c0_8 = arith.constant 0 : index
      %18 = arith.index_cast %arg9 : i32 to index
      %c0_9 = arith.constant 0 : index
      %c0_10 = arith.constant 0 : index
      %19 = vector.load %arg1[%c0_8, %18, %c0_9, %c0_10] : memref<1x8x16x16xf32, #tpu.memory_space<vmem>>, vector<1x1x16x16xf32>
      %20 = vector.shape_cast %19 : vector<1x1x16x16xf32> to vector<16x16xf32>
      %21 = arith.index_cast %arg9 : i32 to index
      %c0_11 = arith.constant 0 : index
      %c0_12 = arith.constant 0 : index
      %22 = vector.load %arg2[%21, %c0_11, %c0_12] : memref<8x16x128xf32, #tpu.memory_space<vmem>>, vector<1x16x128xf32>
      %23 = vector.shape_cast %22 : vector<1x16x128xf32> to vector<16x128xf32>
      %cst_13 = arith.constant dense<0.000000e+00> : vector<16x128xf32>
      %24 = tpu.matmul %20, %23, %cst_13 {dimension_numbers = #tpu.dot_dimension_numbers<[0], [0], [1], [1], [0, 1, 1, 1], [], []>} : vector<16x16xf32>, vector<16x128xf32>, vector<16x128xf32> -> vector<16x128xf32>
      %cst_14 = arith.constant 0.000000e+00 : f32
      %25 = vector.broadcast %cst_14 : f32 to vector<16x128xf32>
      %26 = arith.cmpf ogt, %24, %25 : vector<16x128xf32>
      %cst_15 = arith.constant 2.000000e-01 : f32
      %27 = vector.broadcast %cst_15 : f32 to vector<16x128xf32>
      %28 = arith.mulf %27, %24 : vector<16x128xf32>
      %29 = arith.select %26, %24, %28 : vector<16x128xi1>, vector<16x128xf32>
      %30 = arith.index_cast %arg9 : i32 to index
      %c0_16 = arith.constant 0 : index
      %c0_17 = arith.constant 0 : index
      %31 = vector.load %arg3[%30, %c0_16, %c0_17] : memref<8x16x128xf32, #tpu.memory_space<vmem>>, vector<1x16x128xf32>
      %32 = vector.shape_cast %31 : vector<1x16x128xf32> to vector<16x128xf32>
      %cst_18 = arith.constant dense<0.000000e+00> : vector<128x128xf32>
      %33 = tpu.matmul %29, %32, %cst_18 {dimension_numbers = #tpu.dot_dimension_numbers<[0], [0], [1], [1], [0, 1, 1, 1], [], []>} : vector<16x128xf32>, vector<16x128xf32>, vector<128x128xf32> -> vector<128x128xf32>
      %cst_19 = arith.constant 0.000000e+00 : f32
      %34 = vector.broadcast %cst_19 : f32 to vector<128x128xf32>
      %35 = arith.cmpf ogt, %33, %34 : vector<128x128xf32>
      %cst_20 = arith.constant 2.000000e-01 : f32
      %36 = vector.broadcast %cst_20 : f32 to vector<128x128xf32>
      %37 = arith.mulf %36, %33 : vector<128x128xf32>
      %38 = arith.select %35, %33, %37 : vector<128x128xi1>, vector<128x128xf32>
      %c0_21 = arith.constant 0 : index
      %39 = arith.index_cast %arg9 : i32 to index
      %c0_22 = arith.constant 0 : index
      %c0_23 = arith.constant 0 : index
      %40 = vector.load %arg4[%c0_21, %39, %c0_22, %c0_23] : memref<1x8x128x128xf32, #tpu.memory_space<vmem>>, vector<1x1x128x128xf32>
      %41 = vector.shape_cast %40 : vector<1x1x128x128xf32> to vector<128x128xf32>
      %42 = arith.addf %38, %41 : vector<128x128xf32>
      %c8 = arith.constant 8 : index
      %c0_24 = arith.constant 0 : index
      %43 = vector.load %arg8[%c8, %c0_24] : memref<144x128xf32, #tpu.memory_space<vmem>>, vector<128x128xf32>
      tpu.vector_store %arg8[%c8, %c0_24], %42 {strides = array<i32>} : memref<144x128xf32, #tpu.memory_space<vmem>>, vector<128x128xf32>,
      %c6 = arith.constant 6 : index
      %c0_25 = arith.constant 0 : index
      %44 = vector.load %arg8[%c6, %c0_25] : memref<144x128xf32, #tpu.memory_space<vmem>>, vector<128x128xf32>
      %c25_i32 = arith.constant 25 : i32
      %45 = arith.muli %arg9, %c25_i32 : i32
      %c0_i32_26 = arith.constant 0 : i32
      %46 = arith.addi %45, %c0_i32_26 : i32
      %c0_i32_27 = arith.constant 0 : i32
      %47 = arith.addi %46, %c0_i32_27 : i32
      %48 = arith.index_cast %47 : i32 to index
      %49 = memref.load %arg5[%48] : memref<200xf32, #tpu.memory_space<smem>>
      %c2_i32_28 = arith.constant 2 : i32
      %50 = tpu.dynamic_rotate %44 by %c2_i32_28 dim 1 : vector<128x128xf32>, i32 -> vector<128x128xf32>
      %cst_29 = arith.constant 0.000000e+00 : f32
      %51 = vector.broadcast %cst_29 : f32 to vector<128x128xf32>
      %52 = arith.select %4, %50, %51 : vector<128x128xi1>, vector<128x128xf32>
      %53 = vector.broadcast %49 : f32 to vector<128x128xf32>
      %54 = arith.mulf %53, %52 : vector<128x128xf32>
      %55 = arith.addf %arg10, %54 : vector<128x128xf32>
      %c25_i32_30 = arith.constant 25 : i32
      %56 = arith.muli %arg9, %c25_i32_30 : i32
      %c0_i32_31 = arith.constant 0 : i32
      %57 = arith.addi %56, %c0_i32_31 : i32
      %c1_i32_32 = arith.constant 1 : i32
      %58 = arith.addi %57, %c1_i32_32 : i32
      %59 = arith.index_cast %58 : i32 to index
      %60 = memref.load %arg5[%59] : memref<200xf32, #tpu.memory_space<smem>>
      %c1_i32_33 = arith.constant 1 : i32
      %61 = tpu.dynamic_rotate %44 by %c1_i32_33 dim 1 : vector<128x128xf32>, i32 -> vector<128x128xf32>
      %cst_34 = arith.constant 0.000000e+00 : f32
      %62 = vector.broadcast %cst_34 : f32 to vector<128x128xf32>
      %63 = arith.select %6, %61, %62 : vector<128x128xi1>, vector<128x128xf32>
      %64 = vector.broadcast %60 : f32 to vector<128x128xf32>
      %65 = arith.mulf %64, %63 : vector<128x128xf32>
      %66 = arith.addf %55, %65 : vector<128x128xf32>
      %c25_i32_35 = arith.constant 25 : i32
      %67 = arith.muli %arg9, %c25_i32_35 : i32
      %c0_i32_36 = arith.constant 0 : i32
      %68 = arith.addi %67, %c0_i32_36 : i32
      %c2_i32_37 = arith.constant 2 : i32
      %69 = arith.addi %68, %c2_i32_37 : i32
      %70 = arith.index_cast %69 : i32 to index
      %71 = memref.load %arg5[%70] : memref<200xf32, #tpu.memory_space<smem>>
      %72 = vector.broadcast %71 : f32 to vector<128x128xf32>
      %73 = arith.mulf %72, %44 : vector<128x128xf32>
      %74 = arith.addf %66, %73 : vector<128x128xf32>
      %c25_i32_38 = arith.constant 25 : i32
      %75 = arith.muli %arg9, %c25_i32_38 : i32
      %c0_i32_39 = arith.constant 0 : i32
      %76 = arith.addi %75, %c0_i32_39 : i32
      %c3_i32 = arith.constant 3 : i32
      %77 = arith.addi %76, %c3_i32 : i32
      %78 = arith.index_cast %77 : i32 to index
      %79 = memref.load %arg5[%78] : memref<200xf32, #tpu.memory_space<smem>>
      %c127_i32_40 = arith.constant 127 : i32
      %80 = tpu.dynamic_rotate %44 by %c127_i32_40 dim 1 : vector<128x128xf32>, i32 -> vector<128x128xf32>
      %cst_41 = arith.constant 0.000000e+00 : f32
      %81 = vector.broadcast %cst_41 : f32 to vector<128x128xf32>
      %82 = arith.select %8, %80, %81 : vector<128x128xi1>, vector<128x128xf32>
      %83 = vector.broadcast %79 : f32 to vector<128x128xf32>
      %84 = arith.mulf %83, %82 : vector<128x128xf32>
      %85 = arith.addf %74, %84 : vector<128x128xf32>
      %c25_i32_42 = arith.constant 25 : i32
      %86 = arith.muli %arg9, %c25_i32_42 : i32
      %c0_i32_43 = arith.constant 0 : i32
      %87 = arith.addi %86, %c0_i32_43 : i32
      %c4_i32 = arith.constant 4 : i32
      %88 = arith.addi %87, %c4_i32 : i32
      %89 = arith.index_cast %88 : i32 to index
      %90 = memref.load %arg5[%89] : memref<200xf32, #tpu.memory_space<smem>>
      %c126_i32_44 = arith.constant 126 : i32
      %91 = tpu.dynamic_rotate %44 by %c126_i32_44 dim 1 : vector<128x128xf32>, i32 -> vector<128x128xf32>
      %cst_45 = arith.constant 0.000000e+00 : f32
      %92 = vector.broadcast %cst_45 : f32 to vector<128x128xf32>
      %93 = arith.select %10, %91, %92 : vector<128x128xi1>, vector<128x128xf32>
      %94 = vector.broadcast %90 : f32 to vector<128x128xf32>
      %95 = arith.mulf %94, %93 : vector<128x128xf32>
      %96 = arith.addf %85, %95 : vector<128x128xf32>
      %c7 = arith.constant 7 : index
      %c0_46 = arith.constant 0 : index
      %97 = vector.load %arg8[%c7, %c0_46] : memref<144x128xf32, #tpu.memory_space<vmem>>, vector<128x128xf32>
      %c25_i32_47 = arith.constant 25 : i32
      %98 = arith.muli %arg9, %c25_i32_47 : i32
      %c5_i32 = arith.constant 5 : i32
      %99 = arith.addi %98, %c5_i32 : i32
      %c0_i32_48 = arith.constant 0 : i32
      %100 = arith.addi %99, %c0_i32_48 : i32
      %101 = arith.index_cast %100 : i32 to index
      %102 = memref.load %arg5[%101] : memref<200xf32, #tpu.memory_space<smem>>
      %c2_i32_49 = arith.constant 2 : i32
      %103 = tpu.dynamic_rotate %97 by %c2_i32_49 dim 1 : vector<128x128xf32>, i32 -> vector<128x128xf32>
      %cst_50 = arith.constant 0.000000e+00 : f32
      %104 = vector.broadcast %cst_50 : f32 to vector<128x128xf32>
      %105 = arith.select %4, %103, %104 : vector<128x128xi1>, vector<128x128xf32>
      %106 = vector.broadcast %102 : f32 to vector<128x128xf32>
      %107 = arith.mulf %106, %105 : vector<128x128xf32>
      %108 = arith.addf %96, %107 : vector<128x128xf32>
      %c25_i32_51 = arith.constant 25 : i32
      %109 = arith.muli %arg9, %c25_i32_51 : i32
      %c5_i32_52 = arith.constant 5 : i32
      %110 = arith.addi %109, %c5_i32_52 : i32
      %c1_i32_53 = arith.constant 1 : i32
      %111 = arith.addi %110, %c1_i32_53 : i32
      %112 = arith.index_cast %111 : i32 to index
      %113 = memref.load %arg5[%112] : memref<200xf32, #tpu.memory_space<smem>>
      %c1_i32_54 = arith.constant 1 : i32
      %114 = tpu.dynamic_rotate %97 by %c1_i32_54 dim 1 : vector<128x128xf32>, i32 -> vector<128x128xf32>
      %cst_55 = arith.constant 0.000000e+00 : f32
      %115 = vector.broadcast %cst_55 : f32 to vector<128x128xf32>
      %116 = arith.select %6, %114, %115 : vector<128x128xi1>, vector<128x128xf32>
      %117 = vector.broadcast %113 : f32 to vector<128x128xf32>
      %118 = arith.mulf %117, %116 : vector<128x128xf32>
      %119 = arith.addf %108, %118 : vector<128x128xf32>
      %c25_i32_56 = arith.constant 25 : i32
      %120 = arith.muli %arg9, %c25_i32_56 : i32
      %c5_i32_57 = arith.constant 5 : i32
      %121 = arith.addi %120, %c5_i32_57 : i32
      %c2_i32_58 = arith.constant 2 : i32
      %122 = arith.addi %121, %c2_i32_58 : i32
      %123 = arith.index_cast %122 : i32 to index
      %124 = memref.load %arg5[%123] : memref<200xf32, #tpu.memory_space<smem>>
      %125 = vector.broadcast %124 : f32 to vector<128x128xf32>
      %126 = arith.mulf %125, %97 : vector<128x128xf32>
      %127 = arith.addf %119, %126 : vector<128x128xf32>
      %c25_i32_59 = arith.constant 25 : i32
      %128 = arith.muli %arg9, %c25_i32_59 : i32
      %c5_i32_60 = arith.constant 5 : i32
      %129 = arith.addi %128, %c5_i32_60 : i32
      %c3_i32_61 = arith.constant 3 : i32
      %130 = arith.addi %129, %c3_i32_61 : i32
      %131 = arith.index_cast %130 : i32 to index
      %132 = memref.load %arg5[%131] : memref<200xf32, #tpu.memory_space<smem>>
      %c127_i32_62 = arith.constant 127 : i32
      %133 = tpu.dynamic_rotate %97 by %c127_i32_62 dim 1 : vector<128x128xf32>, i32 -> vector<128x128xf32>
      %cst_63 = arith.constant 0.000000e+00 : f32
      %134 = vector.broadcast %cst_63 : f32 to vector<128x128xf32>
      %135 = arith.select %8, %133, %134 : vector<128x128xi1>, vector<128x128xf32>
      %136 = vector.broadcast %132 : f32 to vector<128x128xf32>
      %137 = arith.mulf %136, %135 : vector<128x128xf32>
      %138 = arith.addf %127, %137 : vector<128x128xf32>
      %c25_i32_64 = arith.constant 25 : i32
      %139 = arith.muli %arg9, %c25_i32_64 : i32
      %c5_i32_65 = arith.constant 5 : i32
      %140 = arith.addi %139, %c5_i32_65 : i32
      %c4_i32_66 = arith.constant 4 : i32
      %141 = arith.addi %140, %c4_i32_66 : i32
      %142 = arith.index_cast %141 : i32 to index
      %143 = memref.load %arg5[%142] : memref<200xf32, #tpu.memory_space<smem>>
      %c126_i32_67 = arith.constant 126 : i32
      %144 = tpu.dynamic_rotate %97 by %c126_i32_67 dim 1 : vector<128x128xf32>, i32 -> vector<128x128xf32>
      %cst_68 = arith.constant 0.000000e+00 : f32
      %145 = vector.broadcast %cst_68 : f32 to vector<128x128xf32>
      %146 = arith.select %10, %144, %145 : vector<128x128xi1>, vector<128x128xf32>
      %147 = vector.broadcast %143 : f32 to vector<128x128xf32>
      %148 = arith.mulf %147, %146 : vector<128x128xf32>
      %149 = arith.addf %138, %148 : vector<128x128xf32>
      %c8_69 = arith.constant 8 : index
      %c0_70 = arith.constant 0 : index
      %150 = vector.load %arg8[%c8_69, %c0_70] : memref<144x128xf32, #tpu.memory_space<vmem>>, vector<128x128xf32>
      %c25_i32_71 = arith.constant 25 : i32
      %151 = arith.muli %arg9, %c25_i32_71 : i32
      %c10_i32 = arith.constant 10 : i32
      %152 = arith.addi %151, %c10_i32 : i32
      %c0_i32_72 = arith.constant 0 : i32
      %153 = arith.addi %152, %c0_i32_72 : i32
      %154 = arith.index_cast %153 : i32 to index
      %155 = memref.load %arg5[%154] : memref<200xf32, #tpu.memory_space<smem>>
      %c2_i32_73 = arith.constant 2 : i32
      %156 = tpu.dynamic_rotate %150 by %c2_i32_73 dim 1 : vector<128x128xf32>, i32 -> vector<128x128xf32>
      %cst_74 = arith.constant 0.000000e+00 : f32
      %157 = vector.broadcast %cst_74 : f32 to vector<128x128xf32>
      %158 = arith.select %4, %156, %157 : vector<128x128xi1>, vector<128x128xf32>
      %159 = vector.broadcast %155 : f32 to vector<128x128xf32>
      %160 = arith.mulf %159, %158 : vector<128x128xf32>
      %161 = arith.addf %149, %160 : vector<128x128xf32>
      %c25_i32_75 = arith.constant 25 : i32
      %162 = arith.muli %arg9, %c25_i32_75 : i32
      %c10_i32_76 = arith.constant 10 : i32
      %163 = arith.addi %162, %c10_i32_76 : i32
      %c1_i32_77 = arith.constant 1 : i32
      %164 = arith.addi %163, %c1_i32_77 : i32
      %165 = arith.index_cast %164 : i32 to index
      %166 = memref.load %arg5[%165] : memref<200xf32, #tpu.memory_space<smem>>
      %c1_i32_78 = arith.constant 1 : i32
      %167 = tpu.dynamic_rotate %150 by %c1_i32_78 dim 1 : vector<128x128xf32>, i32 -> vector<128x128xf32>
      %cst_79 = arith.constant 0.000000e+00 : f32
      %168 = vector.broadcast %cst_79 : f32 to vector<128x128xf32>
      %169 = arith.select %6, %167, %168 : vector<128x128xi1>, vector<128x128xf32>
      %170 = vector.broadcast %166 : f32 to vector<128x128xf32>
      %171 = arith.mulf %170, %169 : vector<128x128xf32>
      %172 = arith.addf %161, %171 : vector<128x128xf32>
      %c25_i32_80 = arith.constant 25 : i32
      %173 = arith.muli %arg9, %c25_i32_80 : i32
      %c10_i32_81 = arith.constant 10 : i32
      %174 = arith.addi %173, %c10_i32_81 : i32
      %c2_i32_82 = arith.constant 2 : i32
      %175 = arith.addi %174, %c2_i32_82 : i32
      %176 = arith.index_cast %175 : i32 to index
      %177 = memref.load %arg5[%176] : memref<200xf32, #tpu.memory_space<smem>>
      %178 = vector.broadcast %177 : f32 to vector<128x128xf32>
      %179 = arith.mulf %178, %150 : vector<128x128xf32>
      %180 = arith.addf %172, %179 : vector<128x128xf32>
      %c25_i32_83 = arith.constant 25 : i32
      %181 = arith.muli %arg9, %c25_i32_83 : i32
      %c10_i32_84 = arith.constant 10 : i32
      %182 = arith.addi %181, %c10_i32_84 : i32
      %c3_i32_85 = arith.constant 3 : i32
      %183 = arith.addi %182, %c3_i32_85 : i32
      %184 = arith.index_cast %183 : i32 to index
      %185 = memref.load %arg5[%184] : memref<200xf32, #tpu.memory_space<smem>>
      %c127_i32_86 = arith.constant 127 : i32
      %186 = tpu.dynamic_rotate %150 by %c127_i32_86 dim 1 : vector<128x128xf32>, i32 -> vector<128x128xf32>
      %cst_87 = arith.constant 0.000000e+00 : f32
      %187 = vector.broadcast %cst_87 : f32 to vector<128x128xf32>
      %188 = arith.select %8, %186, %187 : vector<128x128xi1>, vector<128x128xf32>
      %189 = vector.broadcast %185 : f32 to vector<128x128xf32>
      %190 = arith.mulf %189, %188 : vector<128x128xf32>
      %191 = arith.addf %180, %190 : vector<128x128xf32>
      %c25_i32_88 = arith.constant 25 : i32
      %192 = arith.muli %arg9, %c25_i32_88 : i32
      %c10_i32_89 = arith.constant 10 : i32
      %193 = arith.addi %192, %c10_i32_89 : i32
      %c4_i32_90 = arith.constant 4 : i32
      %194 = arith.addi %193, %c4_i32_90 : i32
      %195 = arith.index_cast %194 : i32 to index
      %196 = memref.load %arg5[%195] : memref<200xf32, #tpu.memory_space<smem>>
      %c126_i32_91 = arith.constant 126 : i32
      %197 = tpu.dynamic_rotate %150 by %c126_i32_91 dim 1 : vector<128x128xf32>, i32 -> vector<128x128xf32>
      %cst_92 = arith.constant 0.000000e+00 : f32
      %198 = vector.broadcast %cst_92 : f32 to vector<128x128xf32>
      %199 = arith.select %10, %197, %198 : vector<128x128xi1>, vector<128x128xf32>
      %200 = vector.broadcast %196 : f32 to vector<128x128xf32>
      %201 = arith.mulf %200, %199 : vector<128x128xf32>
      %202 = arith.addf %191, %201 : vector<128x128xf32>
      %c9 = arith.constant 9 : index
      %c0_93 = arith.constant 0 : index
      %203 = vector.load %arg8[%c9, %c0_93] : memref<144x128xf32, #tpu.memory_space<vmem>>, vector<128x128xf32>
      %c25_i32_94 = arith.constant 25 : i32
      %204 = arith.muli %arg9, %c25_i32_94 : i32
      %c15_i32 = arith.constant 15 : i32
      %205 = arith.addi %204, %c15_i32 : i32
      %c0_i32_95 = arith.constant 0 : i32
      %206 = arith.addi %205, %c0_i32_95 : i32
      %207 = arith.index_cast %206 : i32 to index
      %208 = memref.load %arg5[%207] : memref<200xf32, #tpu.memory_space<smem>>
      %c2_i32_96 = arith.constant 2 : i32
      %209 = tpu.dynamic_rotate %203 by %c2_i32_96 dim 1 : vector<128x128xf32>, i32 -> vector<128x128xf32>
      %cst_97 = arith.constant 0.000000e+00 : f32
      %210 = vector.broadcast %cst_97 : f32 to vector<128x128xf32>
      %211 = arith.select %4, %209, %210 : vector<128x128xi1>, vector<128x128xf32>
      %212 = vector.broadcast %208 : f32 to vector<128x128xf32>
      %213 = arith.mulf %212, %211 : vector<128x128xf32>
      %214 = arith.addf %202, %213 : vector<128x128xf32>
      %c25_i32_98 = arith.constant 25 : i32
      %215 = arith.muli %arg9, %c25_i32_98 : i32
      %c15_i32_99 = arith.constant 15 : i32
      %216 = arith.addi %215, %c15_i32_99 : i32
      %c1_i32_100 = arith.constant 1 : i32
      %217 = arith.addi %216, %c1_i32_100 : i32
      %218 = arith.index_cast %217 : i32 to index
      %219 = memref.load %arg5[%218] : memref<200xf32, #tpu.memory_space<smem>>
      %c1_i32_101 = arith.constant 1 : i32
      %220 = tpu.dynamic_rotate %203 by %c1_i32_101 dim 1 : vector<128x128xf32>, i32 -> vector<128x128xf32>
      %cst_102 = arith.constant 0.000000e+00 : f32
      %221 = vector.broadcast %cst_102 : f32 to vector<128x128xf32>
      %222 = arith.select %6, %220, %221 : vector<128x128xi1>, vector<128x128xf32>
      %223 = vector.broadcast %219 : f32 to vector<128x128xf32>
      %224 = arith.mulf %223, %222 : vector<128x128xf32>
      %225 = arith.addf %214, %224 : vector<128x128xf32>
      %c25_i32_103 = arith.constant 25 : i32
      %226 = arith.muli %arg9, %c25_i32_103 : i32
      %c15_i32_104 = arith.constant 15 : i32
      %227 = arith.addi %226, %c15_i32_104 : i32
      %c2_i32_105 = arith.constant 2 : i32
      %228 = arith.addi %227, %c2_i32_105 : i32
      %229 = arith.index_cast %228 : i32 to index
      %230 = memref.load %arg5[%229] : memref<200xf32, #tpu.memory_space<smem>>
      %231 = vector.broadcast %230 : f32 to vector<128x128xf32>
      %232 = arith.mulf %231, %203 : vector<128x128xf32>
      %233 = arith.addf %225, %232 : vector<128x128xf32>
      %c25_i32_106 = arith.constant 25 : i32
      %234 = arith.muli %arg9, %c25_i32_106 : i32
      %c15_i32_107 = arith.constant 15 : i32
      %235 = arith.addi %234, %c15_i32_107 : i32
      %c3_i32_108 = arith.constant 3 : i32
      %236 = arith.addi %235, %c3_i32_108 : i32
      %237 = arith.index_cast %236 : i32 to index
      %238 = memref.load %arg5[%237] : memref<200xf32, #tpu.memory_space<smem>>
      %c127_i32_109 = arith.constant 127 : i32
      %239 = tpu.dynamic_rotate %203 by %c127_i32_109 dim 1 : vector<128x128xf32>, i32 -> vector<128x128xf32>
      %cst_110 = arith.constant 0.000000e+00 : f32
      %240 = vector.broadcast %cst_110 : f32 to vector<128x128xf32>
      %241 = arith.select %8, %239, %240 : vector<128x128xi1>, vector<128x128xf32>
      %242 = vector.broadcast %238 : f32 to vector<128x128xf32>
      %243 = arith.mulf %242, %241 : vector<128x128xf32>
      %244 = arith.addf %233, %243 : vector<128x128xf32>
      %c25_i32_111 = arith.constant 25 : i32
      %245 = arith.muli %arg9, %c25_i32_111 : i32
      %c15_i32_112 = arith.constant 15 : i32
      %246 = arith.addi %245, %c15_i32_112 : i32
      %c4_i32_113 = arith.constant 4 : i32
      %247 = arith.addi %246, %c4_i32_113 : i32
      %248 = arith.index_cast %247 : i32 to index
      %249 = memref.load %arg5[%248] : memref<200xf32, #tpu.memory_space<smem>>
      %c126_i32_114 = arith.constant 126 : i32
      %250 = tpu.dynamic_rotate %203 by %c126_i32_114 dim 1 : vector<128x128xf32>, i32 -> vector<128x128xf32>
      %cst_115 = arith.constant 0.000000e+00 : f32
      %251 = vector.broadcast %cst_115 : f32 to vector<128x128xf32>
      %252 = arith.select %10, %250, %251 : vector<128x128xi1>, vector<128x128xf32>
      %253 = vector.broadcast %249 : f32 to vector<128x128xf32>
      %254 = arith.mulf %253, %252 : vector<128x128xf32>
      %255 = arith.addf %244, %254 : vector<128x128xf32>
      %c10 = arith.constant 10 : index
      %c0_116 = arith.constant 0 : index
      %256 = vector.load %arg8[%c10, %c0_116] : memref<144x128xf32, #tpu.memory_space<vmem>>, vector<128x128xf32>
      %c25_i32_117 = arith.constant 25 : i32
      %257 = arith.muli %arg9, %c25_i32_117 : i32
      %c20_i32 = arith.constant 20 : i32
      %258 = arith.addi %257, %c20_i32 : i32
      %c0_i32_118 = arith.constant 0 : i32
      %259 = arith.addi %258, %c0_i32_118 : i32
      %260 = arith.index_cast %259 : i32 to index
      %261 = memref.load %arg5[%260] : memref<200xf32, #tpu.memory_space<smem>>
      %c2_i32_119 = arith.constant 2 : i32
      %262 = tpu.dynamic_rotate %256 by %c2_i32_119 dim 1 : vector<128x128xf32>, i32 -> vector<128x128xf32>
      %cst_120 = arith.constant 0.000000e+00 : f32
      %263 = vector.broadcast %cst_120 : f32 to vector<128x128xf32>
      %264 = arith.select %4, %262, %263 : vector<128x128xi1>, vector<128x128xf32>
      %265 = vector.broadcast %261 : f32 to vector<128x128xf32>
      %266 = arith.mulf %265, %264 : vector<128x128xf32>
      %267 = arith.addf %255, %266 : vector<128x128xf32>
      %c25_i32_121 = arith.constant 25 : i32
      %268 = arith.muli %arg9, %c25_i32_121 : i32
      %c20_i32_122 = arith.constant 20 : i32
      %269 = arith.addi %268, %c20_i32_122 : i32
      %c1_i32_123 = arith.constant 1 : i32
      %270 = arith.addi %269, %c1_i32_123 : i32
      %271 = arith.index_cast %270 : i32 to index
      %272 = memref.load %arg5[%271] : memref<200xf32, #tpu.memory_space<smem>>
      %c1_i32_124 = arith.constant 1 : i32
      %273 = tpu.dynamic_rotate %256 by %c1_i32_124 dim 1 : vector<128x128xf32>, i32 -> vector<128x128xf32>
      %cst_125 = arith.constant 0.000000e+00 : f32
      %274 = vector.broadcast %cst_125 : f32 to vector<128x128xf32>
      %275 = arith.select %6, %273, %274 : vector<128x128xi1>, vector<128x128xf32>
      %276 = vector.broadcast %272 : f32 to vector<128x128xf32>
      %277 = arith.mulf %276, %275 : vector<128x128xf32>
      %278 = arith.addf %267, %277 : vector<128x128xf32>
      %c25_i32_126 = arith.constant 25 : i32
      %279 = arith.muli %arg9, %c25_i32_126 : i32
      %c20_i32_127 = arith.constant 20 : i32
      %280 = arith.addi %279, %c20_i32_127 : i32
      %c2_i32_128 = arith.constant 2 : i32
      %281 = arith.addi %280, %c2_i32_128 : i32
      %282 = arith.index_cast %281 : i32 to index
      %283 = memref.load %arg5[%282] : memref<200xf32, #tpu.memory_space<smem>>
      %284 = vector.broadcast %283 : f32 to vector<128x128xf32>
      %285 = arith.mulf %284, %256 : vector<128x128xf32>
      %286 = arith.addf %278, %285 : vector<128x128xf32>
      %c25_i32_129 = arith.constant 25 : i32
      %287 = arith.muli %arg9, %c25_i32_129 : i32
      %c20_i32_130 = arith.constant 20 : i32
      %288 = arith.addi %287, %c20_i32_130 : i32
      %c3_i32_131 = arith.constant 3 : i32
      %289 = arith.addi %288, %c3_i32_131 : i32
      %290 = arith.index_cast %289 : i32 to index
      %291 = memref.load %arg5[%290] : memref<200xf32, #tpu.memory_space<smem>>
      %c127_i32_132 = arith.constant 127 : i32
      %292 = tpu.dynamic_rotate %256 by %c127_i32_132 dim 1 : vector<128x128xf32>, i32 -> vector<128x128xf32>
      %cst_133 = arith.constant 0.000000e+00 : f32
      %293 = vector.broadcast %cst_133 : f32 to vector<128x128xf32>
      %294 = arith.select %8, %292, %293 : vector<128x128xi1>, vector<128x128xf32>
      %295 = vector.broadcast %291 : f32 to vector<128x128xf32>
      %296 = arith.mulf %295, %294 : vector<128x128xf32>
      %297 = arith.addf %286, %296 : vector<128x128xf32>
      %c25_i32_134 = arith.constant 25 : i32
      %298 = arith.muli %arg9, %c25_i32_134 : i32
      %c20_i32_135 = arith.constant 20 : i32
      %299 = arith.addi %298, %c20_i32_135 : i32
      %c4_i32_136 = arith.constant 4 : i32
      %300 = arith.addi %299, %c4_i32_136 : i32
      %301 = arith.index_cast %300 : i32 to index
      %302 = memref.load %arg5[%301] : memref<200xf32, #tpu.memory_space<smem>>
      %c126_i32_137 = arith.constant 126 : i32
      %303 = tpu.dynamic_rotate %256 by %c126_i32_137 dim 1 : vector<128x128xf32>, i32 -> vector<128x128xf32>
      %cst_138 = arith.constant 0.000000e+00 : f32
      %304 = vector.broadcast %cst_138 : f32 to vector<128x128xf32>
      %305 = arith.select %10, %303, %304 : vector<128x128xi1>, vector<128x128xf32>
      %306 = vector.broadcast %302 : f32 to vector<128x128xf32>
      %307 = arith.mulf %306, %305 : vector<128x128xf32>
      %308 = arith.addf %297, %307 : vector<128x128xf32>
      scf.yield %308 : vector<128x128xf32>
    }
    %c8_i32_3 = arith.constant 8 : i32
    %c0_4 = arith.constant 0 : index
    %c0_5 = arith.constant 0 : index
    %c0_6 = arith.constant 0 : index
    %c0_7 = arith.constant 0 : index
    %15 = vector.load %arg7[%c0_4, %c0_5, %c0_6, %c0_7] : memref<1x1x128x128xf32, #tpu.memory_space<vmem>>, vector<1x1x128x128xf32>
    %16 = vector.shape_cast %15 : vector<1x1x128x128xf32> to vector<128x128xf32>
    %17 = vector.shape_cast %14 : vector<128x128xf32> to vector<1x1x128x128xf32>
    tpu.vector_store %arg7[%c0_4, %c0_5, %c0_6, %c0_7], %17 {strides = array<i32>} : memref<1x1x128x128xf32, #tpu.memory_space<vmem>>, vector<1x1x128x128xf32>,
    return
  }
  func.func @transform_0(%arg0: i32) -> (i32, i32, i32, i32) {
    %c0_i32 = arith.constant 0 : i32
    %c0_i32_0 = arith.constant 0 : i32
    %c0_i32_1 = arith.constant 0 : i32
    %c0_i32_2 = arith.constant 0 : i32
    return %arg0, %c0_i32, %c0_i32_0, %c0_i32_1 : i32, i32, i32, i32
  }
  func.func @transform_1(%arg0: i32) -> (i32, i32, i32) {
    %c0_i32 = arith.constant 0 : i32
    %c0_i32_0 = arith.constant 0 : i32
    %c0_i32_1 = arith.constant 0 : i32
    %c0_i32_2 = arith.constant 0 : i32
    return %c0_i32, %c0_i32_0, %c0_i32_1 : i32, i32, i32
  }
  func.func @transform_2(%arg0: i32) -> (i32, i32, i32) {
    %c0_i32 = arith.constant 0 : i32
    %c0_i32_0 = arith.constant 0 : i32
    %c0_i32_1 = arith.constant 0 : i32
    %c0_i32_2 = arith.constant 0 : i32
    return %c0_i32, %c0_i32_0, %c0_i32_1 : i32, i32, i32
  }
  func.func @transform_3(%arg0: i32) -> (i32, i32, i32, i32) {
    %c0_i32 = arith.constant 0 : i32
    %c0_i32_0 = arith.constant 0 : i32
    %c0_i32_1 = arith.constant 0 : i32
    %c0_i32_2 = arith.constant 0 : i32
    return %arg0, %c0_i32, %c0_i32_0, %c0_i32_1 : i32, i32, i32, i32
  }
  func.func @transform_4(%arg0: i32) -> i32 {
    %c0_i32 = arith.constant 0 : i32
    %c0_i32_0 = arith.constant 0 : i32
    return %c0_i32 : i32
  }
  func.func @transform_5(%arg0: i32) -> i32 {
    %c0_i32 = arith.constant 0 : i32
    %c0_i32_0 = arith.constant 0 : i32
    return %c0_i32 : i32
  }
  func.func @transform_6(%arg0: i32) -> (i32, i32, i32, i32) {
    %c0_i32 = arith.constant 0 : i32
    %c0_i32_0 = arith.constant 0 : i32
    %c0_i32_1 = arith.constant 0 : i32
    %c0_i32_2 = arith.constant 0 : i32
    return %arg0, %c0_i32, %c0_i32_0, %c0_i32_1 : i32, i32, i32, i32
  }
}

</mosaic_0001>

<bundles_post_ra>
// kernel: hrtnn_forward.1
= control target key start
LH: loop header
LB: loop body
LE: loop exit
PB: predicated region body
PF: predicated region fallthrough
CT: control target
= control target key end

     0   :  { %s6691_s0 = inlined_call_operand.vmem [shape: f32[2,8,16,16], index: 0, kind: input, shape index: {}]   ;;  %s6692_s1 = inlined_call_operand.vmem [shape: f32[8,16,128], index: 1, kind: input, shape index: {}]   ;;  %s6693_s2 = inlined_call_operand.vmem [shape: f32[8,16,128], index: 2, kind: input, shape index: {}]   ;;  %s6694_s3 = inlined_call_operand.hbm [shape: f32[2,8,128,128], index: 3, kind: input, shape index: {}]   ;;  %s6695_s4 = inlined_call_operand.vmem [shape: f32[200], index: 4, kind: input, shape index: {}]   ;;  %s6696_s5 = inlined_call_operand.<no memory space> [shape: f32[1], index: 5, kind: input, shape index: {}]   ;;  %s6697_s6 = inlined_call_operand.hbm [shape: f32[2,1,128,128], index: 6, kind: output, shape index: {}]  }
   0x1   :  { %6720 = sst [smem:[#allocation161_spill]] %s6695_s4 }
   0x2   :  { %11 = sst [smem:[#allocation3]] %s6696_s5 }
   0x3   :  { %12 = vsyncpa [#allocation5], 0 }
   0x4   :  { %14 = vsyncpa [#allocation5 + $0x1], 0 }
   0x5   :  { %15 = vsyncpa [#allocation7], 0 }
   0x6   :  { %16 = vsyncpa [#allocation6], 0 }
   0x7   :  { %18 = vsyncpa [#allocation6 + $0x1], 0  ;;  %s3405_s23 = smov 0   ;;  %s3407_s24 = smov 0  }
   0x8   :  { %s3409_s25 = smov 0   ;;  %s3411_s26 = smov 0  }
   0x9 LB: > { %s3426_s5 = sadd.s32 4294967295, %s3287_s26   ;;  %s2781_s27 = sadd.s32 4294967294, %s3287_s26   ;;  %s3287_s26 = sphi %s3411_s26, %s7139_s26   ;;  %s3283_s25 = sphi %s3409_s25, %s7138_s25   ;;  %s3279_s24 = sphi %s3407_s24, %s7137_s24   ;;  %s3275_s23 = sphi %s3405_s23, %s7136_s23  }
   0xa   : > { %s3430_s28 = sadd.s32 1, %s3287_s26   ;;  %s99_s29 = sadd.s32 1, %s3283_s25 }
   0xb   : > { %s96_s30 = ssub.s32 %s3287_s26, %s3430_s28  ;;  %p106_p0 = scmp.ne.s32.totalorder %s3283_s25, %s3279_s24 }
   0xc   : > { %p97_p1 = scmp.eq.s32.totalorder %s96_s30, 0  ;;  %p107_p2 = scmp.eq.s32.totalorder %s3287_s26, 0 }
   0xd   : > { %p112_p3 = scmp.ne.s32.totalorder %s3279_s24, %s3275_s23  ;;  %p113_p4 = scmp.eq.s32.totalorder %s3426_s5, 0 }
   0xe   : > { %s3442_s7 = scalar_select %p97_p1, %s3283_s25, %s99_s29  }
   0xf   : > { %p3444_p5 = por %p107_p2, %p106_p0  ;;  %p3450_p6 = por %p113_p4, %p112_p3 }
  0x10   : > { %6721 = sst [smem:[#allocation13_spill]] %s3442_s7  ;;  %p178_p7 = scmp.eq.s32.totalorder %s3426_s5, 1 }
  0x11   : > { %p184_p8 = scmp.eq.s32.totalorder %s2781_s27, 1  ;;  %p2782_p9 = scmp.ge.s32.totalorder %s3287_s26, 1 }
  0x12   : > { %p191_p10 = scmp.lt.s32.totalorder %s3287_s26, 3  ;;  %p3457_p11 = por %p178_p7, %p106_p0 }
  0x13   : > { %p3461_p12 = por %p184_p8, %p112_p3  ;;  %s6727_s4 = sld [smem:[#allocation161_spill]] }
  0x14   : > { %p3465_p13 = pnand %p2782_p9, %p191_p10  ;;  %p2849_p2 = scmp.lt.s32.totalorder %s3287_s26, 2 }
  0x15   : > { %s231_s16 = sand.u32 1, %s3283_s25   ;;  %s3357_s19 = smov [#allocation8]  }
  0x16   : > { %p2836_p1 = pneg %p3465_p13  ;;  %p3481_p3 = pnand %p2849_p2, %p3444_p5 }
  0x17   : > { %s2785_s18 = sshll.u32 %s231_s16, 10  ;;  %s2819_s20 = sshll.u32 %s3287_s26, 10 }
  0x18   : > { %p2837_p7 = pnand %p2836_p1, %p113_p4  ;;  %s235_s21 = scalar_lea.vmem [#allocation4], %s2785_s18 }
  0x19   : > { %s209_s15 = sshll.u32 %s6727_s4, 4  ;;  %s243_s22 = sshll.u32 %s235_s21, 4  ;;  %s210_s15 = int_to_ptr.vmem [resolvable:$true] %s209_s15  ;;  %s244_s22 = int_to_ptr.vmem [resolvable:$true] %s243_s22 }
  0x1a   : > { %2839 = dma.vmem_to_smem (!%p2837_p7), %s210_s15, 32, %s3357_s19, [#allocation7]  }
  0x1b   : > { %s240_s30 = scalar_lea.hbm %s6694_s3, %s2819_s20  ;;  %s232_s14 = scalar_lea.sflag [#allocation5], %s231_s16 }
  0x1c   : > { %s241_s13 = sshll.u32 %s240_s30, 4  ;;  %p3123_p8 = pneg %p3481_p3  ;;  %s242_s13 = int_to_ptr.hbm [resolvable:$true] %s241_s13 }
  0x1d   : > { %s3119_s8 = sshra.s32 %s242_s13, 4  ;;  %s3126_s18 = scalar_lea.hbm %s6694_s3, 2048  ;;  %s3120_s8 = int_to_ptr.hbm [resolvable:$true] %s3119_s8 }
  0x1e   : > { %s3121_s4 = scalar_lea.hbm %s3120_s8, 1024  ;;  %p3127_p1 = scmp.lt.s32.totalorder %s3120_s8, %s6694_s3 }
  0x1f   : > { %p3122_p5 = scmp.ne.s32.totalorder %s3120_s8, %s3121_s4  ;;  %p3128_p2 = scmp.lt.s32.totalorder %s3126_s18, %s3121_s4 }
  0x21   : > { %p3124_p9 = pnand %p3123_p8, %p3122_p5  ;;  %p3129_p7 = por %p3128_p2, %p3127_p1 }
  0x23   : > { %p3125_p10 = pneg %p3124_p9 }
  0x25   : > { %p3130_p0 = pnand %p3129_p7, %p3125_p10 }
  0x27   : > { %3133 = shalt.err (!%p3130_p0)
}
  0x28   : > { %s3358_s16 = smov 128   ;;  %s3359_s20 = smov 8  }
  0x29   : > { %2843 = dma.hbm_to_vmem [thread:$0]  (!%p3481_p3), %s242_s13, 16384, %s244_s22, %s232_s14, %s3358_s16, %s3358_s16, %s3359_s20  }
  0x2a   : > { %255 = sbr.rel (%p3465_p13) target bundleno = 1725 (0x6bd), region = 44  ;;  %s3502_s27 = sand.u32 (!%p3465_p13), 1, %s3279_s24  }
  0x2b   : > { %s2789_s7 = sshll.u32 (!%p3465_p13), %s3502_s27, 10  ;;  %s258_s29 = scalar_lea.sflag (!%p3465_p13), [#allocation5], %s3502_s27 }
  0x2c   : > { %s3506_s4 = scalar_lea.vmem (!%p3465_p13), [#allocation4], %s2789_s7 }
  0x2f   : > { %3262 = dma.done.wait (%p3450_p6), %s258_s29, 16384  }
  0x30   : > { %3264 = vsyncadd (%p3450_p6), %s258_s29, 4294950912 }
  0x31   : > { %3266 = dma.done.wait (%p113_p4), [#allocation7], 32  }
  0x32   : > { %3268 = vsyncadd (%p113_p4), [#allocation7], 4294967264 }
  0x33   : > { %272 = sfence }
  0x34   : > { %s2791_s12 = sshll.u32 %s3502_s27, 7  ;;  %p302_p13 = scmp.lt.s32.totalorder %s3426_s5, 1  ;;  %v325_v0 = vlaneseq  ;;  %v3360_v1 = vmov 0.0  }
  0x35   : > { %307 = vst [vmem:[#allocation2] sm:$0xff] %v3360_v1  ;;  %s331_s17 = sld [smem:[#allocation3]]  ;;  %s3532_s8 = scalar_lea.vmem [#allocation9], %s2791_s12 }
  0x36   : > { %s303_s22 = scalar_select %p302_p13, %s3426_s5, 1  ;;  %308 = vst [vmem:[#allocation2 + $0x8] sm:$0xff] %v3360_v1  ;;  %v3519_v2 = vand.u32 127, %v325_v0 }
  0x37   : > { %309 = vst [vmem:[#allocation2 + $0x10] sm:$0xff] %v3360_v1  ;;  %s3566_s15 = smov 0  }
  0x38   : > { %s2820_s9 = sshll.u32 %s303_s22, 7  ;;  %310 = vst [vmem:[#allocation2 + $0x18] sm:$0xff] %v3360_v1  ;;  %vm327_vm0 = vcmp.ge.s32.totalorder %v3519_v2, 2  ;;  %vm328_vm1 = vcmp.ge.s32.totalorder %v3519_v2, 1  ;;  %vm329_vm2 = vcmp.lt.s32.totalorder %v3519_v2, 127  ;;  %vm330_vm3 = vcmp.lt.s32.totalorder %v3519_v2, 126 }
  0x39   : > { %s3528_s14 = scalar_lea.vmem %s6691_s0, %s2820_s9  ;;  %311 = vst [vmem:[#allocation2 + $0x20] sm:$0xff] %v3360_v1 }
  0x3a   : > { %312 = vst [vmem:[#allocation2 + $0x28] sm:$0xff] %v3360_v1 }
  0x3b   : > { %313 = vst [vmem:[#allocation2 + $0x30] sm:$0xff] %v3360_v1  ;;  %v332_v3 = vstv %s331_s17  }
  0x3c   : > { %314 = vst [vmem:[#allocation2 + $0x38] sm:$0xff] %v3360_v1  ;;  %v6729_v4 = vmov %v332_v3  ;;  %v6730_v5 = vmov %v332_v3  ;;  %v6731_v6 = vmov %v332_v3  ;;  %v6732_v7 = vmov %v332_v3 }
  0x3d   : > { %315 = vst [vmem:[#allocation2 + $0x40] sm:$0xff] %v3360_v1  ;;  %v6733_v8 = vmov %v332_v3  ;;  %v6734_v9 = vmov %v332_v3  ;;  %v6735_v10 = vmov %v332_v3  ;;  %v6736_v11 = vmov %v332_v3 }
  0x3e   : > { %316 = vst [vmem:[#allocation2 + $0x48] sm:$0xff] %v3360_v1  ;;  %v6737_v12 = vmov %v332_v3  ;;  %v6738_v13 = vmov %v332_v3  ;;  %v6739_v14 = vmov %v332_v3  ;;  %v6740_v15 = vmov %v332_v3 }
  0x3f   : > { %317 = vst [vmem:[#allocation2 + $0x50] sm:$0xff] %v3360_v1  ;;  %v6741_v16 = vmov %v332_v3  ;;  %v6742_v17 = vmov %v332_v3  ;;  %v6743_v18 = vmov %v332_v3 }
  0x40   : > { %318 = vst [vmem:[#allocation2 + $0x58] sm:$0xff] %v3360_v1 }
  0x41   : > { %319 = vst [vmem:[#allocation2 + $0x60] sm:$0xff] %v3360_v1 }
  0x42   : > { %320 = vst [vmem:[#allocation2 + $0x68] sm:$0xff] %v3360_v1 }
  0x43   : > { %321 = vst [vmem:[#allocation2 + $0x70] sm:$0xff] %v3360_v1 }
  0x44   : > { %322 = vst [vmem:[#allocation2 + $0x78] sm:$0xff] %v3360_v1 }
  0x45   : > { %323 = vst [vmem:[#allocation2 + $0x80] sm:$0xff] %v3360_v1 }
  0x46   : > { %324 = vst [vmem:[#allocation2 + $0x88] sm:$0xff] %v3360_v1 }
  0x47 LB: >> { %6744 = vst [vmem:[#allocation14_spill] sm:$0xff] %v3291_v4  ;;  %s2794_s19 = sshll.u32 %s3355_s15, 4  ;;  %vm394_vm4 = vcmask 130048   ;;  %s2813_s17 = sshll.u32 %s3355_s15, 7  ;;  %s3355_s15 = sphi %s3566_s15, %s338_s15   ;;  %v3351_v3 = vphi %v332_v3, %v7133_v3   ;;  %v3347_v18 = vphi %v6743_v18, %v7132_v18   ;;  %v3343_v17 = vphi %v6742_v17, %v7131_v17   ;;  %v3339_v16 = vphi %v6741_v16, %v7130_v16   ;;  %v3335_v15 = vphi %v6740_v15, %v7129_v15   ;;  %v3331_v14 = vphi %v6739_v14, %v7128_v14   ;;  %v3327_v13 = vphi %v6738_v13, %v7127_v13   ;;  %v3323_v12 = vphi %v6737_v12, %v7126_v12   ;;  %v3319_v11 = vphi %v6736_v11, %v7125_v11   ;;  %v3315_v10 = vphi %v6735_v10, %v7124_v10   ;;  %v3311_v9 = vphi %v6734_v9, %v7123_v9   ;;  %v3307_v8 = vphi %v6733_v8, %v7122_v8   ;;  %v3303_v7 = vphi %v6732_v7, %v7121_v7   ;;  %v3299_v6 = vphi %v6731_v6, %v7120_v6   ;;  %v3295_v5 = vphi %v6730_v5, %v7119_v5   ;;  %v3291_v4 = vphi %v6729_v4, %v7118_v4  }
  0x48   : >> { %6745 = vst [vmem:[#allocation15_spill] sm:$0xff] %v3295_v5  ;;  %s356_s18 = scalar_lea.vmem %s3528_s14, %s2794_s19  ;;  %s359_s20 = scalar_lea.vmem %s6692_s1, %s2794_s19 }
  0x49   : >> { %6746 = vst [vmem:[#allocation16_spill] sm:$0xff] %v3299_v6  ;;  %v357_v19 = vld [vmem:[%s356_s18] sm:$0xff]  ;;  %v361_v20 = vld [vmem:[%s359_s20 + $0x8] sm:$0xff]  ;;  %s430_s12 = scalar_lea.vmem %s6693_s2, %s2794_s19  ;;  %s3640_s22 = scalar_lea.vmem %s3506_s4, %s2813_s17 [#allocation4] }
  0x4a   : >> { %6747 = vst [vmem:[#allocation17_spill] sm:$0xff] %v3303_v7  ;;  %362 = vxpose.xlu0.b32.start [1/2] (short) (narrow) %v357_v19, 16  ;;  %415 = vmatpush.msra.mxu0 %v361_v20  ;;  %v360_v21 = vld [vmem:[%s359_s20] sm:$0xff]  ;;  %v358_v22 = vld [vmem:[%s356_s18 + $0x8] sm:$0xff]  ;;  %s3361_s9 = smov 126   ;;  %s3362_s30 = smov 127  }
  0x4b   : >> { %6748 = vst [vmem:[#allocation18_spill] sm:$0xff] %v3307_v8  ;;  %v432_v25 = vld [vmem:[%s430_s12 + $0x8] sm:$0xff]  ;;  %v431_v26 = vld [vmem:[%s430_s12] sm:$0xff]  ;;  %s6698_s13 = smov 2   ;;  %v630_v57 = vld [vmem:[%s3640_s22 + $0x10] sm:$0xff]  ;;  %s3364_s19 = smov 1  }
  0x4c   : >> { %6749 = vst [vmem:[#allocation19_spill] sm:$0xff] %v3311_v9  ;;  %416 = vmatpush.msra.mxu0 %v360_v21  ;;  %2822 = vmatpush.msra.mxu1 %v432_v25  ;;  %v628_v45 = vld [vmem:[%s3640_s22] sm:$0xff]  ;;  %v629_v50 = vld [vmem:[%s3640_s22 + $0x8] sm:$0xff]  ;;  %v631_v63 = vld [vmem:[%s3640_s22 + $0x18] sm:$0xff]  ;;  %s3756_s18 = smul.u32 25, %s3355_s15  ;;  %s338_s15 = sadd.s32 1, %s3355_s15  }
  0x4d   : >> { %6750 = vst [vmem:[#allocation20_spill] sm:$0xff] %v3315_v10  ;;  %2823 = vmatpush.msra.mxu2 %v432_v25  ;;  %2824 = vmatpush.msra.mxu3 %v432_v25  ;;  %v640_v7 = vld [vmem:[%s3640_s22 + $0x60] sm:$0xff]  ;;  %v641_v5 = vld [vmem:[%s3640_s22 + $0x68] sm:$0xff]  ;;  %p6579_p4 = scmp.ge.s32.totalorder %s338_s15, 8  }
  0x4e   : >> { %6751 = vst [vmem:[#allocation21_spill] sm:$0xff] %v3319_v11  ;;  %527 = vmatpush.msrb.mxu0 %v432_v25  ;;  %2825 = vmatpush.msra.mxu1 %v431_v26  ;;  %s775_s21 = sadd.s32 1, %s3756_s18  ;;  %s693_s16 = sld [smem:[#allocation8 + %s3756_s18]] }
  0x4f   : >> { %6752 = vst [vmem:[#allocation22_spill] sm:$0xff] %v3323_v12  ;;  %2826 = vmatpush.msra.mxu2 %v431_v26  ;;  %2827 = vmatpush.msra.mxu3 %v431_v26  ;;  %s776_s20 = sld [smem:[#allocation8 + %s775_s21]]  ;;  %s858_s7 = sadd.s32 2, %s3756_s18 }
  0x50   : >> { %6753 = vst [vmem:[#allocation23_spill] sm:$0xff] %v3327_v13  ;;  %528 = vmatpush.msrb.mxu0 %v431_v26  ;;  %v632_v26 = vld [vmem:[%s3640_s22 + $0x20] sm:$0xff]  ;;  %s893_s29 = sadd.s32 3, %s3756_s18  ;;  %s859_s12 = sld [smem:[#allocation8 + %s858_s7]] }
  0x51   : >> { %6754 = vst [vmem:[#allocation24_spill] sm:$0xff] %v3331_v14  ;;  %s894_s17 = sld [smem:[#allocation8 + %s893_s29]]  ;;  %s976_s21 = sadd.s32 4, %s3756_s18 }
  0x52   : >> { %6755 = vst [vmem:[#allocation25_spill] sm:$0xff] %v3335_v15  ;;  %363 = vxpose.xlu0.b32.end [2/2] (short) (narrow) %v358_v22, 16  ;;  %s977_s7 = sld [smem:[#allocation8 + %s976_s21]]  ;;  %s1241_s21 = sadd.s32 7, %s3756_s18 }
  0x53   : > { %s2821_s4 = sshll.u32 (%p6579_p4), %s3426_s5, 7 }
  0xee   : >> { %v378_v23 = vpop.trf.xlu0 }
  0xef   : >> { %2795 = vmatmul.msk.f32.vlgmr.msra.gmra.mxu0 %vm394_vm4, %v378_v23 }
  0xf6   : >> { %v379_v24 = vpop.trf.xlu0 }
  0xf7   : >> { %2796 = vmatmul.msk.f32.gmra.mxu0 %vm394_vm4, %v379_v24 }
 0x16c   : >> { %v418_v27 = vpop.f32.mrf.mxu0 }
 0x16d   : >> { %v426_v28 = vmul.f32 0.2, %v418_v27  ;;  %vm424_vm5 = vcmp.gt.f32.partialorder %v418_v27, 0.0 }
 0x16f   : >> { %v428_v29 = vsel %vm424_vm5, %v418_v27, %v426_v28 }
 0x170   : >> { %433 = vxpose.xlu1.b32.start [1/2] (short) %v428_v29, 128 }
 0x174   : >> { %v421_v30 = vpop.f32.mrf.mxu0 }
 0x175   : >> { %v427_v31 = vmul.f32 0.2, %v421_v30  ;;  %vm425_vm6 = vcmp.gt.f32.partialorder %v421_v30, 0.0 }
 0x177   : >> { %v429_v32 = vsel %vm425_vm6, %v421_v30, %v427_v31 }
 0x178   : >> { %434 = vxpose.xlu1.b32.end [2/2] (short) %v429_v32, 128 }
 0x214   : >> { %v449_v33 = vpop.trf.xlu1 }
 0x215   : >> { %2797 = vmatmul.msk.f32.vlgmr.msrb.gmra.mxu0 %vm394_vm4, %v449_v33 }
 0x21c   : >> { %v450_v34 = vpop.trf.xlu1 }
 0x21d   : >> { %2798 = vmatmul.msk.f32.vlgmr.msra.gmra.mxu1 %vm394_vm4, %v450_v34 }
 0x224   : >> { %v451_v35 = vpop.trf.xlu1 }
 0x225   : >> { %2799 = vmatmul.msk.f32.gmra.mxu1 %vm394_vm4, %v451_v35  ;;  %v633_v35 = vld [vmem:[%s3640_s22 + $0x28] sm:$0xff] }
 0x22c   : >> { %v452_v36 = vpop.trf.xlu1 }
 0x22d   : >> { %2800 = vmatmul.msk.f32.gmra.mxu1 %vm394_vm4, %v452_v36 }
 0x234   : >> { %v453_v37 = vpop.trf.xlu1 }
 0x235   : >> { %2801 = vmatmul.msk.f32.gmra.mxu1 %vm394_vm4, %v453_v37 }
 0x23c   : >> { %v454_v38 = vpop.trf.xlu1 }
 0x23d   : >> { %2802 = vmatmul.msk.f32.gmra.mxu1 %vm394_vm4, %v454_v38 }
 0x244   : >> { %v455_v39 = vpop.trf.xlu1 }
 0x245   : >> { %2803 = vmatmul.msk.f32.vlgmr.msra.gmra.mxu2 %vm394_vm4, %v455_v39 }
 0x24c   : >> { %v456_v40 = vpop.trf.xlu1 }
 0x24d   : >> { %2804 = vmatmul.msk.f32.gmra.mxu2 %vm394_vm4, %v456_v40 }
 0x254   : >> { %v457_v41 = vpop.trf.xlu1 }
 0x255   : >> { %2805 = vmatmul.msk.f32.gmra.mxu2 %vm394_vm4, %v457_v41 }
 0x25c   : >> { %v458_v42 = vpop.trf.xlu1 }
 0x25d   : >> { %2806 = vmatmul.msk.f32.gmra.mxu2 %vm394_vm4, %v458_v42  ;;  %v634_v42 = vld [vmem:[%s3640_s22 + $0x30] sm:$0xff] }
 0x264   : >> { %v459_v54 = vpop.trf.xlu1 }
 0x265   : >> { %2807 = vmatmul.msk.f32.gmra.mxu2 %vm394_vm4, %v459_v54 }
 0x26c   : >> { %v460_v21 = vpop.trf.xlu1 }
 0x26d   : >> { %2808 = vmatmul.msk.f32.vlgmr.msra.gmra.mxu3 %vm394_vm4, %v460_v21 }
 0x274   : >> { %v461_v24 = vpop.trf.xlu1 }
 0x275   : >> { %2809 = vmatmul.msk.f32.gmra.mxu3 %vm394_vm4, %v461_v24 }
 0x27c   : >> { %v462_v32 = vpop.trf.xlu1 }
 0x27d   : >> { %2810 = vmatmul.msk.f32.gmra.mxu3 %vm394_vm4, %v462_v32 }
 0x284   : >> { %v463_v37 = vpop.trf.xlu1 }
 0x285   : >> { %2811 = vmatmul.msk.f32.gmra.mxu3 %vm394_vm4, %v463_v37 }
 0x28c   : >> { %v464_v40 = vpop.trf.xlu1 }
 0x28d   : >> { %2812 = vmatmul.msk.f32.gmra.mxu3 %vm394_vm4, %v464_v40 }
 0x292   : >> { %v530_v43 = vpop.f32.mrf.mxu0 }
 0x293   : >> { %vm578_vm7 = vcmp.gt.f32.partialorder %v530_v43, 0.0  ;;  %v594_v44 = vmul.f32 0.2, %v530_v43 }
 0x295   : >> { %v610_v46 = vsel %vm578_vm7, %v530_v43, %v594_v44 }
 0x296   : >> { %v3644_v47 = vadd.f32 %v628_v45, %v610_v46 }
 0x298   : >> { %660 = vst [vmem:[#allocation2 + $0x8] sm:$0xff] %v3644_v47 }
 0x29a   : >> { %v533_v48 = vpop.f32.mrf.mxu1 }
 0x29b   : >> { %vm579_vm8 = vcmp.gt.f32.partialorder %v533_v48, 0.0  ;;  %v595_v49 = vmul.f32 0.2, %v533_v48 }
 0x29d   : >> { %v611_v51 = vsel %vm579_vm8, %v533_v48, %v595_v49 }
 0x29e   : >> { %v3648_v52 = vadd.f32 %v629_v50, %v611_v51  ;;  %v635_v51 = vld [vmem:[%s3640_s22 + $0x38] sm:$0xff] }
 0x29f   : >> { %v3650_v53 = vld [vmem:[#allocation2 + $0x6] sm:$0xff] }
 0x2a0   : >> { %661 = vst [vmem:[#allocation2 + $0x10] sm:$0xff] %v3648_v52  ;;  %978 = vrot.lane.b32.xlu1 %v3650_v53, %s3361_s9  ;;  %895 = vrot.lane.b32.xlu0 %v3650_v53, %s3362_s30  ;;  %v3663_v60 = vld [vmem:[#allocation2 + $0x7] sm:$0xff] }
 0x2a1   : >> { %694 = vrot.lane.b32.xlu2 %v3650_v53, %s6698_s13 }
 0x2a2   : >> { %v536_v55 = vpop.f32.mrf.mxu1 }
 0x2a3   : >> { %vm580_vm9 = vcmp.gt.f32.partialorder %v536_v55, 0.0  ;;  %v596_v56 = vmul.f32 0.2, %v536_v55 }
 0x2a5   : >> { %v612_v58 = vsel %vm580_vm9, %v536_v55, %v596_v56 }
 0x2a6   : >> { %v3661_v59 = vadd.f32 %v630_v57, %v612_v58  ;;  %v3780_v58 = vstv %s693_s16  ;;  %s1075_s16 = sadd.s32 5, %s3756_s18 }
 0x2a7   : >> { %v3682_v19 = vld [vmem:[#allocation2 + $0xf] sm:$0xff]  ;;  %s1076_s29 = sld [smem:[#allocation8 + %s1075_s16]] }
 0x2a8   : >> { %1278 = vrot.lane.b32.xlu1 %v3663_v60, %s3362_s30  ;;  %1077 = vrot.lane.b32.xlu0 %v3663_v60, %s6698_s13  ;;  %662 = vst [vmem:[#allocation2 + $0x18] sm:$0xff] %v3661_v59  ;;  %v3684_v20 = vld [vmem:[#allocation2 + $0xe] sm:$0xff] }
 0x2a9   : >> { %777 = vrot.lane.b32.xlu2 %v3650_v53, %s3364_s19 }
 0x2aa   : >> { %v539_v61 = vpop.f32.mrf.mxu1 }
 0x2ab   : >> { %vm581_vm10 = vcmp.gt.f32.partialorder %v539_v61, 0.0  ;;  %v597_v62 = vmul.f32 0.2, %v539_v61 }
 0x2ad   : >> { %v613_v0 = vsel %vm581_vm10, %v539_v61, %v597_v62  ;;  %v3786_v62 = vstv %s776_s20  ;;  %s1158_s20 = sadd.s32 6, %s3756_s18 }
 0x2ae   : >> { %v3673_v1 = vadd.f32 %v631_v63, %v613_v0 }
 0x2af   : >> { %v1061_v22 = vld [vmem:[#allocation2 + $0x17] sm:$0xff] }
 0x2b0   : >> { %1543 = vrot.lane.b32.xlu1 %v3644_v47, %s3364_s19  ;;  %1361 = vrot.lane.b32.xlu0 %v3663_v60, %s3361_s9  ;;  %663 = vst [vmem:[#allocation2 + $0x20] sm:$0xff] %v3673_v1  ;;  %v678_v29 = vld [vmem:[#allocation2 + $0x16] sm:$0xff] }
 0x2b1   : >> { %1160 = vrot.lane.b32.xlu2 %v3663_v60, %s3364_s19 }
 0x2b2   : >> { %v542_v23 = vpop.f32.mrf.mxu1 }
 0x2b3   : >> { %vm582_vm11 = vcmp.gt.f32.partialorder %v542_v23, 0.0  ;;  %v598_v25 = vmul.f32 0.2, %v542_v23 }
 0x2b5   : >> { %v614_v27 = vsel %vm582_vm11, %v542_v23, %v598_v25 }
 0x2b6   : >> { %v3706_v28 = vadd.f32 %v632_v26, %v614_v27  ;;  %v636_v26 = vld [vmem:[%s3640_s22 + $0x40] sm:$0xff] }
 0x2b7   : >> { %v3713_v30 = vld [vmem:[#allocation2 + $0x1e] sm:$0xff] }
 0x2b8   : >> { %1162 = vrot.lane.b32.xlu1 %v3682_v19, %s3364_s19  ;;  %980 = vrot.lane.b32.xlu0 %v3684_v20, %s3361_s9  ;;  %664 = vst [vmem:[#allocation2 + $0x28] sm:$0xff] %v3706_v28  ;;  %v3731_v38 = vld [vmem:[#allocation2 + $0x1f] sm:$0xff] }
 0x2b9   : >> { %1460 = vrot.lane.b32.xlu2 %v3644_v47, %s6698_s13 }
 0x2ba   : >> { %v545_v31 = vpop.f32.mrf.mxu1 }
 0x2bb   : >> { %v599_v33 = vmul.f32 0.2, %v545_v31  ;;  %vm583_vm12 = vcmp.gt.f32.partialorder %v545_v31, 0.0 }
 0x2bd   : >> { %v615_v34 = vsel %vm583_vm12, %v545_v31, %v599_v33  ;;  %v3807_v31 = vstv %s894_s17  ;;  %s6757_s17 = smov 2  }
 0x2be   : >> { %v3722_v36 = vadd.f32 %v633_v35, %v615_v34 }
 0x2bf   : >> { %v3747_v45 = vld [vmem:[#allocation2 + $0x27] sm:$0xff] }
 0x2c0   : >> { %1462 = vrot.lane.b32.xlu1 %v3648_v52, %s6698_s13  ;;  %1280 = vrot.lane.b32.xlu0 %v3682_v19, %s3362_s30  ;;  %665 = vst [vmem:[#allocation2 + $0x30] sm:$0xff] %v3722_v36  ;;  %v3774_v57 = vld [vmem:[#allocation2 + $0x26] sm:$0xff] }
 0x2c1   : >> { %696 = vrot.lane.b32.xlu2 %v3684_v20, %s6698_s13 }
 0x2c7   : >> { %v3770_v56 = vld [vmem:[#allocation2 + $0x2f] sm:$0xff] }
 0x2c8   : >> { %1545 = vrot.lane.b32.xlu0 %v3648_v52, %s3364_s19  ;;  %1081 = vrot.lane.b32.xlu1 %v1061_v22, %s6698_s13  ;;  %v548_v39 = vpop.f32.mrf.mxu2 }
 0x2c9   : >> { %779 = vrot.lane.b32.xlu2 %v3684_v20, %s3364_s19  ;;  %v600_v41 = vmul.f32 0.2, %v548_v39  ;;  %vm584_vm13 = vcmp.gt.f32.partialorder %v548_v39, 0.0 }
 0x2cb   : >> { %v616_v43 = vsel %vm584_vm13, %v548_v39, %v600_v41  ;;  %v3820_v41 = vstv %s977_s7  ;;  %s1359_s7 = sadd.s32 9, %s3756_s18 }
 0x2cc   : >> { %v3739_v44 = vadd.f32 %v634_v42, %v616_v43 }
 0x2ce   : >> { %666 = vst [vmem:[#allocation2 + $0x38] sm:$0xff] %v3739_v44 }
 0x2d0   : >> { %1365 = vrot.lane.b32.xlu1 %v1061_v22, %s3361_s9  ;;  %698 = vrot.lane.b32.xlu0 %v678_v29, %s6698_s13  ;;  %v551_v48 = vpop.f32.mrf.mxu2 }
 0x2d1   : >> { %897 = vrot.lane.b32.xlu2 %v3684_v20, %s3362_s30  ;;  %v601_v49 = vmul.f32 0.2, %v551_v48  ;;  %vm585_vm14 = vcmp.gt.f32.partialorder %v551_v48, 0.0 }
 0x2d3   : >> { %v617_v50 = vsel %vm585_vm14, %v551_v48, %v601_v49 }
 0x2d4   : >> { %v3759_v54 = vadd.f32 %v635_v51, %v617_v50 }
 0x2d5   : >> { %v3818_v39 = vld [vmem:[#allocation2 + $0x36] sm:$0xff] }
 0x2d6   : >> { %667 = vst [vmem:[#allocation2 + $0x40] sm:$0xff] %v3759_v54 }
 0x2d8   : >> { %781 = vrot.lane.b32.xlu0 %v678_v29, %s3364_s19  ;;  %700 = vrot.lane.b32.xlu1 %v3713_v30, %s6698_s13  ;;  %v554_v21 = vpop.f32.mrf.mxu2 }
 0x2d9   : >> { %1079 = vrot.lane.b32.xlu2 %v3682_v19, %s6698_s13  ;;  %v602_v23 = vmul.f32 0.2, %v554_v21  ;;  %vm586_vm15 = vcmp.gt.f32.partialorder %v554_v21, 0.0 }
 0x2db   : >> { %v618_v25 = vsel %vm586_vm15, %v554_v21, %v602_v23 }
 0x2dc   : >> { %v3795_v27 = vadd.f32 %v636_v26, %v618_v25  ;;  %v3844_v25 = vld [vmem:[#allocation2 + $0x37] sm:$0xff] }
 0x2de   : >> { %668 = vst [vmem:[#allocation2 + $0x48] sm:$0xff] %v3795_v27 }
 0x2e0   : >> { %899 = vrot.lane.b32.xlu0 %v678_v29, %s3362_s30  ;;  %984 = vrot.lane.b32.xlu1 %v3713_v30, %s3361_s9 }
 0x2e1   : >> { %1363 = vrot.lane.b32.xlu2 %v3682_v19, %s3361_s9 }
 0x2e8   : >> { %1164 = vrot.lane.b32.xlu0 %v1061_v22, %s3364_s19  ;;  %1284 = vrot.lane.b32.xlu1 %v3731_v38, %s3362_s30 }
 0x2e9   : >> { %982 = vrot.lane.b32.xlu2 %v678_v29, %s3361_s9 }
 0x2f0   : >> { %1464 = vrot.lane.b32.xlu0 %v3661_v59, %s6698_s13  ;;  %1549 = vrot.lane.b32.xlu1 %v3673_v1, %s3364_s19 }
 0x2f1   : >> { %1282 = vrot.lane.b32.xlu2 %v1061_v22, %s3362_s30 }
 0x2f8   : >> { %1083 = vrot.lane.b32.xlu0 %v3731_v38, %s6698_s13  ;;  %1168 = vrot.lane.b32.xlu1 %v3747_v45, %s3364_s19 }
 0x2f9   : >> { %1547 = vrot.lane.b32.xlu2 %v3661_v59, %s3364_s19 }
 0x2fb   : >> { %v695_v46 = vpop.permute.xlu2 %694 }
 0x2fc   : >> { %v726_v61 = vsel %vm327_vm0, %v695_v46, 0.0 }
 0x2fd   : >> { %v743_v22 = vmul.f32 %v3780_v58, %v726_v61 }
 0x2ff   : >> { %v759_v29 = vadd.f32 %v3351_v3, %v743_v22 }
 0x300   : >> { %1367 = vrot.lane.b32.xlu0 %v3731_v38, %s3361_s9  ;;  %1468 = vrot.lane.b32.xlu1 %v3706_v28, %s6698_s13 }
 0x301   : >> { %783 = vrot.lane.b32.xlu2 %v3713_v30, %s3364_s19 }
 0x303   : >> { %v778_v55 = vpop.permute.xlu2 %777 }
 0x304   : >> { %v809_v63 = vsel %vm328_vm1, %v778_v55, 0.0 }
 0x305   : >> { %v826_v24 = vmul.f32 %v3786_v62, %v809_v63  ;;  %v557_v63 = vpop.f32.mrf.mxu2 }
 0x306   : >> { %v603_v23 = vmul.f32 0.2, %v557_v63  ;;  %vm587_vm4 = vcmp.gt.f32.partialorder %v557_v63, 0.0 }
 0x307   : >> { %v842_v32 = vadd.f32 %v826_v24, %v759_v29 }
 0x308   : >> { %785 = vrot.lane.b32.xlu0 %v3774_v57, %s3364_s19  ;;  %1087 = vrot.lane.b32.xlu1 %v3770_v56, %s6698_s13  ;;  %s1159_s13 = sld [smem:[#allocation8 + %s1158_s20]] }
 0x309   : >> { %901 = vrot.lane.b32.xlu2 %v3713_v30, %s3362_s30  ;;  %v3805_v30 = vstv %s859_s12  ;;  %s1242_s12 = sld [smem:[#allocation8 + %s1241_s21]]  ;;  %s1458_s21 = sadd.s32 10, %s3756_s18 }
 0x30a   : >> { %v861_v37 = vmul.f32 %v3805_v30, %v3650_v53  ;;  %v3830_v53 = vstv %s1076_s29  ;;  %s4603_s29 = sld [smem:[#allocation8 + %s1359_s7]] }
 0x30b   : >> { %v1161_v0 = vpop.permute.xlu2 %1160 }
 0x30c   : >> { %v877_v40 = vadd.f32 %v861_v37, %v842_v32  ;;  %v1192_v51 = vsel %vm328_vm1, %v1161_v0, 0.0  ;;  %v619_v32 = vsel %vm587_vm4, %v557_v63, %v603_v23 }
 0x30e   : >> { %v3835_v50 = vstv %s1159_s13  ;;  %s1276_s13 = sadd.s32 8, %s3756_s18 }
 0x30f   : >> { %v3842_v24 = vstv %s1242_s12  ;;  %v1209_v26 = vmul.f32 %v3835_v50, %v1192_v51  ;;  %s1277_s20 = sld [smem:[#allocation8 + %s1276_s13]] }
 0x310   : >> { %903 = vrot.lane.b32.xlu0 %v3774_v57, %s3362_s30  ;;  %1371 = vrot.lane.b32.xlu1 %v3770_v56, %s3361_s9  ;;  %s4630_s12 = sld [smem:[#allocation8 + %s1458_s21]]  ;;  %s1841_s21 = sadd.s32 15, %s3756_s18 }
 0x311   : >> { %1166 = vrot.lane.b32.xlu2 %v3731_v38, %s3364_s19 }
 0x312   : >> { %v896_v33 = vpop.permute.xlu0 %895  ;;  %v979_v3 = vpop.permute.xlu1 %978 }
 0x313   : >> { %v927_v34 = vsel %vm329_vm2, %v896_v33, 0.0  ;;  %v3813_v35 = vpop.permute.xlu2 %1460  ;;  %v1010_v42 = vsel %vm330_vm3, %v979_v3, 0.0  ;;  %v637_v33 = vld [vmem:[%s3640_s22 + $0x48] sm:$0xff] }
 0x314   : >> { %6756 = vst [vmem:[#allocation26_spill] sm:$0xff] %v3813_v35  ;;  %v944_v38 = vmul.f32 %v3807_v31, %v927_v34  ;;  %v1027_v46 = vmul.f32 %v3820_v41, %v1010_v42  ;;  %v3848_v0 = vadd.f32 %v637_v33, %v619_v32  ;;  %v1244_v34 = vmul.f32 %v3842_v24, %v3663_v60  ;;  %v643_v35 = vld [vmem:[%s3640_s22 + $0x78] sm:$0xff] }
 0x316   : >> { %v960_v43 = vadd.f32 %v944_v38, %v877_v40  ;;  %669 = vst [vmem:[#allocation2 + $0x50] sm:$0xff] %v3848_v0 }
 0x318   : >> { %986 = vrot.lane.b32.xlu0 %v3774_v57, %s3361_s9  ;;  %990 = vrot.lane.b32.xlu1 %v3818_v39, %s3361_s9  ;;  %v1043_v21 = vadd.f32 %v1027_v46, %v960_v43 }
 0x319   : >> { %1466 = vrot.lane.b32.xlu2 %v3673_v1, %s6757_s17 }
 0x31a   : >> { %v1078_v48 = vpop.permute.xlu0 %1077  ;;  %v3833_v49 = vpop.permute.xlu1 %1278 }
 0x31b   : >> { %v1109_v55 = vsel %vm327_vm0, %v1078_v48, 0.0  ;;  %v697_v61 = vpop.permute.xlu2 %696  ;;  %v3870_v48 = vld [vmem:[#allocation2 + $0x3f] sm:$0xff] }
 0x31c   : >> { %v1126_v22 = vmul.f32 %v3830_v53, %v1109_v55  ;;  %v727_v37 = vsel %vm327_vm0, %v697_v61, 0.0 }
 0x31d   : >> { %v744_v46 = vmul.f32 %v3780_v58, %v727_v37 }
 0x31e   : >> { %v1142_v29 = vadd.f32 %v1126_v22, %v1043_v21  ;;  %v560_v22 = vpop.f32.mrf.mxu2 }
 0x31f   : >> { %v760_v51 = vadd.f32 %v3347_v18, %v744_v46  ;;  %vm588_vm5 = vcmp.gt.f32.partialorder %v560_v22, 0.0  ;;  %v638_v18 = vld [vmem:[%s3640_s22 + $0x50] sm:$0xff] }
 0x320   : >> { %v1225_v3 = vadd.f32 %v1209_v26, %v1142_v29  ;;  %1286 = vrot.lane.b32.xlu0 %v3747_v45, %s3362_s30  ;;  %1290 = vrot.lane.b32.xlu1 %v3844_v25, %s3362_s30  ;;  %v604_v26 = vmul.f32 0.2, %v560_v22  ;;  %v862_v29 = vmul.f32 %v3805_v30, %v3684_v20 }
 0x321   : >> { %702 = vrot.lane.b32.xlu2 %v3774_v57, %s6757_s17 }
 0x322   : >> { %v3861_v38 = vadd.f32 %v1244_v34, %v1225_v3  ;;  %v3863_v40 = vpop.permute.xlu0 %1361  ;;  %v3865_v42 = vpop.permute.xlu1 %1543  ;;  %v620_v33 = vsel %vm588_vm5, %v560_v22, %v604_v26  ;;  %v3907_v22 = vld [vmem:[#allocation2 + $0x47] sm:$0xff] }
 0x323   : >> { %6758 = vst [vmem:[#allocation27_spill] sm:$0xff] %v3865_v42  ;;  %v780_v60 = vpop.permute.xlu2 %779  ;;  %v3886_v34 = vadd.f32 %v638_v18, %v620_v33  ;;  %v3912_v26 = vld [vmem:[#allocation2 + $0x2e] sm:$0xff] }
 0x324   : >> { %v810_v43 = vsel %vm328_vm1, %v780_v60, 0.0  ;;  %6760 = vst [vmem:[#allocation29_spill] sm:$0xff] %v3912_v26 }
 0x325   : >> { %v827_v57 = vmul.f32 %v3786_v62, %v810_v43  ;;  %670 = vst [vmem:[#allocation2 + $0x58] sm:$0xff] %v3886_v34 }
 0x327   : >> { %v843_v63 = vadd.f32 %v827_v57, %v760_v51 }
 0x328   : >> { %1551 = vrot.lane.b32.xlu0 %v3706_v28, %s3364_s19  ;;  %1174 = vrot.lane.b32.xlu1 %v3870_v48, %s3364_s19 }
 0x329   : >> { %1085 = vrot.lane.b32.xlu2 %v3747_v45, %s6757_s17  ;;  %v878_v3 = vadd.f32 %v862_v29, %v843_v63  ;;  %v1245_v29 = vmul.f32 %v3842_v24, %v3682_v19 }
 0x32a   : >> { %v981_v55 = vpop.permute.xlu0 %980  ;;  %v1163_v61 = vpop.permute.xlu1 %1162 }
 0x32b   : >> { %v898_v21 = vpop.permute.xlu2 %897  ;;  %v1011_v37 = vsel %vm330_vm3, %v981_v55, 0.0  ;;  %v1193_v51 = vsel %vm328_vm1, %v1163_v61, 0.0 }
 0x32c   : >> { %v928_v23 = vsel %vm329_vm2, %v898_v21, 0.0  ;;  %v1028_v46 = vmul.f32 %v3820_v41, %v1011_v37  ;;  %v3972_v4 = vld [vmem:[#allocation2 + $0x56] sm:$0xff] }
 0x32d   : >> { %v945_v32 = vmul.f32 %v3807_v31, %v928_v23 }
 0x32f   : >> { %v961_v60 = vadd.f32 %v945_v32, %v878_v3 }
 0x330   : >> { %1170 = vrot.lane.b32.xlu0 %v3770_v56, %s3364_s19  ;;  %1474 = vrot.lane.b32.xlu1 %v3759_v54, %s6757_s17 }
 0x331   : >> { %1369 = vrot.lane.b32.xlu2 %v3747_v45, %s3361_s9  ;;  %v1044_v63 = vadd.f32 %v1028_v46, %v961_v60  ;;  %v1210_v45 = vmul.f32 %v3835_v50, %v1193_v51  ;;  %v563_v46 = vpop.f32.mrf.mxu3  ;;  %v3940_v51 = vld [vmem:[#allocation2 + $0x4e] sm:$0xff] }
 0x332   : >> { %v3897_v20 = vpop.permute.xlu0 %1280  ;;  %v3899_v43 = vpop.permute.xlu1 %1462  ;;  %vm589_vm6 = vcmp.gt.f32.partialorder %v563_v46, 0.0 }
 0x333   : >> { %6759 = vst [vmem:[#allocation28_spill] sm:$0xff] %v3899_v43  ;;  %v1080_v57 = vpop.permute.xlu2 %1079 }
 0x334   : >> { %v1110_v55 = vsel %vm327_vm0, %v1080_v57, 0.0  ;;  %v605_v57 = vmul.f32 0.2, %v563_v46 }
 0x335   : >> { %v1127_v21 = vmul.f32 %v3830_v53, %v1110_v55 }
 0x336   : >> { %v621_v55 = vsel %vm589_vm6, %v563_v46, %v605_v57 }
 0x337   : >> { %v1143_v23 = vadd.f32 %v1127_v21, %v1044_v63  ;;  %v639_v63 = vld [vmem:[%s3640_s22 + $0x58] sm:$0xff] }
 0x338   : >> { %1470 = vrot.lane.b32.xlu0 %v3722_v36, %s6757_s17  ;;  %1093 = vrot.lane.b32.xlu1 %v3907_v22, %s6757_s17  ;;  %v3943_v21 = vadd.f32 %v639_v63, %v621_v55 }
 0x339   : >> { %v1226_v61 = vadd.f32 %v1210_v45, %v1143_v23  ;;  %704 = vrot.lane.b32.xlu2 %v3912_v26, %s6757_s17  ;;  %v566_v63 = vpop.f32.mrf.mxu3 }
 0x33a   : >> { %v3920_v32 = vpop.permute.xlu0 %1545  ;;  %v3922_v33 = vpop.permute.xlu1 %1081  ;;  %671 = vst [vmem:[#allocation2 + $0x60] sm:$0xff] %v3943_v21  ;;  %v606_v8 = vmul.f32 0.2, %v566_v63  ;;  %vm590_vm7 = vcmp.gt.f32.partialorder %v566_v63, 0.0 }
 0x33b   : >> { %6761 = vst [vmem:[#allocation30_spill] sm:$0xff] %v3920_v32  ;;  %v3924_v18 = vpop.permute.xlu2 %1363  ;;  %v3926_v3 = vadd.f32 %v1245_v29, %v1226_v61  ;;  %v3958_v29 = vld [vmem:[#allocation2 + $0x4f] sm:$0xff] }
 0x33c   : >> { %6762 = vst [vmem:[#allocation31_spill] sm:$0xff] %v3924_v18  ;;  %v622_v11 = vsel %vm590_vm7, %v566_v63, %v606_v8 }
 0x33d   : >> { %6763 = vst [vmem:[#allocation32_spill] sm:$0xff] %v3926_v3  ;;  %v3975_v10 = vadd.f32 %v640_v7, %v622_v11  ;;  %v3990_v7 = vld [vmem:[#allocation2 + $0x3e] sm:$0xff]  ;;  %v642_v3 = vld [vmem:[%s3640_s22 + $0x70] sm:$0xff]  ;;  %s1624_s22 = sadd.s32 12, %s3756_s18 }
 0x33e   : >> { %6767 = vst [vmem:[#allocation36_spill] sm:$0xff] %v3990_v7  ;;  %v3992_v11 = vld [vmem:[#allocation2 + $0x57] sm:$0xff]  ;;  %s1625_s16 = sld [smem:[#allocation8 + %s1624_s22]]  ;;  %s1541_s22 = sadd.s32 11, %s3756_s18 }
 0x33f   : >> { %672 = vst [vmem:[#allocation2 + $0x68] sm:$0xff] %v3975_v10  ;;  %s4692_s13 = sld [smem:[#allocation8 + %s1541_s22]]  ;;  %s1924_s22 = sadd.s32 16, %s3756_s18 }
 0x340   : >> { %789 = vrot.lane.b32.xlu0 %v3818_v39, %s3364_s19  ;;  %1377 = vrot.lane.b32.xlu1 %v3907_v22, %s3361_s9 }
 0x341   : >> { %787 = vrot.lane.b32.xlu2 %v3912_v26, %s3364_s19  ;;  %v569_v13 = vpop.f32.mrf.mxu3 }
 0x342   : >> { %v3934_v37 = vpop.permute.xlu0 %698  ;;  %v3936_v19 = vpop.permute.xlu1 %1365  ;;  %vm591_vm8 = vcmp.gt.f32.partialorder %v569_v13, 0.0  ;;  %v607_v14 = vmul.f32 0.2, %v569_v13 }
 0x343   : >> { %6764 = vst [vmem:[#allocation33_spill] sm:$0xff] %v3936_v19  ;;  %v3938_v60 = vpop.permute.xlu2 %982 }
 0x344   : >> { %v623_v32 = vsel %vm591_vm8, %v569_v13, %v607_v14  ;;  %v4022_v13 = vld [vmem:[#allocation2 + $0x46] sm:$0xff] }
 0x345   : >> { %6772 = vst [vmem:[#allocation41_spill] sm:$0xff] %v4022_v13  ;;  %v4024_v14 = vld [vmem:[#allocation2 + $0x5f] sm:$0xff] }
 0x348   : >> { %907 = vrot.lane.b32.xlu0 %v3818_v39, %s3362_s30  ;;  %996 = vrot.lane.b32.xlu1 %v3940_v51, %s3361_s9 }
 0x349   : >> { %905 = vrot.lane.b32.xlu2 %v3912_v26, %s3362_s30 }
 0x34a   : >> { %v3952_v45 = vpop.permute.xlu0 %781  ;;  %v3954_v23 = vpop.permute.xlu1 %700 }
 0x34b   : >> { %v3956_v61 = vpop.permute.xlu2 %1282 }
 0x350   : >> { %1089 = vrot.lane.b32.xlu0 %v3844_v25, %s6757_s17  ;;  %1296 = vrot.lane.b32.xlu1 %v3958_v29, %s3362_s30 }
 0x351   : >> { %988 = vrot.lane.b32.xlu2 %v3912_v26, %s3361_s9 }
 0x352   : >> { %v3966_v46 = vpop.permute.xlu0 %899  ;;  %v3968_v57 = vpop.permute.xlu1 %984 }
 0x353   : >> { %v3970_v55 = vpop.permute.xlu2 %1547 }
 0x354   : >> { %6765 = vst [vmem:[#allocation34_spill] sm:$0xff] %v3970_v55 }
 0x358   : >> { %1373 = vrot.lane.b32.xlu0 %v3844_v25, %s3361_s9  ;;  %915 = vrot.lane.b32.xlu1 %v3972_v4, %s3362_s30 }
 0x359   : >> { %1288 = vrot.lane.b32.xlu2 %v3770_v56, %s3362_s30 }
 0x35a   : >> { %v3984_v6 = vpop.permute.xlu0 %1164  ;;  %v3986_v9 = vpop.permute.xlu1 %1284 }
 0x35b   : >> { %6766 = vst [vmem:[#allocation35_spill] sm:$0xff] %v3986_v9  ;;  %v3988_v8 = vpop.permute.xlu2 %783  ;;  %v4011_v9 = vadd.f32 %v641_v5, %v623_v32 }
 0x35d   : >> { %673 = vst [vmem:[#allocation2 + $0x70] sm:$0xff] %v4011_v9 }
 0x360   : >> { %992 = vrot.lane.b32.xlu0 %v3990_v7, %s3361_s9  ;;  %1180 = vrot.lane.b32.xlu1 %v3992_v11, %s3364_s19 }
 0x361   : >> { %1553 = vrot.lane.b32.xlu2 %v3722_v36, %s3364_s19 }
 0x362   : >> { %v4000_v56 = vpop.permute.xlu0 %1464  ;;  %v4002_v63 = vpop.permute.xlu1 %1549 }
 0x363   : >> { %6768 = vst [vmem:[#allocation37_spill] sm:$0xff] %v4000_v56  ;;  %v4004_v12 = vpop.permute.xlu2 %901 }
 0x364   : >> { %6769 = vst [vmem:[#allocation38_spill] sm:$0xff] %v4002_v63 }
 0x368   : >> { %1292 = vrot.lane.b32.xlu0 %v3870_v48, %s3362_s30  ;;  %1480 = vrot.lane.b32.xlu1 %v3886_v34, %s6757_s17 }
 0x369   : >> { %706 = vrot.lane.b32.xlu2 %v3818_v39, %s6757_s17 }
 0x36a   : >> { %v4015_v26 = vpop.permute.xlu0 %1083  ;;  %v4017_v63 = vpop.permute.xlu1 %1168 }
 0x36b   : >> { %6770 = vst [vmem:[#allocation39_spill] sm:$0xff] %v4017_v63  ;;  %v4020_v55 = vpop.permute.xlu2 %1166 }
 0x36c   : >> { %6771 = vst [vmem:[#allocation40_spill] sm:$0xff] %v4020_v55 }
 0x370   : >> { %793 = vrot.lane.b32.xlu0 %v4022_v13, %s3364_s19  ;;  %1099 = vrot.lane.b32.xlu1 %v4024_v14, %s6757_s17 }
 0x371   : >> { %1172 = vrot.lane.b32.xlu2 %v3844_v25, %s3364_s19 }
 0x372   : >> { %v4032_v5 = vpop.permute.xlu0 %1367  ;;  %v4034_v39 = vpop.permute.xlu1 %1468 }
 0x373   : >> { %6773 = vst [vmem:[#allocation42_spill] sm:$0xff] %v4032_v5  ;;  %v4036_v32 = vpop.permute.xlu2 %1466  ;;  %v572_v5 = vpop.f32.mrf.mxu3 }
 0x374   : >> { %6774 = vst [vmem:[#allocation43_spill] sm:$0xff] %v4034_v39  ;;  %v608_v42 = vmul.f32 0.2, %v572_v5  ;;  %v4050_v39 = vld [vmem:[#allocation2 + $0x66] sm:$0xff]  ;;  %vm592_vm9 = vcmp.gt.f32.partialorder %v572_v5, 0.0 }
 0x375   : >> { %6775 = vst [vmem:[#allocation44_spill] sm:$0xff] %v4036_v32 }
 0x376   : >> { %v624_v32 = vsel %vm592_vm9, %v572_v5, %v608_v42 }
 0x377   : >> { %v4053_v56 = vadd.f32 %v642_v3, %v624_v32  ;;  %v4068_v3 = vld [vmem:[#allocation2 + $0x67] sm:$0xff] }
 0x378   : >> { %911 = vrot.lane.b32.xlu0 %v4022_v13, %s3362_s30  ;;  %1383 = vrot.lane.b32.xlu1 %v4024_v14, %s3361_s9 }
 0x379   : >> { %1472 = vrot.lane.b32.xlu2 %v3739_v44, %s6757_s17  ;;  %674 = vst [vmem:[#allocation2 + $0x78] sm:$0xff] %v4053_v56 }
 0x37a   : >> { %v4044_v63 = vpop.permute.xlu0 %785  ;;  %v4046_v43 = vpop.permute.xlu1 %1087 }
 0x37b   : >> { %6776 = vst [vmem:[#allocation45_spill] sm:$0xff] %v4046_v43  ;;  %v4048_v25 = vpop.permute.xlu2 %702 }
 0x380   : >> { %1176 = vrot.lane.b32.xlu0 %v3907_v22, %s3364_s19  ;;  %1002 = vrot.lane.b32.xlu1 %v4050_v39, %s3361_s9 }
 0x381   : >> { %708 = vrot.lane.b32.xlu2 %v3990_v7, %s6757_s17 }
 0x382   : >> { %v4062_v43 = vpop.permute.xlu0 %903  ;;  %v4064_v55 = vpop.permute.xlu1 %1371 }
 0x383   : >> { %6777 = vst [vmem:[#allocation46_spill] sm:$0xff] %v4062_v43  ;;  %v4066_v42 = vpop.permute.xlu2 %1085 }
 0x384   : >> { %6778 = vst [vmem:[#allocation47_spill] sm:$0xff] %v4064_v55  ;;  %v575_v55 = vpop.f32.mrf.mxu3 }
 0x385   : >> { %6779 = vst [vmem:[#allocation48_spill] sm:$0xff] %v4066_v42  ;;  %v609_v18 = vmul.f32 0.2, %v575_v55  ;;  %v4082_v42 = vld [vmem:[#allocation2 + $0x6e] sm:$0xff]  ;;  %vm593_vm10 = vcmp.gt.f32.partialorder %v575_v55, 0.0 }
 0x387   : >> { %v625_v19 = vsel %vm593_vm10, %v575_v55, %v609_v18  ;;  %v4100_v18 = vld [vmem:[#allocation2 + $0x6f] sm:$0xff] }
 0x388   : >> { %1476 = vrot.lane.b32.xlu0 %v3795_v27, %s6757_s17  ;;  %1302 = vrot.lane.b32.xlu1 %v4068_v3, %s3362_s30  ;;  %v4085_v15 = vadd.f32 %v643_v35, %v625_v19 }
 0x389   : >> { %791 = vrot.lane.b32.xlu2 %v3990_v7, %s3364_s19 }
 0x38a   : >> { %v4076_v5 = vpop.permute.xlu0 %986  ;;  %v4078_v32 = vpop.permute.xlu1 %990  ;;  %675 = vst [vmem:[#allocation2 + $0x80] sm:$0xff] %v4085_v15 }
 0x38b   : >> { %6780 = vst [vmem:[#allocation49_spill] sm:$0xff] %v4076_v5  ;;  %v4080_v43 = vpop.permute.xlu2 %1369 }
 0x38c   : >> { %6781 = vst [vmem:[#allocation50_spill] sm:$0xff] %v4078_v32 }
 0x38d   : >> { %6782 = vst [vmem:[#allocation51_spill] sm:$0xff] %v4080_v43 }
 0x390   : >> { %1095 = vrot.lane.b32.xlu0 %v3958_v29, %s6757_s17  ;;  %921 = vrot.lane.b32.xlu1 %v4082_v42, %s3362_s30 }
 0x391   : >> { %909 = vrot.lane.b32.xlu2 %v3990_v7, %s3362_s30 }
 0x392   : >> { %v4094_v32 = vpop.permute.xlu0 %1286  ;;  %v4096_v43 = vpop.permute.xlu1 %1290 }
 0x393   : >> { %6783 = vst [vmem:[#allocation52_spill] sm:$0xff] %v4094_v32  ;;  %v4098_v5 = vpop.permute.xlu2 %704 }
 0x394   : >> { %6784 = vst [vmem:[#allocation53_spill] sm:$0xff] %v4096_v43 }
 0x395   : >> { %6785 = vst [vmem:[#allocation54_spill] sm:$0xff] %v4098_v5 }
 0x398   : >> { %1379 = vrot.lane.b32.xlu0 %v3958_v29, %s3361_s9  ;;  %1186 = vrot.lane.b32.xlu1 %v4100_v18, %s3364_s19 }
 0x399   : >> { %1091 = vrot.lane.b32.xlu2 %v3870_v48, %s6757_s17 }
 0x39a   : >> { %v4108_v35 = vpop.permute.xlu0 %1551  ;;  %v4110_v19 = vpop.permute.xlu1 %1174 }
 0x39b   : >> { %6786 = vst [vmem:[#allocation55_spill] sm:$0xff] %v4108_v35  ;;  %v4112_v55 = vpop.permute.xlu2 %787  ;;  %v4126_v35 = vld [vmem:[#allocation2 + $0x77] sm:$0xff] }
 0x39c   : >> { %6787 = vst [vmem:[#allocation56_spill] sm:$0xff] %v4110_v19 }
 0x39d   : >> { %6788 = vst [vmem:[#allocation57_spill] sm:$0xff] %v4112_v55 }
 0x3a0   : >> { %797 = vrot.lane.b32.xlu0 %v3972_v4, %s3364_s19  ;;  %1486 = vrot.lane.b32.xlu1 %v4011_v9, %s6757_s17 }
 0x3a1   : >> { %1375 = vrot.lane.b32.xlu2 %v3870_v48, %s3361_s9 }
 0x3a2   : >> { %v4120_v43 = vpop.permute.xlu0 %1170  ;;  %v4122_v5 = vpop.permute.xlu1 %1474 }
 0x3a3   : >> { %6789 = vst [vmem:[#allocation58_spill] sm:$0xff] %v4120_v43  ;;  %v4124_v7 = vpop.permute.xlu2 %905 }
 0x3a4   : >> { %6790 = vst [vmem:[#allocation59_spill] sm:$0xff] %v4122_v5 }
 0x3a5   : >> { %6791 = vst [vmem:[#allocation60_spill] sm:$0xff] %v4124_v7 }
 0x3a8   : >> { %998 = vrot.lane.b32.xlu0 %v3972_v4, %s3361_s9  ;;  %1105 = vrot.lane.b32.xlu1 %v4126_v35, %s6757_s17 }
 0x3a9   : >> { %710 = vrot.lane.b32.xlu2 %v4022_v13, %s6757_s17 }
 0x3aa   : >> { %v4134_v19 = vpop.permute.xlu0 %1470  ;;  %v4136_v48 = vpop.permute.xlu1 %1093 }
 0x3ab   : >> { %6792 = vst [vmem:[#allocation61_spill] sm:$0xff] %v4134_v19  ;;  %v4138_v43 = vpop.permute.xlu2 %988  ;;  %v4152_v19 = vld [vmem:[#allocation2 + $0x5e] sm:$0xff] }
 0x3ac   : >> { %6793 = vst [vmem:[#allocation62_spill] sm:$0xff] %v4136_v48  ;;  %v4154_v48 = vld [vmem:[#allocation2 + $0x7e] sm:$0xff] }
 0x3ad   : >> { %6794 = vst [vmem:[#allocation63_spill] sm:$0xff] %v4138_v43 }
 0x3b0   : >> { %1298 = vrot.lane.b32.xlu0 %v3992_v11, %s3362_s30  ;;  %1389 = vrot.lane.b32.xlu1 %v4126_v35, %s3361_s9 }
 0x3b1   : >> { %994 = vrot.lane.b32.xlu2 %v4022_v13, %s3361_s9 }
 0x3b2   : >> { %v4146_v5 = vpop.permute.xlu0 %789  ;;  %v4148_v7 = vpop.permute.xlu1 %1377 }
 0x3b3   : >> { %6795 = vst [vmem:[#allocation64_spill] sm:$0xff] %v4146_v5  ;;  %v4150_v55 = vpop.permute.xlu2 %1288 }
 0x3b4   : >> { %6796 = vst [vmem:[#allocation65_spill] sm:$0xff] %v4148_v7 }
 0x3b5   : >> { %6797 = vst [vmem:[#allocation66_spill] sm:$0xff] %v4150_v55  ;;  %v4168_v55 = vld [vmem:[#allocation2 + $0x7f] sm:$0xff] }
 0x3b8   : >> { %917 = vrot.lane.b32.xlu0 %v4152_v19, %s3362_s30  ;;  %1008 = vrot.lane.b32.xlu1 %v4154_v48, %s3361_s9 }
 0x3b9   : >> { %1294 = vrot.lane.b32.xlu2 %v3907_v22, %s3362_s30 }
 0x3ba   : >> { %v4162_v43 = vpop.permute.xlu0 %907  ;;  %v4164_v5 = vpop.permute.xlu1 %996 }
 0x3bb   : >> { %6798 = vst [vmem:[#allocation67_spill] sm:$0xff] %v4162_v43  ;;  %v4166_v7 = vpop.permute.xlu2 %1553 }
 0x3bc   : >> { %6799 = vst [vmem:[#allocation68_spill] sm:$0xff] %v4164_v5 }
 0x3bd   : >> { %6800 = vst [vmem:[#allocation69_spill] sm:$0xff] %v4166_v7 }
 0x3c0   : >> { %1182 = vrot.lane.b32.xlu0 %v4024_v14, %s3364_s19  ;;  %1308 = vrot.lane.b32.xlu1 %v4168_v55, %s3362_s30 }
 0x3c1   : >> { %712 = vrot.lane.b32.xlu2 %v3940_v51, %s6757_s17 }
 0x3c2   : >> { %v4176_v13 = vpop.permute.xlu0 %1089  ;;  %v4180_v43 = vpop.permute.xlu1 %1296 }
 0x3c3   : >> { %6801 = vst [vmem:[#allocation70_spill] sm:$0xff] %v4176_v13  ;;  %v4178_v22 = vpop.permute.xlu2 %706 }
 0x3c4   : >> { %6802 = vst [vmem:[#allocation71_spill] sm:$0xff] %v4178_v22 }
 0x3c5   : >> { %6803 = vst [vmem:[#allocation72_spill] sm:$0xff] %v4180_v43 }
 0x3c8   : >> { %1482 = vrot.lane.b32.xlu0 %v3943_v21, %s6757_s17  ;;  %1555 = vrot.lane.b32.xlu1 %v3739_v44, %s3364_s19 }
 0x3c9   : >> { %795 = vrot.lane.b32.xlu2 %v3940_v51, %s3364_s19 }
 0x3ca   : >> { %v4188_v7 = vpop.permute.xlu0 %1373  ;;  %v4192_v32 = vpop.permute.xlu1 %915 }
 0x3cb   : >> { %6804 = vst [vmem:[#allocation73_spill] sm:$0xff] %v4188_v7  ;;  %v4190_v5 = vpop.permute.xlu2 %1172 }
 0x3cc   : >> { %6805 = vst [vmem:[#allocation74_spill] sm:$0xff] %v4190_v5 }
 0x3cd   : >> { %6806 = vst [vmem:[#allocation75_spill] sm:$0xff] %v4192_v32 }
 0x3d0   : >> { %801 = vrot.lane.b32.xlu0 %v4050_v39, %s3364_s19  ;;  %1561 = vrot.lane.b32.xlu1 %v3848_v0, %s3364_s19 }
 0x3d1   : >> { %913 = vrot.lane.b32.xlu2 %v3940_v51, %s3362_s30 }
 0x3d2   : >> { %v4200_v43 = vpop.permute.xlu0 %992  ;;  %v4204_v22 = vpop.permute.xlu1 %1180 }
 0x3d3   : >> { %6807 = vst [vmem:[#allocation76_spill] sm:$0xff] %v4200_v43  ;;  %v4202_v13 = vpop.permute.xlu2 %1472 }
 0x3d4   : >> { %6808 = vst [vmem:[#allocation77_spill] sm:$0xff] %v4202_v13 }
 0x3d5   : >> { %6809 = vst [vmem:[#allocation78_spill] sm:$0xff] %v4204_v22 }
 0x3d8   : >> { %1101 = vrot.lane.b32.xlu0 %v4068_v3, %s6757_s17  ;;  %1567 = vrot.lane.b32.xlu1 %v3975_v10, %s3364_s19 }
 0x3d9   : >> { %1178 = vrot.lane.b32.xlu2 %v3958_v29, %s3364_s19 }
 0x3da   : >> { %v4212_v7 = vpop.permute.xlu0 %1292  ;;  %v4220_v51 = vpop.permute.xlu1 %1480 }
 0x3db   : >> { %6810 = vst [vmem:[#allocation79_spill] sm:$0xff] %v4212_v7  ;;  %v4214_v32 = vpop.permute.xlu2 %708 }
 0x3dc   : >> { %6811 = vst [vmem:[#allocation80_spill] sm:$0xff] %v4220_v51 }
 0x3e0   : >> { %1385 = vrot.lane.b32.xlu0 %v4068_v3, %s3361_s9  ;;  %1573 = vrot.lane.b32.xlu1 %v4085_v15, %s3364_s19 }
 0x3e1   : >> { %1478 = vrot.lane.b32.xlu2 %v3848_v0, %s6757_s17 }
 0x3e2   : >> { %v4224_v13 = vpop.permute.xlu0 %793  ;;  %v4236_v7 = vpop.permute.xlu1 %1099 }
 0x3e3   : >> { %6812 = vst [vmem:[#allocation81_spill] sm:$0xff] %v4224_v13  ;;  %v4226_v22 = vpop.permute.xlu2 %791 }
 0x3e4   : >> { %6814 = vst [vmem:[#allocation83_spill] sm:$0xff] %v4236_v7 }
 0x3e8   : >> { %1004 = vrot.lane.b32.xlu0 %v4082_v42, %s3361_s9  ;;  %1665 = vrot.lane.b32.xlu1 %v3661_v59, %s3362_s30 }
 0x3e9   : >> { %714 = vrot.lane.b32.xlu2 %v3972_v4, %s6757_s17 }
 0x3ea   : >> { %v4234_v29 = vpop.permute.xlu0 %911  ;;  %v4250_v4 = vpop.permute.xlu1 %1383 }
 0x3eb   : >> { %6813 = vst [vmem:[#allocation82_spill] sm:$0xff] %v4234_v29  ;;  %v4238_v51 = vpop.permute.xlu2 %909  ;;  %v4252_v29 = vld [vmem:[#allocation2 + $0x76] sm:$0xff] }
 0x3ec   : >> { %6815 = vst [vmem:[#allocation84_spill] sm:$0xff] %v4238_v51  ;;  %v3042_v51 = vld [vmem:[#allocation2 + $0x27] sm:$0xff] }
 0x3ed   : >> { %6818 = vst [vmem:[#allocation87_spill] sm:$0xff] %v4250_v4 }
 0x3f0   : >> { %1304 = vrot.lane.b32.xlu0 %v4100_v18, %s3362_s30  ;;  %1671 = vrot.lane.b32.xlu1 %v3722_v36, %s3362_s30 }
 0x3f1   : >> { %1097 = vrot.lane.b32.xlu2 %v3992_v11, %s6757_s17 }
 0x3f2   : >> { %v4246_v13 = vpop.permute.xlu0 %1176 }
 0x3f3   : >> { %6816 = vst [vmem:[#allocation85_spill] sm:$0xff] %v4246_v13  ;;  %v4248_v59 = vpop.permute.xlu2 %1091  ;;  %v4264_v13 = vpop.permute.xlu1 %1002 }
 0x3f4   : >> { %6817 = vst [vmem:[#allocation86_spill] sm:$0xff] %v4248_v59 }
 0x3f5   : >> { %6821 = vst [vmem:[#allocation90_spill] sm:$0xff] %v4264_v13 }
 0x3f8   : >> { %805 = vrot.lane.b32.xlu0 %v4252_v29, %s3364_s19  ;;  %1677 = vrot.lane.b32.xlu1 %v3795_v27, %s3362_s30 }
 0x3f9   : >> { %1381 = vrot.lane.b32.xlu2 %v3992_v11, %s3361_s9 }
 0x3fa   : >> { %v4260_v7 = vpop.permute.xlu0 %1476 }
 0x3fb   : >> { %6819 = vst [vmem:[#allocation88_spill] sm:$0xff] %v4260_v7  ;;  %v4262_v43 = vpop.permute.xlu2 %1375  ;;  %v4280_v11 = vpop.permute.xlu1 %1302 }
 0x3fc   : >> { %6820 = vst [vmem:[#allocation89_spill] sm:$0xff] %v4262_v43  ;;  %v4388_v43 = vld [vmem:[#allocation2 + $0x51] sm:$0xff] }
 0x3fd   : >> { %6824 = vst [vmem:[#allocation93_spill] sm:$0xff] %v4280_v11 }
 0x400   : >> { %923 = vrot.lane.b32.xlu0 %v4252_v29, %s3362_s30  ;;  %1683 = vrot.lane.b32.xlu1 %v3943_v21, %s3362_s30 }
 0x401   : >> { %716 = vrot.lane.b32.xlu2 %v4152_v19, %s6757_s17 }
 0x402   : >> { %v4272_v4 = vpop.permute.xlu0 %1095 }
 0x403   : >> { %6822 = vst [vmem:[#allocation91_spill] sm:$0xff] %v4272_v4  ;;  %v4274_v59 = vpop.permute.xlu2 %710 }
 0x404   : >> { %6823 = vst [vmem:[#allocation92_spill] sm:$0xff] %v4274_v59  ;;  %v4296_v59 = vpop.permute.xlu1 %921 }
 0x405   : >> { %6828 = vst [vmem:[#allocation97_spill] sm:$0xff] %v4296_v59 }
 0x408   : >> { %1188 = vrot.lane.b32.xlu0 %v4126_v35, %s3364_s19  ;;  %1689 = vrot.lane.b32.xlu1 %v4053_v56, %s3362_s30 }
 0x409   : >> { %799 = vrot.lane.b32.xlu2 %v4152_v19, %s3364_s19 }
 0x40a   : >> { %v4284_v7 = vpop.permute.xlu0 %1379 }
 0x40b   : >> { %6825 = vst [vmem:[#allocation94_spill] sm:$0xff] %v4284_v7  ;;  %v4286_v13 = vpop.permute.xlu2 %994 }
 0x40c   : >> { %6826 = vst [vmem:[#allocation95_spill] sm:$0xff] %v4286_v13 }
 0x410   : >> { %1488 = vrot.lane.b32.xlu0 %v4053_v56, %s6757_s17  ;;  %1746 = vrot.lane.b32.xlu1 %v3648_v52, %s3361_s9 }
 0x411   : >> { %1000 = vrot.lane.b32.xlu2 %v4152_v19, %s3361_s9  ;;  %v4310_v19 = vpop.permute.xlu1 %1186 }
 0x412   : >> { %v4294_v4 = vpop.permute.xlu0 %797  ;;  %6832 = vst [vmem:[#allocation101_spill] sm:$0xff] %v4310_v19  ;;  %v4374_v19 = vld [vmem:[#allocation2 + $0x39] sm:$0xff] }
 0x413   : >> { %6827 = vst [vmem:[#allocation96_spill] sm:$0xff] %v4294_v4  ;;  %v4298_v11 = vpop.permute.xlu2 %1294 }
 0x414   : >> { %6829 = vst [vmem:[#allocation98_spill] sm:$0xff] %v4298_v11 }
 0x418   : >> { %1107 = vrot.lane.b32.xlu0 %v4168_v55, %s6757_s17  ;;  %1752 = vrot.lane.b32.xlu1 %v3706_v28, %s3361_s9 }
 0x419   : >> { %1300 = vrot.lane.b32.xlu2 %v4024_v14, %s3362_s30  ;;  %v4322_v14 = vpop.permute.xlu1 %1486 }
 0x41a   : >> { %v4306_v13 = vpop.permute.xlu0 %998  ;;  %6835 = vst [vmem:[#allocation104_spill] sm:$0xff] %v4322_v14 }
 0x41b   : >> { %6830 = vst [vmem:[#allocation99_spill] sm:$0xff] %v4306_v13  ;;  %v4308_v52 = vpop.permute.xlu2 %712  ;;  %v4470_v13 = vld [vmem:[#allocation2 + $0x61] sm:$0xff] }
 0x41c   : >> { %6831 = vst [vmem:[#allocation100_spill] sm:$0xff] %v4308_v52 }
 0x41d   : >> { %6863 = vst [vmem:[#allocation132_spill] sm:$0xff] %v4470_v13 }
 0x420   : >> { %1391 = vrot.lane.b32.xlu0 %v4168_v55, %s3361_s9  ;;  %1758 = vrot.lane.b32.xlu1 %v3759_v54, %s3361_s9 }
 0x421   : >> { %718 = vrot.lane.b32.xlu2 %v4050_v39, %s6757_s17  ;;  %v4338_v14 = vpop.permute.xlu1 %1105 }
 0x422   : >> { %v4318_v11 = vpop.permute.xlu0 %1298 }
 0x423   : >> { %6833 = vst [vmem:[#allocation102_spill] sm:$0xff] %v4318_v11  ;;  %v4320_v28 = vpop.permute.xlu2 %795 }
 0x424   : >> { %6834 = vst [vmem:[#allocation103_spill] sm:$0xff] %v4320_v28 }
 0x428   : >> { %1557 = vrot.lane.b32.xlu0 %v3759_v54, %s3364_s19  ;;  %1764 = vrot.lane.b32.xlu1 %v3886_v34, %s3361_s9 }
 0x429   : >> { %919 = vrot.lane.b32.xlu2 %v4050_v39, %s3362_s30  ;;  %v4346_v39 = vld [vmem:[#allocation2 + $0x9] sm:$0xff] }
 0x42a   : >> { %v4330_v7 = vpop.permute.xlu0 %917 }
 0x42b   : >> { %6836 = vst [vmem:[#allocation105_spill] sm:$0xff] %v4330_v7  ;;  %v4332_v52 = vpop.permute.xlu2 %913 }
 0x42c   : >> { %6837 = vst [vmem:[#allocation106_spill] sm:$0xff] %v4332_v52  ;;  %v4356_v52 = vpop.permute.xlu1 %1389 }
 0x42d   : >> { %6841 = vst [vmem:[#allocation110_spill] sm:$0xff] %v4356_v52  ;;  %v4484_v52 = vld [vmem:[#allocation2 + $0x79] sm:$0xff] }
 0x42e   : >> { %6866 = vst [vmem:[#allocation135_spill] sm:$0xff] %v4484_v52 }
 0x430   : >> { %1563 = vrot.lane.b32.xlu0 %v3886_v34, %s3364_s19  ;;  %1770 = vrot.lane.b32.xlu1 %v4011_v9, %s3361_s9 }
 0x431   : >> { %1184 = vrot.lane.b32.xlu2 %v4068_v3, %s3364_s19 }
 0x432   : >> { %v4342_v54 = vpop.permute.xlu0 %1182 }
 0x433   : >> { %6838 = vst [vmem:[#allocation107_spill] sm:$0xff] %v4342_v54  ;;  %v4344_v28 = vpop.permute.xlu2 %1178  ;;  %v4360_v54 = vld [vmem:[#allocation2 + $0x21] sm:$0xff] }
 0x434   : >> { %6839 = vst [vmem:[#allocation108_spill] sm:$0xff] %v4344_v28 }
 0x438   : >> { %1569 = vrot.lane.b32.xlu0 %v4011_v9, %s3364_s19  ;;  %1843 = vrot.lane.b32.xlu1 %v4346_v39, %s6757_s17 }
 0x439   : >> { %1484 = vrot.lane.b32.xlu2 %v3975_v10, %s6757_s17 }
 0x43a   : >> { %v4354_v7 = vpop.permute.xlu0 %1482 }
 0x43b   : >> { %6840 = vst [vmem:[#allocation109_spill] sm:$0xff] %v4354_v7  ;;  %v4358_v3 = vpop.permute.xlu2 %1478  ;;  %v4372_v7 = vpop.permute.xlu1 %1008 }
 0x43c   : >> { %6842 = vst [vmem:[#allocation111_spill] sm:$0xff] %v4358_v3 }
 0x43d   : >> { %6844 = vst [vmem:[#allocation113_spill] sm:$0xff] %v4372_v7 }
 0x440   : >> { %1661 = vrot.lane.b32.xlu0 %v3644_v47, %s3362_s30  ;;  %1849 = vrot.lane.b32.xlu1 %v4360_v54, %s6757_s17 }
 0x441   : >> { %720 = vrot.lane.b32.xlu2 %v4082_v42, %s6757_s17 }
 0x442   : >> { %v4368_v28 = vpop.permute.xlu0 %801 }
 0x443   : >> { %6843 = vst [vmem:[#allocation112_spill] sm:$0xff] %v4368_v28  ;;  %v4370_v11 = vpop.permute.xlu2 %714  ;;  %v4386_v28 = vpop.permute.xlu1 %1308 }
 0x444   : >> { %6847 = vst [vmem:[#allocation116_spill] sm:$0xff] %v4386_v28 }
 0x448   : >> { %1667 = vrot.lane.b32.xlu0 %v3673_v1, %s3362_s30  ;;  %1855 = vrot.lane.b32.xlu1 %v4374_v19, %s6757_s17 }
 0x449   : >> { %803 = vrot.lane.b32.xlu2 %v4082_v42, %s3364_s19 }
 0x44a   : >> { %v4382_v47 = vpop.permute.xlu0 %1101 }
 0x44b   : >> { %6845 = vst [vmem:[#allocation114_spill] sm:$0xff] %v4382_v47  ;;  %v4384_v3 = vpop.permute.xlu2 %1097  ;;  %v4400_v47 = vld [vmem:[#allocation2 + $0x69] sm:$0xff]  ;;  %v4406_v28 = vpop.permute.xlu1 %1555 }
 0x44c   : >> { %6846 = vst [vmem:[#allocation115_spill] sm:$0xff] %v4384_v3 }
 0x44d   : >> { %6850 = vst [vmem:[#allocation119_spill] sm:$0xff] %v4406_v28 }
 0x450   : >> { %1673 = vrot.lane.b32.xlu0 %v3739_v44, %s3362_s30  ;;  %1861 = vrot.lane.b32.xlu1 %v4388_v43, %s6757_s17 }
 0x451   : >> { %1103 = vrot.lane.b32.xlu2 %v4100_v18, %s6757_s17 }
 0x452   : >> { %v4396_v1 = vpop.permute.xlu0 %1385 }
 0x453   : >> { %6848 = vst [vmem:[#allocation117_spill] sm:$0xff] %v4396_v1  ;;  %v4398_v42 = vpop.permute.xlu2 %1381  ;;  %v4414_v1 = vld [vmem:[#allocation2 + $0x81] sm:$0xff]  ;;  %v4424_v28 = vpop.permute.xlu1 %1561 }
 0x454   : >> { %6849 = vst [vmem:[#allocation118_spill] sm:$0xff] %v4398_v42  ;;  %v4428_v42 = vld [vmem:[#allocation2 + $0x19] sm:$0xff] }
 0x455   : >> { %6854 = vst [vmem:[#allocation123_spill] sm:$0xff] %v4424_v28  ;;  %v4442_v28 = vld [vmem:[#allocation2 + $0x31] sm:$0xff] }
 0x456   : >> { %6858 = vst [vmem:[#allocation127_spill] sm:$0xff] %v4442_v28 }
 0x458   : >> { %1679 = vrot.lane.b32.xlu0 %v3848_v0, %s3362_s30  ;;  %1867 = vrot.lane.b32.xlu1 %v4400_v47, %s6757_s17 }
 0x459   : >> { %1387 = vrot.lane.b32.xlu2 %v4100_v18, %s3361_s9 }
 0x45a   : >> { %v4410_v44 = vpop.permute.xlu0 %1004 }
 0x45b   : >> { %6851 = vst [vmem:[#allocation120_spill] sm:$0xff] %v4410_v44  ;;  %v4412_v7 = vpop.permute.xlu2 %716 }
 0x45c   : >> { %6852 = vst [vmem:[#allocation121_spill] sm:$0xff] %v4412_v7 }
 0x460   : >> { %1685 = vrot.lane.b32.xlu0 %v3975_v10, %s3362_s30  ;;  %1873 = vrot.lane.b32.xlu1 %v4414_v1, %s6757_s17 }
 0x461   : >> { %722 = vrot.lane.b32.xlu2 %v4252_v29, %s6757_s17 }
 0x462   : >> { %v4422_v0 = vpop.permute.xlu0 %1304 }
 0x463   : >> { %6853 = vst [vmem:[#allocation122_spill] sm:$0xff] %v4422_v0  ;;  %v4426_v18 = vpop.permute.xlu2 %799  ;;  %v4440_v0 = vpop.permute.xlu1 %1567 }
 0x464   : >> { %6855 = vst [vmem:[#allocation124_spill] sm:$0xff] %v4426_v18  ;;  %v4444_v18 = vld [vmem:[#allocation2 + $0x18] sm:$0xff] }
 0x465   : >> { %6857 = vst [vmem:[#allocation126_spill] sm:$0xff] %v4440_v0  ;;  %v4458_v0 = vld [vmem:[#allocation2 + $0x49] sm:$0xff] }
 0x466   : >> { %6861 = vst [vmem:[#allocation130_spill] sm:$0xff] %v4458_v0 }
 0x468   : >> { %1691 = vrot.lane.b32.xlu0 %v4085_v15, %s3362_s30  ;;  %1930 = vrot.lane.b32.xlu1 %v4428_v42, %s3364_s19 }
 0x469   : >> { %1006 = vrot.lane.b32.xlu2 %v4252_v29, %s3361_s9 }
 0x46a   : >> { %v4436_v10 = vpop.permute.xlu0 %805 }
 0x46b   : >> { %v4438_v7 = vpop.permute.xlu2 %1000 }
 0x46c   : >> { %6856 = vst [vmem:[#allocation125_spill] sm:$0xff] %v4438_v7  ;;  %v4456_v7 = vpop.permute.xlu1 %1573 }
 0x46d   : >> { %6860 = vst [vmem:[#allocation129_spill] sm:$0xff] %v4456_v7 }
 0x470   : >> { %1748 = vrot.lane.b32.xlu0 %v4444_v18, %s3361_s9  ;;  %1936 = vrot.lane.b32.xlu1 %v4442_v28, %s3364_s19 }
 0x471   : >> { %1306 = vrot.lane.b32.xlu2 %v4126_v35, %s3362_s30 }
 0x472   : >> { %v4452_v44 = vpop.permute.xlu0 %923 }
 0x473   : >> { %v4454_v3 = vpop.permute.xlu2 %1300 }
 0x474   : >> { %6859 = vst [vmem:[#allocation128_spill] sm:$0xff] %v4454_v3  ;;  %v4476_v3 = vpop.permute.xlu1 %1665 }
 0x478   : >> { %1754 = vrot.lane.b32.xlu0 %v3722_v36, %s3361_s9  ;;  %1942 = vrot.lane.b32.xlu1 %v4458_v0, %s3364_s19  ;;  %v4685_v0 = vld [vmem:[#allocation2 + $0x20] sm:$0xff] }
 0x479   : >> { %724 = vrot.lane.b32.xlu2 %v4154_v48, %s6757_s17 }
 0x47a   : >> { %v4466_v59 = vpop.permute.xlu0 %1188 }
 0x47b   : >> { %v4468_v35 = vpop.permute.xlu2 %718 }
 0x47c   : >> { %6862 = vst [vmem:[#allocation131_spill] sm:$0xff] %v4468_v35 }
 0x480   : >> { %1760 = vrot.lane.b32.xlu0 %v3795_v27, %s3361_s9  ;;  %1948 = vrot.lane.b32.xlu1 %v4470_v13, %s3364_s19  ;;  %v4494_v13 = vpop.permute.xlu1 %1671 }
 0x481   : >> { %807 = vrot.lane.b32.xlu2 %v4154_v48, %s3364_s19  ;;  %6868 = vst [vmem:[#allocation137_spill] sm:$0xff] %v4494_v13  ;;  %v4512_v13 = vld [vmem:[#allocation2 + $0x29] sm:$0xff] }
 0x482   : >> { %v4480_v36 = vpop.permute.xlu0 %1488  ;;  %6874 = vst [vmem:[#allocation143_spill] sm:$0xff] %v4512_v13 }
 0x483   : >> { %6864 = vst [vmem:[#allocation133_spill] sm:$0xff] %v4480_v36  ;;  %v4482_v7 = vpop.permute.xlu2 %919  ;;  %v4498_v36 = vld [vmem:[#allocation2 + $0x11] sm:$0xff] }
 0x484   : >> { %6865 = vst [vmem:[#allocation134_spill] sm:$0xff] %v4482_v7 }
 0x485   : >> { %6870 = vst [vmem:[#allocation139_spill] sm:$0xff] %v4498_v36 }
 0x488   : >> { %1766 = vrot.lane.b32.xlu0 %v3943_v21, %s3361_s9  ;;  %1954 = vrot.lane.b32.xlu1 %v4484_v52, %s3364_s19  ;;  %v1838_v52 = vld [vmem:[#allocation2 + $0x71] sm:$0xff] }
 0x489   : >> { %925 = vrot.lane.b32.xlu2 %v4154_v48, %s3362_s30 }
 0x48a   : >> { %v4492_v35 = vpop.permute.xlu0 %1107 }
 0x48b   : >> { %6867 = vst [vmem:[#allocation136_spill] sm:$0xff] %v4492_v35  ;;  %v4496_v5 = vpop.permute.xlu2 %1184  ;;  %v4510_v35 = vpop.permute.xlu1 %1677 }
 0x48c   : >> { %6869 = vst [vmem:[#allocation138_spill] sm:$0xff] %v4496_v5 }
 0x48d   : >> { %6873 = vst [vmem:[#allocation142_spill] sm:$0xff] %v4510_v35 }
 0x490   : >> { %1772 = vrot.lane.b32.xlu0 %v4053_v56, %s3361_s9  ;;  %2046 = vrot.lane.b32.xlu1 %v4498_v36, %s3362_s30 }
 0x491   : >> { %1190 = vrot.lane.b32.xlu2 %v4168_v55, %s3364_s19 }
 0x492   : >> { %v4506_v7 = vpop.permute.xlu0 %1391 }
 0x493   : >> { %6871 = vst [vmem:[#allocation140_spill] sm:$0xff] %v4506_v7  ;;  %v4508_v48 = vpop.permute.xlu2 %1484  ;;  %v4524_v7 = vpop.permute.xlu1 %1683 }
 0x494   : >> { %6872 = vst [vmem:[#allocation141_spill] sm:$0xff] %v4508_v48  ;;  %v1832_v48 = vld [vmem:[#allocation2 + $0x41] sm:$0xff] }
 0x495   : >> { %6877 = vst [vmem:[#allocation146_spill] sm:$0xff] %v4524_v7 }
 0x498   : >> { %1845 = vrot.lane.b32.xlu0 %v4498_v36, %s6757_s17  ;;  %2052 = vrot.lane.b32.xlu1 %v4512_v13, %s3362_s30 }
 0x499   : >> { %1490 = vrot.lane.b32.xlu2 %v4085_v15, %s6757_s17  ;;  %v1835_v15 = vld [vmem:[#allocation2 + $0x59] sm:$0xff] }
 0x49a   : >> { %v4520_v5 = vpop.permute.xlu0 %1557 }
 0x49b   : >> { %6875 = vst [vmem:[#allocation144_spill] sm:$0xff] %v4520_v5  ;;  %v4522_v55 = vpop.permute.xlu2 %720  ;;  %v4537_v5 = vpop.permute.xlu1 %1689 }
 0x49c   : >> { %6876 = vst [vmem:[#allocation145_spill] sm:$0xff] %v4522_v55  ;;  %v6897_v55 = vld [vmem:[#allocation40_spill] sm:$0xff] }
 0x49d   : >> { %6880 = vst [vmem:[#allocation149_spill] sm:$0xff] %v4537_v5  ;;  %v3039_v5 = vld [vmem:[#allocation2 + $0x1f] sm:$0xff] }
 0x4a0   : >> { %1851 = vrot.lane.b32.xlu0 %v4512_v13, %s6757_s17  ;;  %2058 = vrot.lane.b32.xlu1 %v1832_v48, %s3362_s30 }
 0x4a1   : >> { %1559 = vrot.lane.b32.xlu2 %v3795_v27, %s3364_s19  ;;  %v728_v27 = vsel %vm327_vm0, %v3934_v37, 0.0 }
 0x4a2   : >> { %v4531_v35 = vpop.permute.xlu0 %1563 }
 0x4a3   : >> { %6878 = vst [vmem:[#allocation147_spill] sm:$0xff] %v4531_v35  ;;  %v4533_v36 = vpop.permute.xlu2 %803 }
 0x4a4   : >> { %6879 = vst [vmem:[#allocation148_spill] sm:$0xff] %v4533_v36  ;;  %v4682_v36 = vmul.f32 %v3039_v5, %v3842_v24  ;;  %v813_v5 = vsel %vm328_vm1, %v4044_v63, 0.0  ;;  %v6893_v63 = vld [vmem:[#allocation26_spill] sm:$0xff] }
 0x4a8   : >> { %1857 = vrot.lane.b32.xlu0 %v1832_v48, %s6757_s17  ;;  %2064 = vrot.lane.b32.xlu1 %v1835_v15, %s3362_s30 }
 0x4a9   : >> { %1565 = vrot.lane.b32.xlu2 %v3943_v21, %s3364_s19  ;;  %v811_v21 = vsel %vm328_vm1, %v3952_v45, 0.0  ;;  %v929_v45 = vsel %vm329_vm2, %v3966_v46, 0.0 }
 0x4aa   : >> { %v4541_v7 = vpop.permute.xlu0 %1569 }
 0x4ab   : >> { %6881 = vst [vmem:[#allocation150_spill] sm:$0xff] %v4541_v7  ;;  %v4543_v13 = vpop.permute.xlu2 %1103  ;;  %v4557_v7 = vpop.permute.xlu1 %1746 }
 0x4ac   : >> { %6882 = vst [vmem:[#allocation151_spill] sm:$0xff] %v4543_v13  ;;  %v828_v13 = vmul.f32 %v3786_v62, %v811_v21 }
 0x4ad   : >> { %6884 = vst [vmem:[#allocation153_spill] sm:$0xff] %v4557_v7 }
 0x4b0   : >> { %1863 = vrot.lane.b32.xlu0 %v1835_v15, %s6757_s17  ;;  %2070 = vrot.lane.b32.xlu1 %v1838_v52, %s3362_s30  ;;  %v745_v15 = vmul.f32 %v3780_v58, %v728_v27 }
 0x4b1   : >> { %1571 = vrot.lane.b32.xlu2 %v4053_v56, %s3364_s19  ;;  %v3032_v56 = vld [vmem:[#allocation2 + $0x10] sm:$0xff] }
 0x4b2   : >> { %v4552_v48 = vpop.permute.xlu0 %1661  ;;  %v761_v37 = vadd.f32 %v3343_v17, %v745_v15  ;;  %v729_v17 = vsel %vm327_vm0, %v3954_v23, 0.0  ;;  %v812_v23 = vsel %vm328_vm1, %v3988_v8, 0.0  ;;  %v1111_v8 = vsel %vm327_vm0, %v3922_v33, 0.0 }
 0x4b3   : >> { %6883 = vst [vmem:[#allocation152_spill] sm:$0xff] %v4552_v48  ;;  %v4559_v35 = vpop.permute.xlu2 %1387  ;;  %v4581_v46 = vpop.permute.xlu1 %1752  ;;  %v930_v33 = vsel %vm329_vm2, %v4004_v12, 0.0  ;;  %v1310_v12 = vsel %vm329_vm2, %v3833_v49, 0.0 }
 0x4b4   : >> { %6885 = vst [vmem:[#allocation154_spill] sm:$0xff] %v4559_v35  ;;  %v844_v48 = vadd.f32 %v828_v13, %v761_v37  ;;  %v946_v35 = vmul.f32 %v3807_v31, %v929_v45  ;;  %v1012_v13 = vsel %vm330_vm3, %v3938_v60, 0.0  ;;  %v746_v37 = vmul.f32 %v3780_v58, %v729_v17 }
 0x4b5   : >> { %6887 = vst [vmem:[#allocation156_spill] sm:$0xff] %v4581_v46  ;;  %v1029_v60 = vmul.f32 %v3820_v41, %v1012_v13  ;;  %v829_v45 = vmul.f32 %v3786_v62, %v812_v23  ;;  %v3035_v46 = vld [vmem:[#allocation2 + $0x1e] sm:$0xff] }
 0x4b6   : >> { %v864_v23 = vmul.f32 %v3035_v46, %v3805_v30  ;;  %v730_v46 = vsel %vm327_vm0, %v4048_v25, 0.0  ;;  %v3038_v25 = vld [vmem:[#allocation2 + $0x17] sm:$0xff] }
 0x4b8   : >> { %1869 = vrot.lane.b32.xlu0 %v1838_v52, %s6757_s17  ;;  %2127 = vrot.lane.b32.xlu1 %v4346_v39, %s3361_s9  ;;  %v3033_v52 = vld [vmem:[#allocation2 + $0x16] sm:$0xff] }
 0x4b9   : >> { %1663 = vrot.lane.b32.xlu2 %v3032_v56, %s3362_s30  ;;  %v863_v15 = vmul.f32 %v3033_v52, %v3805_v30 }
 0x4ba   : >> { %v4571_v27 = vpop.permute.xlu0 %1667 }
 0x4bb   : >> { %6886 = vst [vmem:[#allocation155_spill] sm:$0xff] %v4571_v27  ;;  %v4573_v21 = vpop.permute.xlu2 %722  ;;  %v879_v7 = vadd.f32 %v863_v15, %v844_v48  ;;  %v4596_v48 = vld [vmem:[#allocation2 + $0x28] sm:$0xff]  ;;  %v1128_v15 = vmul.f32 %v3830_v53, %v1111_v8  ;;  %v4641_v8 = vld [vmem:[#allocation2 + $0x40] sm:$0xff] }
 0x4bd   : >> { %v962_v27 = vadd.f32 %v946_v35, %v879_v7  ;;  %v1194_v35 = vsel %vm328_vm1, %v3984_v6, 0.0 }
 0x4be   : >> { %v1211_v13 = vmul.f32 %v3835_v50, %v1194_v35 }
 0x4bf   : >> { %v1045_v52 = vadd.f32 %v1029_v60, %v962_v27  ;;  %v4632_v27 = vstv %s1277_s20  ;;  %v947_v60 = vmul.f32 %v3807_v31, %v930_v33  ;;  %s1742_s20 = sadd.s32 14, %s3756_s18 }
 0x4c0   : >> { %1926 = vrot.lane.b32.xlu0 %v4346_v39, %s3364_s19  ;;  %2133 = vrot.lane.b32.xlu1 %v4360_v54, %s3361_s9  ;;  %v762_v39 = vadd.f32 %v3339_v16, %v746_v37  ;;  %v4621_v16 = vstv %s1625_s16  ;;  %v4623_v37 = vpop.permute.xlu1 %1758  ;;  %s1659_s16 = sadd.s32 13, %s3756_s18 }
 0x4c1   : >> { %1669 = vrot.lane.b32.xlu2 %v4596_v48, %s3362_s30  ;;  %6889 = vst [vmem:[#allocation158_spill] sm:$0xff] %v4623_v37  ;;  %v1144_v6 = vadd.f32 %v1128_v15, %v1045_v52  ;;  %v4657_v52 = vstv %s4603_s29  ;;  %v1246_v15 = vmul.f32 %v3038_v25, %v3842_v24  ;;  %v1327_v37 = vmul.f32 %v4632_v27, %v1310_v12  ;;  %s4751_s7 = sld [smem:[#allocation8 + %s1659_s16]]  ;;  %s2007_s16 = sadd.s32 17, %s3756_s18 }
 0x4c2   : >> { %v4601_v7 = vpop.permute.xlu0 %1673  ;;  %v747_v25 = vmul.f32 %v3780_v58, %v730_v46  ;;  %v4689_v46 = vmul.f32 %v4685_v0, %v4621_v16  ;;  %s4801_s29 = sld [smem:[#allocation8 + %s1742_s20]]  ;;  %s2042_s20 = sadd.s32 18, %s3756_s18 }
 0x4c3   : >> { %6888 = vst [vmem:[#allocation157_spill] sm:$0xff] %v4601_v7  ;;  %v4613_v17 = vpop.permute.xlu2 %1006  ;;  %v845_v7 = vadd.f32 %v829_v45, %v762_v39  ;;  %v4645_v39 = vld [vmem:[#allocation2 + $0x8] sm:$0xff]  ;;  %v4654_v45 = vmul.f32 %v3032_v56, %v4621_v16  ;;  %v1013_v56 = vsel %vm330_vm3, %v3968_v57, 0.0 }
 0x4c4   : >> { %v4649_v35 = vmul.f32 %v4645_v39, %v4621_v16  ;;  %v3040_v57 = vld [vmem:[#allocation2 + $0x26] sm:$0xff] }
 0x4c5   : >> { %v880_v33 = vadd.f32 %v864_v23, %v845_v7  ;;  %v1312_v7 = vsel %vm329_vm2, %v3956_v61, 0.0  ;;  %v1030_v61 = vmul.f32 %v3820_v41, %v1013_v56  ;;  %v1492_v56 = vsel %vm327_vm0, %v6893_v63, 0.0 }
 0x4c6   : >> { %v830_v63 = vmul.f32 %v3786_v62, %v813_v5 }
 0x4c7   : >> { %v963_v23 = vadd.f32 %v947_v60, %v880_v33  ;;  %v1329_v33 = vmul.f32 %v4632_v27, %v1312_v7 }
 0x4c8   : >> { %1932 = vrot.lane.b32.xlu0 %v4360_v54, %s3364_s19  ;;  %2139 = vrot.lane.b32.xlu1 %v4374_v19, %s3361_s9  ;;  %v1227_v54 = vadd.f32 %v1211_v13, %v1144_v6  ;;  %v4662_v13 = vmul.f32 %v4444_v18, %v4621_v16  ;;  %v1393_v18 = vsel %vm330_vm3, %v3863_v40, 0.0  ;;  %v1343_v40 = vadd.f32 %v1327_v37, %v3861_v38  ;;  %v6892_v38 = vld [vmem:[#allocation25_spill] sm:$0xff]  ;;  %v4718_v7 = vpop.permute.xlu1 %1764 }
 0x4c9   : >> { %1675 = vrot.lane.b32.xlu2 %v4641_v8, %s3362_s30  ;;  %v763_v37 = vadd.f32 %v6892_v38, %v747_v25  ;;  %6895 = vst [vmem:[#allocation25_spill] sm:$0xff] %v4718_v7  ;;  %v6900_v7 = vld [vmem:[#allocation46_spill] sm:$0xff] }
 0x4ca   : >> { %v4651_v49 = vpop.permute.xlu0 %1679  ;;  %v1262_v12 = vadd.f32 %v1246_v15, %v1227_v54  ;;  %v1410_v54 = vmul.f32 %v4657_v52, %v1393_v18  ;;  %v1311_v15 = vsel %vm329_vm2, %v3897_v20, 0.0  ;;  %v6894_v18 = vld [vmem:[#allocation33_spill] sm:$0xff] }
 0x4cb   : >> { %6890 = vst [vmem:[#allocation159_spill] sm:$0xff] %v4651_v49  ;;  %v4664_v6 = vpop.permute.xlu2 %1306  ;;  %v1112_v49 = vsel %vm327_vm0, %v4015_v26, 0.0  ;;  %v865_v26 = vmul.f32 %v3040_v57, %v3805_v30  ;;  %v1395_v20 = vsel %vm330_vm3, %v6894_v18, 0.0  ;;  %v1046_v57 = vadd.f32 %v1030_v61, %v963_v23  ;;  %v6899_v61 = vld [vmem:[#allocation37_spill] sm:$0xff] }
 0x4cc   : >> { %6891 = vst [vmem:[#allocation160_spill] sm:$0xff] %v4664_v6  ;;  %v1129_v60 = vmul.f32 %v3830_v53, %v1112_v49  ;;  %v4710_v49 = vstv %s4630_s12  ;;  %v1345_v38 = vadd.f32 %v1329_v33, %v1262_v12  ;;  %v1195_v6 = vsel %vm328_vm1, %v6897_v55, 0.0  ;;  %s5201_s12 = sld [smem:[#allocation8 + %s1841_s21]]  ;;  %s2125_s21 = sadd.s32 19, %s3756_s18 }
 0x4cd   : >> { %v1328_v23 = vmul.f32 %v4632_v27, %v1311_v15  ;;  %v931_v12 = vsel %vm329_vm2, %v6900_v7, 0.0  ;;  %v1426_v55 = vadd.f32 %v1410_v54, %v1343_v40  ;;  %v1412_v5 = vmul.f32 %v4657_v52, %v1395_v20  ;;  %v6901_v15 = vld [vmem:[#allocation32_spill] sm:$0xff] }
 0x4ce   : >> { %v1145_v18 = vadd.f32 %v1129_v60, %v1046_v57  ;;  %v1212_v60 = vmul.f32 %v3835_v50, %v1195_v6  ;;  %v6902_v57 = vld [vmem:[#allocation49_spill] sm:$0xff]  ;;  %v1509_v40 = vmul.f32 %v4710_v49, %v1492_v56  ;;  %v4757_v20 = vstv %s4692_s13  ;;  %s5475_s13 = sld [smem:[#allocation8 + %s1924_s22]]  ;;  %s2224_s22 = sadd.s32 20, %s3756_s18 }
 0x4cf   : >> { %v1344_v28 = vadd.f32 %v1328_v23, %v6901_v15  ;;  %v1014_v7 = vsel %vm330_vm3, %v6902_v57, 0.0  ;;  %v1428_v54 = vadd.f32 %v1412_v5, %v1345_v38  ;;  %v4764_v23 = vmul.f32 %v4596_v48, %v4621_v16  ;;  %v6904_v57 = vld [vmem:[#allocation28_spill] sm:$0xff] }
 0x4d0   : >> { %1938 = vrot.lane.b32.xlu0 %v4374_v19, %s3364_s19  ;;  %2145 = vrot.lane.b32.xlu1 %v4388_v43, %s3361_s9  ;;  %v6896_v19 = vld [vmem:[#allocation31_spill] sm:$0xff]  ;;  %v1228_v6 = vadd.f32 %v1212_v60, %v1145_v18  ;;  %v1525_v15 = vadd.f32 %v1509_v40, %v1426_v55  ;;  %v1493_v56 = vsel %vm327_vm0, %v6904_v57, 0.0  ;;  %v6906_v55 = vld [vmem:[#allocation29_spill] sm:$0xff]  ;;  %v6910_v57 = vld [vmem:[#allocation30_spill] sm:$0xff] }
 0x4d1   : >> { %1681 = vrot.lane.b32.xlu2 %v3886_v34, %s3362_s30  ;;  %v1394_v25 = vsel %vm330_vm3, %v6896_v19, 0.0  ;;  %v1494_v34 = vsel %vm327_vm0, %v6899_v61, 0.0  ;;  %v846_v19 = vadd.f32 %v830_v63, %v763_v37  ;;  %v6903_v63 = vld [vmem:[#allocation27_spill] sm:$0xff]  ;;  %v4780_v5 = vmul.f32 %v3805_v30, %v6906_v55  ;;  %v3043_v60 = vld [vmem:[#allocation2 + $0x2f] sm:$0xff] }
 0x4d2   : >> { %v4730_v4 = vpop.permute.xlu0 %1685  ;;  %v1411_v61 = vmul.f32 %v4657_v52, %v1394_v25  ;;  %v1511_v37 = vmul.f32 %v4710_v49, %v1494_v34  ;;  %v1575_v25 = vsel %vm328_vm1, %v6903_v63, 0.0  ;;  %v1031_v34 = vmul.f32 %v3820_v41, %v1014_v7 }
 0x4d3   : >> { %6898 = vst [vmem:[#allocation26_spill] sm:$0xff] %v4730_v4  ;;  %v4739_v33 = vpop.permute.xlu2 %724  ;;  %v4743_v4 = vmul.f32 %v3042_v51, %v3842_v24  ;;  %v948_v51 = vmul.f32 %v3807_v31, %v931_v12  ;;  %v881_v38 = vadd.f32 %v865_v26, %v846_v19  ;;  %v6905_v12 = vld [vmem:[#allocation34_spill] sm:$0xff]  ;;  %v4783_v26 = vmul.f32 %v3043_v60, %v3842_v24  ;;  %v6908_v19 = vld [vmem:[#allocation35_spill] sm:$0xff]  ;;  %v4803_v60 = vpop.permute.xlu1 %1770 }
 0x4d4   : >> { %v1427_v18 = vadd.f32 %v1411_v61, %v1344_v28  ;;  %v1577_v48 = vsel %vm328_vm1, %v6905_v12, 0.0  ;;  %v1313_v28 = vsel %vm329_vm2, %v6908_v19, 0.0  ;;  %v1527_v61 = vadd.f32 %v1511_v37, %v1428_v54 }
 0x4d5   : >> { %6907 = vst [vmem:[#allocation33_spill] sm:$0xff] %v4783_v26  ;;  %v964_v7 = vadd.f32 %v948_v51, %v881_v38  ;;  %v1510_v63 = vmul.f32 %v4710_v49, %v1493_v56  ;;  %v1576_v12 = vsel %vm328_vm1, %v6910_v57, 0.0  ;;  %v1263_v55 = vadd.f32 %v4682_v36, %v1228_v6  ;;  %v6912_v56 = vld [vmem:[#allocation42_spill] sm:$0xff] }
 0x4d6   : >> { %v1594_v51 = vmul.f32 %v4757_v20, %v1577_v48  ;;  %v1396_v38 = vsel %vm330_vm3, %v6912_v56, 0.0  ;;  %v1330_v36 = vmul.f32 %v4632_v27, %v1313_v28  ;;  %v4813_v6 = vstv %s4751_s7  ;;  %s5785_s7 = sld [smem:[#allocation8 + %s2007_s16]] }
 0x4d7   : >> { %v1047_v19 = vadd.f32 %v1031_v34, %v964_v7  ;;  %v1526_v57 = vadd.f32 %v1510_v63, %v1427_v18  ;;  %v740_v48 = vsel %vm327_vm0, %v4573_v21, 0.0  ;;  %v1413_v28 = vmul.f32 %v4657_v52, %v1396_v38  ;;  %v3044_v63 = vld [vmem:[#allocation2 + $0x36] sm:$0xff] }
 0x4d8   : >> { %1944 = vrot.lane.b32.xlu0 %v4388_v43, %s3364_s19  ;;  %2151 = vrot.lane.b32.xlu1 %v4400_v47, %s3361_s9  ;;  %v1592_v43 = vmul.f32 %v4757_v20, %v1575_v25  ;;  %v1610_v26 = vadd.f32 %v1594_v51, %v1527_v61  ;;  %v1346_v18 = vadd.f32 %v1330_v36, %v1263_v55  ;;  %v3045_v21 = vld [vmem:[#allocation2 + $0x37] sm:$0xff] }
 0x4d9   : >> { %1687 = vrot.lane.b32.xlu2 %v4011_v9, %s3362_s30  ;;  %v6911_v9 = vld [vmem:[#allocation48_spill] sm:$0xff]  ;;  %v4846_v38 = vld [vmem:[#allocation2 + $0x38] sm:$0xff] }
 0x4da   : >> { %v4791_v40 = vpop.permute.xlu0 %1691  ;;  %v1113_v25 = vsel %vm327_vm0, %v6911_v9, 0.0  ;;  %v1608_v37 = vadd.f32 %v1592_v43, %v1525_v15  ;;  %v1695_v9 = vsel %vm329_vm2, %v4476_v3, 0.0  ;;  %v6913_v43 = vld [vmem:[#allocation39_spill] sm:$0xff]  ;;  %v4828_v3 = vmul.f32 %v3044_v63, %v3805_v30 }
 0x4db   : >> { %6909 = vst [vmem:[#allocation31_spill] sm:$0xff] %v4791_v40  ;;  %v4805_v54 = vpop.permute.xlu2 %807  ;;  %v1593_v40 = vmul.f32 %v4757_v20, %v1576_v12  ;;  %v1130_v15 = vmul.f32 %v3830_v53, %v1113_v25  ;;  %v1196_v34 = vsel %vm328_vm1, %v6913_v43, 0.0  ;;  %v1712_v61 = vmul.f32 %v4813_v6, %v1695_v9  ;;  %v6916_v43 = vld [vmem:[#allocation52_spill] sm:$0xff]  ;;  %v4873_v63 = vpop.permute.xlu1 %1843 }
 0x4dc   : >> { %v4836_v12 = vmul.f32 %v3045_v21, %v3842_v24  ;;  %v4839_v55 = vadd.f32 %v4649_v35, %v1608_v37  ;;  %v757_v25 = vmul.f32 %v3780_v58, %v740_v48  ;;  %v1213_v56 = vmul.f32 %v3835_v50, %v1196_v34  ;;  %v6915_v35 = vld [vmem:[#allocation44_spill] sm:$0xff]  ;;  %v6918_v21 = vld [vmem:[#allocation15_spill] sm:$0xff] }
 0x4dd   : >> { %v1146_v7 = vadd.f32 %v1130_v15, %v1047_v19  ;;  %v1609_v51 = vadd.f32 %v1593_v40, %v1526_v57  ;;  %v4850_v19 = vmul.f32 %v4846_v38, %v4621_v16  ;;  %v1429_v9 = vadd.f32 %v1413_v28, %v1346_v18  ;;  %v6917_v18 = vld [vmem:[#allocation36_spill] sm:$0xff] }
 0x4de   : >> { %v1495_v37 = vsel %vm327_vm0, %v6915_v35, 0.0  ;;  %v4856_v15 = vstv %s4801_s29  ;;  %v823_v57 = vsel %vm328_vm1, %v4436_v10, 0.0  ;;  %v1314_v34 = vsel %vm329_vm2, %v6916_v43, 0.0  ;;  %v6919_v10 = vld [vmem:[#allocation54_spill] sm:$0xff]  ;;  %s5815_s29 = sld [smem:[#allocation8 + %s2042_s20]]  ;;  %s2425_s20 = sadd.s32 23, %s3756_s18 }
 0x4df   : >> { %6914 = vst [vmem:[#allocation40_spill] sm:$0xff] %v4850_v19  ;;  %v4871_v28 = vmul.f32 %v3805_v30, %v6917_v18  ;;  %v6921_v43 = vld [vmem:[#allocation38_spill] sm:$0xff] }
 0x4e0   : >> { %1950 = vrot.lane.b32.xlu0 %v4400_v47, %s3364_s19  ;;  %2157 = vrot.lane.b32.xlu1 %v4414_v1, %s3361_s9  ;;  %v1645_v47 = vadd.f32 %v4662_v13, %v1610_v26  ;;  %v1229_v13 = vadd.f32 %v1213_v56, %v1146_v7  ;;  %v4877_v7 = vadd.f32 %v4654_v45, %v1609_v51  ;;  %v731_v56 = vsel %vm327_vm0, %v6919_v10, 0.0  ;;  %v2210_v45 = vld [vmem:[#allocation2 + $0x1a] sm:$0xff] }
 0x4e1   : >> { %1744 = vrot.lane.b32.xlu2 %v4645_v39, %s3361_s9  ;;  %v1578_v18 = vsel %vm328_vm1, %v6921_v43, 0.0  ;;  %v4894_v51 = vmul.f32 %v4641_v8, %v4621_v16  ;;  %v1331_v10 = vmul.f32 %v4632_v27, %v1314_v34 }
 0x4e2   : >> { %v1749_v36 = vpop.permute.xlu0 %1748  ;;  %v1728_v26 = vadd.f32 %v1712_v61, %v1645_v47  ;;  %v1512_v61 = vmul.f32 %v4710_v49, %v1495_v37  ;;  %v3047_v47 = vld [vmem:[#allocation2 + $0x3f] sm:$0xff]  ;;  %v1595_v34 = vmul.f32 %v4757_v20, %v1578_v18 }
 0x4e3   : >> { %v1778_v39 = vsel %vm330_vm3, %v1749_v36, 0.0  ;;  %v4860_v40 = vpop.permute.xlu2 %925  ;;  %v773_v36 = vadd.f32 %v6918_v21, %v757_v25  ;;  %v4884_v35 = vmul.f32 %v3047_v47, %v3842_v24  ;;  %v840_v25 = vmul.f32 %v3786_v62, %v823_v57  ;;  %v6922_v47 = vld [vmem:[#allocation57_spill] sm:$0xff] }
 0x4e4   : >> { %v1795_v48 = vmul.f32 %v4856_v15, %v1778_v39  ;;  %v1528_v37 = vadd.f32 %v1512_v61, %v1429_v9  ;;  %v1264_v21 = vadd.f32 %v4743_v4, %v1229_v13  ;;  %v748_v57 = vmul.f32 %v3780_v58, %v731_v56  ;;  %v6924_v9 = vld [vmem:[#allocation41_spill] sm:$0xff]  ;;  %v6926_v61 = vld [vmem:[#allocation43_spill] sm:$0xff] }
 0x4e5   : >> { %v4910_v4 = vmul.f32 %v3805_v30, %v6924_v9  ;;  %v856_v13 = vadd.f32 %v840_v25, %v773_v36  ;;  %v6928_v56 = vld [vmem:[#allocation45_spill] sm:$0xff] }
 0x4e6   : >> { %v4886_v39 = vadd.f32 %v1795_v48, %v1728_v26  ;;  %v814_v26 = vsel %vm328_vm1, %v6922_v47, 0.0  ;;  %v6923_v48 = vld [vmem:[#allocation71_spill] sm:$0xff]  ;;  %v1611_v25 = vadd.f32 %v1595_v34, %v1528_v37  ;;  %v1347_v9 = vadd.f32 %v1331_v10, %v1264_v21 }
 0x4e7   : >> { %v732_v8 = vsel %vm327_vm0, %v6923_v48, 0.0  ;;  %6925 = vst [vmem:[#allocation46_spill] sm:$0xff] %v4910_v4  ;;  %v6929_v47 = vld [vmem:[#allocation51_spill] sm:$0xff]  ;;  %v831_v36 = vmul.f32 %v3786_v62, %v814_v26  ;;  %v6932_v4 = vld [vmem:[#allocation60_spill] sm:$0xff]  ;;  %v1024_v21 = vsel %vm330_vm3, %v4613_v17, 0.0 }
 0x4e8   : >> { %6920 = vst [vmem:[#allocation37_spill] sm:$0xff] %v4886_v39  ;;  %1956 = vrot.lane.b32.xlu0 %v4414_v1, %s3364_s19  ;;  %2230 = vrot.lane.b32.xlu1 %v2210_v45, %s6757_s17  ;;  %v1496_v1 = vsel %vm327_vm0, %v6926_v61, 0.0  ;;  %v1114_v45 = vsel %vm327_vm0, %v6928_v56, 0.0  ;;  %v1397_v48 = vsel %vm330_vm3, %v6929_v47, 0.0  ;;  %v749_v61 = vmul.f32 %v3780_v58, %v732_v8  ;;  %v6933_v10 = vld [vmem:[#allocation55_spill] sm:$0xff] }
 0x4e9   : >> { %1750 = vrot.lane.b32.xlu2 %v4685_v0, %s3361_s9  ;;  %v875_v0 = vmul.f32 %v3805_v30, %v4252_v29  ;;  %v941_v39 = vsel %vm329_vm2, %v4452_v44, 0.0  ;;  %v1513_v56 = vmul.f32 %v4710_v49, %v1496_v1  ;;  %v4938_v26 = vmul.f32 %v3830_v53, %v1114_v45  ;;  %v4954_v1 = vpop.permute.xlu1 %1849  ;;  %v6936_v17 = vld [vmem:[#allocation23_spill] sm:$0xff] }
 0x4ea   : >> { %v4918_v43 = vpop.permute.xlu0 %1754  ;;  %v1414_v29 = vmul.f32 %v4657_v52, %v1397_v48  ;;  %v932_v37 = vsel %vm329_vm2, %v6932_v4, 0.0  ;;  %v1579_v44 = vsel %vm328_vm1, %v6933_v10, 0.0  ;;  %v958_v34 = vmul.f32 %v3807_v31, %v941_v39  ;;  %v6935_v4 = vld [vmem:[#allocation63_spill] sm:$0xff] }
 0x4eb   : >> { %6927 = vst [vmem:[#allocation32_spill] sm:$0xff] %v4918_v43  ;;  %v4929_v18 = vpop.permute.xlu2 %1190  ;;  %v6931_v43 = vld [vmem:[#allocation24_spill] sm:$0xff]  ;;  %v891_v47 = vadd.f32 %v875_v0, %v856_v13  ;;  %v1015_v48 = vsel %vm330_vm3, %v6935_v4, 0.0  ;;  %v765_v0 = vadd.f32 %v6936_v17, %v749_v61  ;;  %v6939_v61 = vld [vmem:[#allocation53_spill] sm:$0xff] }
 0x4ec   : >> { %6930 = vst [vmem:[#allocation49_spill] sm:$0xff] %v4929_v18  ;;  %v764_v19 = vadd.f32 %v6931_v43, %v748_v57  ;;  %v6934_v57 = vld [vmem:[#allocation64_spill] sm:$0xff]  ;;  %v2213_v43 = vld [vmem:[#allocation2 + $0x32] sm:$0xff]  ;;  %v1430_v45 = vadd.f32 %v1414_v29, %v1347_v9  ;;  %v4961_v18 = vadd.f32 %v4689_v46, %v1611_v25  ;;  %v1041_v29 = vmul.f32 %v3820_v41, %v1024_v21 }
 0x4ed   : >> { %v815_v13 = vsel %vm328_vm1, %v6934_v57, 0.0  ;;  %v974_v9 = vadd.f32 %v958_v34, %v891_v47  ;;  %v1316_v46 = vsel %vm329_vm2, %v6939_v61, 0.0  ;;  %v1596_v25 = vmul.f32 %v4757_v20, %v1579_v44  ;;  %v3048_v57 = vld [vmem:[#allocation2 + $0x4e] sm:$0xff]  ;;  %v6941_v47 = vld [vmem:[#allocation56_spill] sm:$0xff] }
 0x4ee   : >> { %v847_v8 = vadd.f32 %v831_v36, %v764_v19  ;;  %6937 = vst [vmem:[#allocation27_spill] sm:$0xff] %v4961_v18  ;;  %v6938_v19 = vld [vmem:[#allocation50_spill] sm:$0xff]  ;;  %v949_v36 = vmul.f32 %v3807_v31, %v932_v37  ;;  %v832_v10 = vmul.f32 %v3786_v62, %v815_v13  ;;  %v1199_v37 = vsel %vm328_vm1, %v6941_v47, 0.0  ;;  %v6978_v18 = vld [vmem:[#allocation132_spill] sm:$0xff] }
 0x4ef   : >> { %v1016_v39 = vsel %vm330_vm3, %v6938_v19, 0.0  ;;  %v1032_v21 = vmul.f32 %v3820_v41, %v1015_v48  ;;  %v3049_v34 = vld [vmem:[#allocation2 + $0x4f] sm:$0xff]  ;;  %v1529_v19 = vadd.f32 %v1513_v56, %v1430_v45  ;;  %v4998_v47 = vmul.f32 %v4632_v27, %v1316_v46 }
 0x4f0   : >> { %2048 = vrot.lane.b32.xlu0 %v4428_v42, %s3362_s30  ;;  %2236 = vrot.lane.b32.xlu1 %v2213_v43, %s6757_s17  ;;  %v4979_v43 = vmul.f32 %v3048_v57, %v3805_v30  ;;  %v4989_v17 = vmul.f32 %v3049_v34, %v3842_v24  ;;  %v1033_v13 = vmul.f32 %v3820_v41, %v1016_v39  ;;  %v1123_v57 = vsel %vm327_vm0, %v4338_v14, 0.0  ;;  %v3050_v39 = vld [vmem:[#allocation2 + $0x50] sm:$0xff] }
 0x4f1   : >> { %1756 = vrot.lane.b32.xlu2 %v4846_v38, %s3361_s9  ;;  %v882_v38 = vadd.f32 %v4780_v5, %v847_v8  ;;  %v848_v61 = vadd.f32 %v832_v10, %v765_v0  ;;  %v733_v8 = vsel %vm327_vm0, %v4214_v32, 0.0  ;;  %v1057_v48 = vadd.f32 %v1041_v29, %v974_v9  ;;  %v6944_v0 = vld [vmem:[#allocation67_spill] sm:$0xff]  ;;  %v2216_v9 = vld [vmem:[#allocation2 + $0x4a] sm:$0xff] }
 0x4f2   : >> { %v4981_v4 = vpop.permute.xlu0 %1760  ;;  %v1612_v34 = vadd.f32 %v1596_v25, %v1529_v19  ;;  %v5007_v56 = vmul.f32 %v3050_v39, %v4621_v16  ;;  %v933_v14 = vsel %vm329_vm2, %v6944_v0, 0.0  ;;  %v1140_v32 = vmul.f32 %v3830_v53, %v1123_v57  ;;  %v6947_v19 = vld [vmem:[#allocation58_spill] sm:$0xff]  ;;  %v6949_v0 = vld [vmem:[#allocation59_spill] sm:$0xff] }
 0x4f3   : >> { %6940 = vst [vmem:[#allocation28_spill] sm:$0xff] %v4981_v4  ;;  %v4991_v44 = vpop.permute.xlu2 %1490  ;;  %v965_v5 = vadd.f32 %v949_v36, %v882_v38  ;;  %v5004_v4 = vmul.f32 %v3835_v50, %v1199_v37  ;;  %v816_v36 = vsel %vm328_vm1, %v4226_v22, 0.0  ;;  %v883_v29 = vadd.f32 %v4828_v3, %v848_v61  ;;  %v6945_v37 = vld [vmem:[#allocation127_spill] sm:$0xff]  ;;  %v5030_v3 = vpop.permute.xlu1 %1855 }
 0x4f4   : >> { %6942 = vst [vmem:[#allocation34_spill] sm:$0xff] %v4991_v44  ;;  %v750_v46 = vmul.f32 %v3780_v58, %v733_v8  ;;  %v736_v25 = vsel %vm327_vm0, %v4370_v11, 0.0  ;;  %v1206_v10 = vsel %vm328_vm1, %v4466_v59, 0.0  ;;  %v3051_v22 = vld [vmem:[#allocation2 + $0x56] sm:$0xff]  ;;  %v1197_v11 = vsel %vm328_vm1, %v6947_v19, 0.0  ;;  %v6953_v44 = vld [vmem:[#allocation84_spill] sm:$0xff] }
 0x4f5   : >> { %6943 = vst [vmem:[#allocation29_spill] sm:$0xff] %v5007_v56  ;;  %v1048_v45 = vadd.f32 %v1032_v21, %v965_v5  ;;  %v5028_v38 = vmul.f32 %v3051_v22, %v3805_v30  ;;  %v1156_v21 = vadd.f32 %v1140_v32, %v1057_v48  ;;  %v950_v59 = vmul.f32 %v3807_v31, %v933_v14  ;;  %v3052_v57 = vld [vmem:[#allocation2 + $0x57] sm:$0xff] }
 0x4f6   : >> { %6946 = vst [vmem:[#allocation35_spill] sm:$0xff] %v5030_v3  ;;  %v833_v61 = vmul.f32 %v3786_v62, %v816_v36  ;;  %v5039_v5 = vmul.f32 %v3052_v57, %v3842_v24  ;;  %v1499_v48 = vsel %vm327_vm0, %v6949_v0, 0.0  ;;  %v6950_v32 = vld [vmem:[#allocation62_spill] sm:$0xff]  ;;  %v1223_v14 = vmul.f32 %v3835_v50, %v1206_v10 }
 0x4f7   : >> { %v1147_v36 = vadd.f32 %v4938_v26, %v1048_v45  ;;  %v966_v19 = vadd.f32 %v950_v59, %v883_v29  ;;  %v6952_v57 = vld [vmem:[#allocation22_spill] sm:$0xff]  ;;  %v934_v0 = vsel %vm329_vm2, %v6953_v44, 0.0  ;;  %v6955_v45 = vld [vmem:[#allocation160_spill] sm:$0xff] }
 0x4f8   : >> { %2054 = vrot.lane.b32.xlu0 %v6945_v37, %s3362_s30  ;;  %2242 = vrot.lane.b32.xlu1 %v2216_v9, %s6757_s17  ;;  %v753_v9 = vmul.f32 %v3780_v58, %v736_v25  ;;  %v766_v56 = vadd.f32 %v6952_v57, %v750_v46  ;;  %v1239_v3 = vadd.f32 %v1223_v14, %v1156_v21  ;;  %v1324_v29 = vsel %vm329_vm2, %v6955_v45, 0.0  ;;  %v6957_v44 = vld [vmem:[#allocation70_spill] sm:$0xff]  ;;  %v2219_v59 = vld [vmem:[#allocation2 + $0x62] sm:$0xff] }
 0x4f9   : >> { %1762 = vrot.lane.b32.xlu2 %v3050_v39, %s3361_s9  ;;  %v1117_v39 = vsel %vm327_vm0, %v6950_v32, 0.0  ;;  %v5060_v32 = vadd.f32 %v4764_v23, %v1612_v34  ;;  %v5063_v25 = vmul.f32 %v4710_v49, %v1499_v48  ;;  %v1115_v23 = vsel %vm327_vm0, %v6957_v44, 0.0  ;;  %v6958_v34 = vld [vmem:[#allocation19_spill] sm:$0xff]  ;;  %v6961_v57 = vld [vmem:[#allocation130_spill] sm:$0xff] }
 0x4fa   : >> { %v5041_v8 = vpop.permute.xlu0 %1766  ;;  %v849_v10 = vadd.f32 %v833_v61, %v766_v56  ;;  %v5072_v46 = vmul.f32 %v3830_v53, %v1117_v39  ;;  %v769_v21 = vadd.f32 %v6958_v34, %v753_v9  ;;  %v1049_v48 = vadd.f32 %v1033_v13, %v966_v19  ;;  %v5090_v34 = vld [vmem:[#allocation2 + $0x68] sm:$0xff] }
 0x4fb   : >> { %6948 = vst [vmem:[#allocation30_spill] sm:$0xff] %v5041_v8  ;;  %v5051_v22 = vpop.permute.xlu2 %1559  ;;  %v1214_v8 = vmul.f32 %v3835_v50, %v1197_v11  ;;  %v3053_v11 = vld [vmem:[#allocation2 + $0x77] sm:$0xff]  ;;  %v951_v14 = vmul.f32 %v3807_v31, %v934_v0  ;;  %v1341_v44 = vmul.f32 %v4632_v27, %v1324_v29  ;;  %v1132_v13 = vmul.f32 %v3830_v53, %v1115_v23  ;;  %v6964_v0 = vld [vmem:[#allocation148_spill] sm:$0xff] }
 0x4fc   : >> { %6951 = vst [vmem:[#allocation48_spill] sm:$0xff] %v5051_v22  ;;  %v6954_v22 = vld [vmem:[#allocation96_spill] sm:$0xff]  ;;  %v1258_v56 = vmul.f32 %v3053_v11, %v3842_v24  ;;  %v884_v19 = vadd.f32 %v4871_v28, %v849_v10 }
 0x4fd   : >> { %v819_v26 = vsel %vm328_vm1, %v6954_v22, 0.0  ;;  %6956 = vst [vmem:[#allocation42_spill] sm:$0xff] %v5072_v46  ;;  %v5079_v61 = vadd.f32 %v1214_v8, %v1147_v36  ;;  %v6960_v22 = vld [vmem:[#allocation145_spill] sm:$0xff]  ;;  %v6963_v8 = vld [vmem:[#allocation74_spill] sm:$0xff]  ;;  %v6965_v29 = vld [vmem:[#allocation76_spill] sm:$0xff]  ;;  %v1148_v10 = vadd.f32 %v1132_v13, %v1049_v48 }
 0x4fe   : >> { %v739_v39 = vsel %vm327_vm0, %v6960_v22, 0.0  ;;  %v836_v9 = vmul.f32 %v3786_v62, %v819_v26  ;;  %v1274_v45 = vadd.f32 %v1258_v56, %v1239_v3  ;;  %6962 = vst [vmem:[#allocation44_spill] sm:$0xff] %v5090_v34  ;;  %v1198_v36 = vsel %vm328_vm1, %v6963_v8, 0.0  ;;  %v6966_v56 = vld [vmem:[#allocation86_spill] sm:$0xff]  ;;  %v6973_v48 = vld [vmem:[#allocation75_spill] sm:$0xff] }
 0x4ff   : >> { %6959 = vst [vmem:[#allocation39_spill] sm:$0xff] %v5079_v61  ;;  %v822_v26 = vsel %vm328_vm1, %v6964_v0, 0.0  ;;  %v1017_v11 = vsel %vm330_vm3, %v6965_v29, 0.0  ;;  %v1116_v23 = vsel %vm327_vm0, %v6966_v56, 0.0  ;;  %v756_v22 = vmul.f32 %v3780_v58, %v739_v39  ;;  %v6969_v0 = vld [vmem:[#allocation110_spill] sm:$0xff] }
 0x500   : >> { %2060 = vrot.lane.b32.xlu0 %v6961_v57, %s3362_s30  ;;  %2248 = vrot.lane.b32.xlu1 %v2219_v59, %s6757_s17  ;;  %v852_v59 = vadd.f32 %v836_v9, %v769_v21  ;;  %v5111_v57 = vpop.permute.xlu1 %1861  ;;  %v967_v8 = vadd.f32 %v951_v14, %v884_v19  ;;  %v1407_v46 = vsel %vm330_vm3, %v6969_v0, 0.0  ;;  %v6970_v61 = vld [vmem:[#allocation66_spill] sm:$0xff]  ;;  %v839_v39 = vmul.f32 %v3786_v62, %v822_v26  ;;  %v6974_v0 = vld [vmem:[#allocation72_spill] sm:$0xff] }
 0x501   : >> { %1768 = vrot.lane.b32.xlu2 %v5090_v34, %s3361_s9  ;;  %6967 = vst [vmem:[#allocation52_spill] sm:$0xff] %v5111_v57  ;;  %v5121_v29 = vsel %vm329_vm2, %v6970_v61, 0.0  ;;  %v6972_v34 = vld [vmem:[#allocation68_spill] sm:$0xff]  ;;  %v1357_v9 = vadd.f32 %v1341_v44, %v1274_v45  ;;  %v1215_v56 = vmul.f32 %v3835_v50, %v1198_v36  ;;  %v937_v14 = vsel %vm329_vm2, %v6973_v48, 0.0  ;;  %v6976_v36 = vld [vmem:[#allocation73_spill] sm:$0xff] }
 0x502   : >> { %v5102_v3 = vpop.permute.xlu0 %1772  ;;  %6971 = vst [vmem:[#allocation15_spill] sm:$0xff] %v5121_v29  ;;  %v1019_v21 = vsel %vm330_vm3, %v6972_v34, 0.0  ;;  %v1034_v13 = vmul.f32 %v3820_v41, %v1017_v11  ;;  %v1133_v19 = vmul.f32 %v3830_v53, %v1116_v23  ;;  %v1319_v61 = vsel %vm329_vm2, %v6974_v0, 0.0  ;;  %v6975_v26 = vld [vmem:[#allocation16_spill] sm:$0xff]  ;;  %v6977_v11 = vld [vmem:[#allocation133_spill] sm:$0xff] }
 0x503   : >> { %v5113_v28 = vpop.permute.xlu2 %1565  ;;  %v887_v34 = vadd.f32 %v5028_v38, %v852_v59  ;;  %v772_v45 = vadd.f32 %v6975_v26, %v756_v22  ;;  %v2222_v44 = vld [vmem:[#allocation2 + $0x7a] sm:$0xff]  ;;  %v1399_v29 = vsel %vm330_vm3, %v6976_v36, 0.0  ;;  %v1231_v48 = vadd.f32 %v1215_v56, %v1148_v10  ;;  %v3057_v26 = vld [vmem:[#allocation2 + $0x6e] sm:$0xff] }
 0x504   : >> { %6968 = vst [vmem:[#allocation36_spill] sm:$0xff] %v5113_v28  ;;  %v1424_v28 = vmul.f32 %v4657_v52, %v1407_v46  ;;  %v1050_v57 = vadd.f32 %v1034_v13, %v967_v8  ;;  %v1506_v23 = vsel %vm327_vm0, %v6977_v11, 0.0  ;;  %v5149_v38 = vmul.f32 %v3820_v41, %v1019_v21  ;;  %v5152_v0 = vld [vmem:[#allocation2 + $0x80] sm:$0xff]  ;;  %v6980_v56 = vld [vmem:[#allocation99_spill] sm:$0xff]  ;;  %v6982_v36 = vld [vmem:[#allocation97_spill] sm:$0xff] }
 0x505   : >> { %v954_v46 = vmul.f32 %v3807_v31, %v937_v14  ;;  %v855_v59 = vadd.f32 %v839_v39, %v772_v45  ;;  %6979 = vst [vmem:[#allocation54_spill] sm:$0xff] %v5152_v0  ;;  %v5157_v10 = vmul.f32 %v4632_v27, %v1319_v61  ;;  %v3056_v13 = vld [vmem:[#allocation2 + $0x58] sm:$0xff]  ;;  %v874_v61 = vmul.f32 %v3057_v26, %v3805_v30 }
 0x506   : >> { %v1440_v22 = vadd.f32 %v1424_v28, %v1357_v9  ;;  %v1149_v8 = vadd.f32 %v1133_v19, %v1050_v57  ;;  %v5163_v14 = vmul.f32 %v3056_v13, %v4621_v16  ;;  %v1416_v28 = vmul.f32 %v4657_v52, %v1399_v29  ;;  %v6981_v19 = vld [vmem:[#allocation78_spill] sm:$0xff] }
 0x507   : >> { %v970_v39 = vadd.f32 %v954_v46, %v887_v34  ;;  %v1523_v9 = vmul.f32 %v4710_v49, %v1506_v23  ;;  %v1266_v57 = vadd.f32 %v4836_v12, %v1231_v48  ;;  %v940_v11 = vsel %vm329_vm2, %v6982_v36, 0.0  ;;  %v6984_v48 = vld [vmem:[#allocation77_spill] sm:$0xff] }
 0x508   : >> { %2066 = vrot.lane.b32.xlu0 %v6978_v18, %s3362_s30  ;;  %2254 = vrot.lane.b32.xlu1 %v2222_v44, %s6757_s17  ;;  %v1020_v18 = vsel %vm330_vm3, %v6980_v56, 0.0  ;;  %v1202_v44 = vsel %vm328_vm1, %v6981_v19, 0.0  ;;  %v890_v23 = vadd.f32 %v874_v61, %v855_v59  ;;  %v5179_v46 = vpop.permute.xlu1 %1867  ;;  %v1498_v13 = vsel %vm327_vm0, %v6984_v48, 0.0  ;;  %v6985_v19 = vld [vmem:[#allocation115_spill] sm:$0xff] }
 0x509   : >> { %1774 = vrot.lane.b32.xlu2 %v5152_v0, %s3361_s9  ;;  %v1037_v34 = vmul.f32 %v3820_v41, %v1020_v18  ;;  %6983 = vst [vmem:[#allocation38_spill] sm:$0xff] %v5179_v46  ;;  %v1539_v56 = vadd.f32 %v1523_v9, %v1440_v22  ;;  %v1232_v26 = vadd.f32 %v5004_v4, %v1149_v8  ;;  %v1119_v36 = vsel %vm327_vm0, %v6985_v19, 0.0  ;;  %v3058_v22 = vld [vmem:[#allocation2 + $0x78] sm:$0xff]  ;;  %v6988_v8 = vld [vmem:[#allocation120_spill] sm:$0xff] }
 0x50a   : >> { %v1846_v21 = vpop.permute.xlu0 %1845  ;;  %v957_v18 = vmul.f32 %v3807_v31, %v940_v11  ;;  %v1641_v9 = vmul.f32 %v3058_v22, %v4621_v16  ;;  %v2209_v0 = vld [vmem:[#allocation2 + $0x12] sm:$0xff]  ;;  %v1349_v48 = vadd.f32 %v4998_v47, %v1266_v57  ;;  %v1023_v19 = vsel %vm330_vm3, %v6988_v8, 0.0 }
 0x50b   : >> { %v1572_v45 = vpop.permute.xlu2 %1571  ;;  %v1053_v61 = vadd.f32 %v1037_v34, %v970_v39  ;;  %v6987_v46 = vld [vmem:[#allocation79_spill] sm:$0xff]  ;;  %v1790_v39 = vsel %vm330_vm3, %v5102_v3, 0.0  ;;  %v1136_v47 = vmul.f32 %v3830_v53, %v1119_v36 }
 0x50c   : >> { %v1589_v29 = vsel %vm328_vm1, %v1572_v45, 0.0  ;;  %v6986_v45 = vld [vmem:[#allocation149_spill] sm:$0xff]  ;;  %v1317_v4 = vsel %vm329_vm2, %v6987_v46, 0.0  ;;  %v6989_v11 = vld [vmem:[#allocation135_spill] sm:$0xff]  ;;  %v973_v34 = vadd.f32 %v957_v18, %v890_v23  ;;  %v1040_v23 = vmul.f32 %v3820_v41, %v1023_v19 }
 0x50d   : >> { %v1606_v12 = vmul.f32 %v4757_v20, %v1589_v29  ;;  %v1707_v59 = vsel %vm329_vm2, %v6986_v45, 0.0  ;;  %v6990_v45 = vld [vmem:[#allocation89_spill] sm:$0xff]  ;;  %v6991_v22 = vld [vmem:[#allocation151_spill] sm:$0xff]  ;;  %v1152_v8 = vadd.f32 %v1136_v47, %v1053_v61  ;;  %v6994_v47 = vld [vmem:[#allocation80_spill] sm:$0xff] }
 0x50e   : >> { %v1724_v57 = vmul.f32 %v4813_v6, %v1707_v59  ;;  %v1400_v3 = vsel %vm330_vm3, %v6990_v45, 0.0  ;;  %v1807_v59 = vmul.f32 %v4856_v15, %v1790_v39  ;;  %v1515_v39 = vmul.f32 %v4710_v49, %v1498_v13  ;;  %v6995_v13 = vld [vmem:[#allocation101_spill] sm:$0xff] }
 0x50f   : >> { %v1622_v29 = vadd.f32 %v1606_v12, %v1539_v56  ;;  %v1219_v56 = vmul.f32 %v3835_v50, %v1202_v44  ;;  %v1267_v12 = vadd.f32 %v4884_v35, %v1232_v26  ;;  %v1334_v44 = vmul.f32 %v4632_v27, %v1317_v4  ;;  %v6992_v35 = vld [vmem:[#allocation153_spill] sm:$0xff] }
 0x510   : >> { %2072 = vrot.lane.b32.xlu0 %v6989_v11, %s3362_s30  ;;  %2311 = vrot.lane.b32.xlu1 %v2209_v0, %s3364_s19  ;;  %v1122_v0 = vsel %vm327_vm0, %v6991_v22, 0.0  ;;  %v1777_v26 = vsel %vm330_vm3, %v6992_v35, 0.0  ;;  %v1056_v11 = vadd.f32 %v1040_v23, %v973_v34  ;;  %v1876_v4 = vsel %vm327_vm0, %v1846_v21, 0.0  ;;  %v5241_v22 = vpop.permute.xlu1 %1873  ;;  %v2212_v23 = vld [vmem:[#allocation2 + $0x2a] sm:$0xff] }
 0x511   : >> { %v1657_v46 = vadd.f32 %v1641_v9, %v1622_v29  ;;  %1847 = vrot.lane.b32.xlu2 %v4428_v42, %s6757_s17  ;;  %v1432_v9 = vadd.f32 %v1416_v28, %v1349_v48  ;;  %v1139_v45 = vmul.f32 %v3830_v53, %v1122_v0  ;;  %v1350_v28 = vadd.f32 %v1334_v44, %v1267_v12 }
 0x512   : >> { %v1852_v36 = vpop.permute.xlu0 %1851  ;;  %v1417_v48 = vmul.f32 %v4657_v52, %v1400_v3  ;;  %v1235_v34 = vadd.f32 %v1219_v56, %v1152_v8  ;;  %v1205_v12 = vsel %vm328_vm1, %v6995_v13, 0.0  ;;  %v3059_v3 = vld [vmem:[#allocation2 + $0x5e] sm:$0xff] }
 0x513   : >> { %v1664_v18 = vpop.permute.xlu2 %1663  ;;  %v1740_v42 = vadd.f32 %v1724_v57, %v1657_v46  ;;  %v1502_v57 = vsel %vm327_vm0, %v6994_v47, 0.0  ;;  %v1794_v46 = vmul.f32 %v4856_v15, %v1777_v26  ;;  %v5250_v21 = vmul.f32 %v3059_v3, %v3805_v30  ;;  %v6996_v56 = vld [vmem:[#allocation139_spill] sm:$0xff]  ;;  %v6997_v8 = vld [vmem:[#allocation144_spill] sm:$0xff] }
 0x514   : >> { %v1694_v29 = vsel %vm329_vm2, %v1664_v18, 0.0  ;;  %v5253_v18 = vstv %s5201_s12  ;;  %v5265_v35 = vmul.f32 %v4710_v49, %v1502_v57  ;;  %v1433_v26 = vadd.f32 %v1417_v48, %v1350_v28  ;;  %v7000_v28 = vld [vmem:[#allocation81_spill] sm:$0xff]  ;;  %s2126_s12 = sld [smem:[#allocation8 + %s2125_s21]]  ;;  %s2508_s21 = sadd.s32 24, %s3756_s18 }
 0x515   : >> { %v1711_v61 = vmul.f32 %v4813_v6, %v1694_v29  ;;  %v5231_v19 = vadd.f32 %v1807_v59, %v1740_v42  ;;  %v5244_v59 = vadd.f32 %v1515_v39, %v1432_v9  ;;  %v1155_v42 = vadd.f32 %v1139_v45, %v1056_v11  ;;  %v6998_v29 = vld [vmem:[#allocation102_spill] sm:$0xff]  ;;  %v3060_v39 = vld [vmem:[#allocation2 + $0x66] sm:$0xff] }
 0x516   : >> { %v1893_v9 = vmul.f32 %v5253_v18, %v1876_v4  ;;  %v5271_v47 = vmul.f32 %v3060_v39, %v3805_v30  ;;  %v1222_v11 = vmul.f32 %v3835_v50, %v1205_v12  ;;  %v1270_v45 = vadd.f32 %v5039_v5, %v1235_v34  ;;  %v3061_v4 = vld [vmem:[#allocation2 + $0x67] sm:$0xff] }
 0x517   : >> { %6993 = vst [vmem:[#allocation57_spill] sm:$0xff] %v5231_v19  ;;  %v1727_v0 = vadd.f32 %v1711_v61, %v4877_v7  ;;  %v1582_v7 = vsel %vm328_vm1, %v6997_v8, 0.0  ;;  %v1320_v61 = vsel %vm329_vm2, %v6998_v29, 0.0  ;;  %v817_v48 = vsel %vm328_vm1, %v7000_v28, 0.0  ;;  %v7002_v8 = vld [vmem:[#allocation118_spill] sm:$0xff]  ;;  %v2215_v28 = vld [vmem:[#allocation2 + $0x42] sm:$0xff] }
 0x518   : >> { %2129 = vrot.lane.b32.xlu0 %v6996_v56, %s3361_s9  ;;  %2317 = vrot.lane.b32.xlu1 %v2212_v23, %s3364_s19  ;;  %v1599_v3 = vmul.f32 %v4757_v20, %v1582_v7  ;;  %v1337_v34 = vmul.f32 %v4632_v27, %v1320_v61  ;;  %v1238_v12 = vadd.f32 %v1222_v11, %v1155_v42  ;;  %v3062_v29 = vld [vmem:[#allocation2 + $0x6f] sm:$0xff]  ;;  %v1879_v7 = vsel %vm327_vm0, %v1852_v36, 0.0  ;;  %v7006_v36 = vld [vmem:[#allocation143_spill] sm:$0xff]  ;;  %v7025_v19 = vld [vmem:[#allocation112_spill] sm:$0xff] }
 0x519   : >> { %v1810_v44 = vadd.f32 %v1794_v46, %v1727_v0  ;;  %1853 = vrot.lane.b32.xlu2 %v6945_v37, %s6757_s17  ;;  %v5276_v37 = vmul.f32 %v3061_v4, %v3842_v24  ;;  %v7001_v0 = vld [vmem:[#allocation156_spill] sm:$0xff]  ;;  %v1257_v39 = vmul.f32 %v3062_v29, %v3842_v24  ;;  %v5316_v29 = vld [vmem:[#allocation2 + $0x49] sm:$0xff] }
 0x51a   : >> { %v1858_v23 = vpop.permute.xlu0 %1857  ;;  %v1780_v13 = vsel %vm330_vm3, %v7001_v0, 0.0  ;;  %v7003_v4 = vld [vmem:[#allocation100_spill] sm:$0xff]  ;;  %v1353_v61 = vadd.f32 %v1337_v34, %v1270_v45  ;;  %v7004_v0 = vld [vmem:[#allocation103_spill] sm:$0xff]  ;;  %v5313_v34 = vpop.permute.xlu1 %1930  ;;  %7007 = vst [vmem:[#allocation41_spill] sm:$0xff] %v5316_v29 }
 0x51b   : >> { %v1670_v57 = vpop.permute.xlu2 %1669  ;;  %v5278_v46 = vadd.f32 %v1893_v9, %v1810_v44  ;;  %v1403_v9 = vsel %vm330_vm3, %v7002_v8, 0.0  ;;  %v1532_v44 = vadd.f32 %v5063_v25, %v1433_v26  ;;  %v1797_v42 = vmul.f32 %v4856_v15, %v1780_v13  ;;  %v7005_v26 = vld [vmem:[#allocation122_spill] sm:$0xff] }
 0x51c   : >> { %v1697_v5 = vsel %vm329_vm2, %v1670_v57, 0.0  ;;  %v735_v57 = vsel %vm327_vm0, %v7003_v4, 0.0  ;;  %v818_v25 = vsel %vm328_vm1, %v7004_v0, 0.0  ;;  %v1420_v45 = vmul.f32 %v4657_v52, %v1403_v9  ;;  %v7008_v4 = vld [vmem:[#allocation147_spill] sm:$0xff] }
 0x51d   : >> { %6999 = vst [vmem:[#allocation71_spill] sm:$0xff] %v5278_v46  ;;  %v1714_v56 = vmul.f32 %v4813_v6, %v1697_v5  ;;  %v1323_v5 = vsel %vm329_vm2, %v7005_v26, 0.0  ;;  %v1615_v8 = vadd.f32 %v1599_v3, %v1532_v44  ;;  %v1273_v13 = vadd.f32 %v1257_v39, %v1238_v12  ;;  %v7009_v12 = vld [vmem:[#allocation154_spill] sm:$0xff] }
 0x51e   : >> { %v5321_v3 = vmul.f32 %v3786_v62, %v817_v48  ;;  %v752_v44 = vmul.f32 %v3780_v58, %v735_v57  ;;  %v1585_v9 = vsel %vm328_vm1, %v7008_v4, 0.0  ;;  %v1406_v39 = vsel %vm330_vm3, %v7009_v12, 0.0  ;;  %v7011_v26 = vld [vmem:[#allocation158_spill] sm:$0xff] }
 0x51f   : >> { %v1730_v11 = vadd.f32 %v1714_v56, %v5060_v32  ;;  %v1896_v32 = vmul.f32 %v5253_v18, %v1879_v7  ;;  %v835_v48 = vmul.f32 %v3786_v62, %v818_v25  ;;  %v1783_v57 = vsel %vm330_vm3, %v7011_v26, 0.0 }
 0x520   : >> { %2135 = vrot.lane.b32.xlu0 %v7006_v36, %s3361_s9  ;;  %2323 = vrot.lane.b32.xlu1 %v2215_v28, %s3364_s19  ;;  %v1650_v36 = vadd.f32 %v4894_v51, %v1615_v8  ;;  %v1602_v12 = vmul.f32 %v4757_v20, %v1585_v9  ;;  %v1882_v26 = vsel %vm327_vm0, %v1858_v23, 0.0  ;;  %v7014_v51 = vld [vmem:[#allocation131_spill] sm:$0xff]  ;;  %v1800_v9 = vmul.f32 %v4856_v15, %v1783_v57 }
 0x521   : >> { %v1813_v56 = vadd.f32 %v1797_v42, %v1730_v11  ;;  %1859 = vrot.lane.b32.xlu2 %v5316_v29, %s6757_s17  ;;  %v1436_v42 = vadd.f32 %v1420_v45, %v1353_v61  ;;  %v1340_v11 = vmul.f32 %v4632_v27, %v1323_v5  ;;  %v1423_v61 = vmul.f32 %v4657_v52, %v1406_v39  ;;  %v7012_v45 = vld [vmem:[#allocation20_spill] sm:$0xff] }
 0x522   : >> { %v1864_v7 = vpop.permute.xlu0 %1863  ;;  %v738_v8 = vsel %vm327_vm0, %v7014_v51, 0.0  ;;  %v1899_v57 = vmul.f32 %v5253_v18, %v1882_v26  ;;  %v7018_v51 = vld [vmem:[#allocation90_spill] sm:$0xff]  ;;  %v7020_v26 = vld [vmem:[#allocation92_spill] sm:$0xff] }
 0x523   : >> { %v1676_v28 = vpop.permute.xlu2 %1675  ;;  %v5331_v0 = vadd.f32 %v1896_v32, %v1813_v56  ;;  %v1356_v46 = vadd.f32 %v1340_v11, %v1273_v13  ;;  %v768_v32 = vadd.f32 %v7012_v45, %v752_v44  ;;  %v7013_v56 = vld [vmem:[#allocation106_spill] sm:$0xff]  ;;  %v1535_v13 = vadd.f32 %v5265_v35, %v1436_v42  ;;  %v2218_v11 = vld [vmem:[#allocation2 + $0x5a] sm:$0xff] }
 0x524   : >> { %v1700_v4 = vsel %vm329_vm2, %v1676_v28, 0.0  ;;  %v936_v25 = vsel %vm329_vm2, %v7013_v56, 0.0  ;;  %v7015_v28 = vld [vmem:[#allocation82_spill] sm:$0xff]  ;;  %v5362_v56 = vld [vmem:[#allocation2 + $0x41] sm:$0xff] }
 0x525   : >> { %7010 = vst [vmem:[#allocation43_spill] sm:$0xff] %v5331_v0  ;;  %v1717_v5 = vmul.f32 %v4813_v6, %v1700_v4  ;;  %v5357_v44 = vsel %vm329_vm2, %v7015_v28, 0.0  ;;  %v7016_v4 = vld [vmem:[#allocation104_spill] sm:$0xff]  ;;  %v851_v23 = vadd.f32 %v835_v48, %v768_v32  ;;  %v1618_v35 = vadd.f32 %v1602_v12, %v1535_v13  ;;  %v7019_v32 = vld [vmem:[#allocation93_spill] sm:$0xff]  ;;  %v7024_v0 = vld [vmem:[#allocation150_spill] sm:$0xff] }
 0x526   : >> { %v1505_v45 = vsel %vm327_vm0, %v7016_v4, 0.0  ;;  %v1439_v42 = vadd.f32 %v1423_v61, %v1356_v46  ;;  %v5375_v48 = vsel %vm330_vm3, %v7018_v51, 0.0  ;;  %v5380_v28 = vsel %vm329_vm2, %v7019_v32, 0.0  ;;  %v7023_v32 = vld [vmem:[#allocation25_spill] sm:$0xff] }
 0x527   : >> { %v1733_v39 = vadd.f32 %v1717_v5, %v1650_v36  ;;  %v5368_v5 = vld [vmem:[#allocation2 + $0x61] sm:$0xff]  ;;  %v953_v46 = vmul.f32 %v3807_v31, %v936_v25  ;;  %v755_v12 = vmul.f32 %v3780_v58, %v738_v8  ;;  %v1522_v13 = vmul.f32 %v4710_v49, %v1505_v45 }
 0x528   : >> { %2141 = vrot.lane.b32.xlu0 %v5362_v56, %s3361_s9  ;;  %2329 = vrot.lane.b32.xlu1 %v2218_v11, %s3364_s19  ;;  %7017 = vst [vmem:[#allocation45_spill] sm:$0xff] %v5368_v5  ;;  %v886_v51 = vadd.f32 %v4979_v43, %v851_v23  ;;  %v1786_v25 = vsel %vm330_vm3, %v7023_v32, 0.0  ;;  %v1588_v8 = vsel %vm328_vm1, %v7024_v0, 0.0  ;;  %v821_v45 = vsel %vm328_vm1, %v7025_v19, 0.0  ;;  %v7026_v23 = vld [vmem:[#allocation91_spill] sm:$0xff] }
 0x529   : >> { %v1816_v36 = vadd.f32 %v1800_v9, %v1733_v39  ;;  %1865 = vrot.lane.b32.xlu2 %v5368_v5, %s6757_s17  ;;  %v734_v9 = vsel %vm327_vm0, %v7020_v26, 0.0  ;;  %v5388_v39 = vpop.permute.xlu1 %1936  ;;  %v1538_v5 = vadd.f32 %v1522_v13, %v1439_v42  ;;  %v1885_v0 = vsel %vm327_vm0, %v1864_v7, 0.0 }
 0x52a   : >> { %v1870_v61 = vpop.permute.xlu0 %1869  ;;  %7021 = vst [vmem:[#allocation51_spill] sm:$0xff] %v5388_v39  ;;  %v969_v32 = vadd.f32 %v953_v46, %v886_v51  ;;  %v1803_v39 = vmul.f32 %v4856_v15, %v1786_v25  ;;  %v1605_v19 = vmul.f32 %v4757_v20, %v1588_v8  ;;  %v838_v46 = vmul.f32 %v3786_v62, %v821_v45  ;;  %v7030_v51 = vld [vmem:[#allocation134_spill] sm:$0xff]  ;;  %v5434_v8 = vld [vmem:[#allocation2 + $0x79] sm:$0xff] }
 0x52b   : >> { %v1682_v11 = vpop.permute.xlu2 %1681  ;;  %v5390_v4 = vadd.f32 %v1899_v57, %v1816_v36  ;;  %v1653_v57 = vadd.f32 %v5163_v14, %v1618_v35  ;;  %v1118_v36 = vsel %vm327_vm0, %v7026_v23, 0.0  ;;  %v5415_v14 = vld [vmem:[#allocation2 + $0x72] sm:$0xff]  ;;  %v7029_v35 = vld [vmem:[#allocation108_spill] sm:$0xff]  ;;  %v741_v7 = vsel %vm327_vm0, %v4739_v33, 0.0 }
 0x52c   : >> { %v1703_v26 = vsel %vm329_vm2, %v1682_v11, 0.0  ;;  %v751_v11 = vmul.f32 %v3780_v58, %v734_v9  ;;  %7028 = vst [vmem:[#allocation60_spill] sm:$0xff] %v5415_v14  ;;  %v1201_v13 = vsel %vm328_vm1, %v7029_v35, 0.0  ;;  %v5427_v9 = vld [vmem:[#allocation2 + $0x59] sm:$0xff]  ;;  %v1135_v45 = vmul.f32 %v3830_v53, %v1118_v36 }
 0x52d   : >> { %7022 = vst [vmem:[#allocation24_spill] sm:$0xff] %v5390_v4  ;;  %v1720_v43 = vmul.f32 %v4813_v6, %v1703_v26  ;;  %v7027_v4 = vld [vmem:[#allocation17_spill] sm:$0xff]  ;;  %v1621_v26 = vadd.f32 %v1605_v19, %v1538_v5  ;;  %v1052_v33 = vadd.f32 %v5149_v38, %v969_v32  ;;  %v1789_v38 = vsel %vm330_vm3, %v4803_v60, 0.0 }
 0x52e   : >> { %v771_v29 = vadd.f32 %v7027_v4, %v755_v12  ;;  %v939_v12 = vsel %vm329_vm2, %v7030_v51, 0.0  ;;  %v1902_v4 = vmul.f32 %v5253_v18, %v1885_v0  ;;  %v1218_v0 = vmul.f32 %v3835_v50, %v1201_v13 }
 0x52f   : >> { %v1736_v42 = vadd.f32 %v1720_v43, %v1653_v57  ;;  %v824_v43 = vsel %vm328_vm1, %v4805_v54, 0.0  ;;  %v956_v36 = vmul.f32 %v3807_v31, %v939_v12 }
 0x530   : >> { %2147 = vrot.lane.b32.xlu0 %v5427_v9, %s3361_s9  ;;  %2335 = vrot.lane.b32.xlu1 %v5415_v14, %s3364_s19  ;;  %v854_v57 = vadd.f32 %v838_v46, %v771_v29  ;;  %v7031_v29 = vld [vmem:[#allocation21_spill] sm:$0xff]  ;;  %v841_v19 = vmul.f32 %v3786_v62, %v824_v43  ;;  %v1806_v43 = vmul.f32 %v4856_v15, %v1789_v38  ;;  %v7046_v14 = vld [vmem:[#allocation27_spill] sm:$0xff] }
 0x531   : >> { %v1819_v25 = vadd.f32 %v1803_v39, %v1736_v42  ;;  %1871 = vrot.lane.b32.xlu2 %v5434_v8, %s6757_s17  ;;  %v758_v39 = vmul.f32 %v3780_v58, %v741_v7  ;;  %v3068_v42 = vld [vmem:[#allocation2 + $0x70] sm:$0xff]  ;;  %v767_v32 = vadd.f32 %v7031_v29, %v751_v11  ;;  %v5457_v13 = vpop.permute.xlu1 %1942 }
 0x532   : >> { %v1927_v23 = vpop.permute.xlu0 %1926  ;;  %v1640_v35 = vmul.f32 %v3068_v42, %v4621_v16  ;;  %v889_v12 = vadd.f32 %v5271_v47, %v854_v57  ;;  %v1888_v42 = vsel %vm327_vm0, %v1870_v61, 0.0  ;;  %v7034_v29 = vld [vmem:[#allocation14_spill] sm:$0xff]  ;;  %v1039_v47 = vmul.f32 %v3820_v41, %v5375_v48 }
 0x533   : >> { %v1688_v51 = vpop.permute.xlu2 %1687  ;;  %v5446_v5 = vadd.f32 %v1902_v4, %v1819_v25  ;;  %v1151_v4 = vadd.f32 %v1135_v45, %v1052_v33  ;;  %v7032_v25 = vld [vmem:[#allocation152_spill] sm:$0xff]  ;;  %v942_v61 = vsel %vm329_vm2, %v4860_v40, 0.0  ;;  %v5480_v57 = vld [vmem:[#allocation2 + $0x71] sm:$0xff]  ;;  %v1905_v48 = vmul.f32 %v5253_v18, %v1888_v42 }
 0x534   : >> { %v1706_v54 = vsel %vm329_vm2, %v1688_v51, 0.0  ;;  %v1656_v46 = vadd.f32 %v1640_v35, %v1621_v26  ;;  %v1693_v60 = vsel %vm329_vm2, %v7032_v25, 0.0  ;;  %v7033_v51 = vld [vmem:[#allocation94_spill] sm:$0xff]  ;;  %v774_v26 = vadd.f32 %v7034_v29, %v758_v39  ;;  %v3071_v42 = vld [vmem:[#allocation2 + $0x7e] sm:$0xff] }
 0x535   : >> { %v1723_v7 = vmul.f32 %v4813_v6, %v1706_v54  ;;  %v1402_v11 = vsel %vm330_vm3, %v7033_v51, 0.0  ;;  %v5471_v54 = vld [vmem:[#allocation2 + $0xa] sm:$0xff]  ;;  %v1234_v45 = vadd.f32 %v1218_v0, %v1151_v4  ;;  %v972_v33 = vadd.f32 %v956_v36, %v889_v12 }
 0x536   : >> { %7035 = vst [vmem:[#allocation55_spill] sm:$0xff] %v5471_v54  ;;  %v1710_v39 = vmul.f32 %v4813_v6, %v1693_v60  ;;  %v857_v38 = vadd.f32 %v841_v19, %v774_v26  ;;  %v5488_v36 = vld [vmem:[#allocation2 + $0x11] sm:$0xff]  ;;  %v5494_v40 = vmul.f32 %v4632_v27, %v5380_v28  ;;  %v7036_v4 = vld [vmem:[#allocation113_spill] sm:$0xff]  ;;  %v876_v51 = vmul.f32 %v3071_v42, %v3805_v30 }
 0x537   : >> { %v1739_v35 = vadd.f32 %v1723_v7, %v1656_v46  ;;  %v5497_v46 = vadd.f32 %v5321_v3, %v767_v32  ;;  %v1419_v7 = vmul.f32 %v4657_v52, %v1402_v11  ;;  %v1025_v19 = vsel %vm330_vm3, %v7036_v4, 0.0  ;;  %v7037_v25 = vld [vmem:[#allocation114_spill] sm:$0xff] }
 0x538   : >> { %2153 = vrot.lane.b32.xlu0 %v5480_v57, %s3361_s9  ;;  %2427 = vrot.lane.b32.xlu1 %v5471_v54, %s3362_s30  ;;  %v1121_v60 = vsel %vm327_vm0, %v7037_v25, 0.0  ;;  %v959_v28 = vmul.f32 %v3807_v31, %v942_v61  ;;  %v1269_v3 = vadd.f32 %v4989_v17, %v1234_v45  ;;  %v7038_v32 = vld [vmem:[#allocation138_spill] sm:$0xff]  ;;  %v1875_v26 = vsel %vm327_vm0, %v4873_v63, 0.0  ;;  %v7040_v25 = vld [vmem:[#allocation155_spill] sm:$0xff] }
 0x539   : >> { %v1822_v0 = vadd.f32 %v1806_v43, %v1739_v35  ;;  %1928 = vrot.lane.b32.xlu2 %v5488_v36, %s3364_s19  ;;  %v1204_v11 = vsel %vm328_vm1, %v7038_v32, 0.0  ;;  %v1055_v4 = vadd.f32 %v1039_v47, %v972_v33  ;;  %v1726_v30 = vadd.f32 %v1710_v39, %v4839_v55  ;;  %v5532_v39 = vpop.permute.xlu1 %1948  ;;  %v7042_v32 = vld [vmem:[#allocation111_spill] sm:$0xff] }
 0x53a   : >> { %v1933_v12 = vpop.permute.xlu0 %1932  ;;  %v892_v61 = vadd.f32 %v876_v51, %v857_v38  ;;  %v1138_v45 = vmul.f32 %v3830_v53, %v1121_v60  ;;  %v1696_v63 = vsel %vm329_vm2, %v7040_v25, 0.0  ;;  %v1958_v42 = vsel %vm328_vm1, %v1927_v23, 0.0  ;;  %v5534_v51 = vld [vmem:[#allocation2 + $0x22] sm:$0xff] }
 0x53b   : >> { %v1745_v43 = vpop.permute.xlu2 %1744  ;;  %v5508_v29 = vadd.f32 %v1905_v48, %v1822_v0  ;;  %v7039_v0 = vld [vmem:[#allocation119_spill] sm:$0xff]  ;;  %v1221_v47 = vmul.f32 %v3835_v50, %v1204_v11  ;;  %v1892_v55 = vmul.f32 %v5253_v18, %v1875_v26  ;;  %7041 = vst [vmem:[#allocation64_spill] sm:$0xff] %v5534_v51  ;;  %v1352_v60 = vadd.f32 %v5157_v10, %v1269_v3  ;;  %v5550_v26 = vld [vmem:[#allocation2 + $0x29] sm:$0xff]  ;;  %v7043_v10 = vld [vmem:[#allocation116_spill] sm:$0xff] }
 0x53c   : >> { %v1776_v35 = vsel %vm330_vm3, %v1745_v43, 0.0  ;;  %v1581_v17 = vsel %vm328_vm1, %v7039_v0, 0.0  ;;  %v975_v33 = vadd.f32 %v959_v28, %v892_v61  ;;  %v1042_v43 = vmul.f32 %v3820_v41, %v1025_v19  ;;  %v7044_v61 = vld [vmem:[#allocation136_spill] sm:$0xff] }
 0x53d   : >> { %v1793_v48 = vmul.f32 %v4856_v15, %v1776_v35  ;;  %v1501_v35 = vsel %vm327_vm0, %v7042_v32, 0.0  ;;  %v5542_v0 = vstv %s5475_s13  ;;  %v1154_v23 = vadd.f32 %v1138_v45, %v1055_v4  ;;  %s2225_s13 = sld [smem:[#allocation8 + %s2224_s22]]  ;;  %s2608_s22 = scalar_lea.sflag (%p6579_p4), [#allocation6], %s3502_s27 }
 0x53e   : >> { %v1713_v28 = vmul.f32 %v4813_v6, %v1696_v63  ;;  %v1975_v11 = vmul.f32 %v5542_v0, %v1958_v42  ;;  %v1325_v3 = vsel %vm329_vm2, %v7043_v10, 0.0  ;;  %v1124_v4 = vsel %vm327_vm0, %v7044_v61, 0.0 }
 0x53f   : >> { %v1809_v38 = vadd.f32 %v1793_v48, %v1726_v30  ;;  %v1598_v30 = vmul.f32 %v4757_v20, %v1581_v17  ;;  %v7045_v48 = vld [vmem:[#allocation49_spill] sm:$0xff]  ;;  %v1237_v63 = vadd.f32 %v1221_v47, %v1154_v23  ;;  %v1058_v42 = vadd.f32 %v1042_v43, %v975_v33 }
 0x540   : >> { %2226 = vrot.lane.b32.xlu0 %v5471_v54, %s6757_s17  ;;  %2433 = vrot.lane.b32.xlu1 %v5534_v51, %s3362_s30  ;;  %v1207_v45 = vsel %vm328_vm1, %v7045_v48, 0.0  ;;  %v1435_v32 = vadd.f32 %v1419_v7, %v1352_v60  ;;  %v1518_v54 = vmul.f32 %v4710_v49, %v1501_v35  ;;  %v1878_v17 = vsel %vm327_vm0, %v4954_v1, 0.0  ;;  %v7047_v7 = vld [vmem:[#allocation123_spill] sm:$0xff]  ;;  %v7048_v35 = vld [vmem:[#allocation157_spill] sm:$0xff] }
 0x541   : >> { %v1908_v19 = vadd.f32 %v1892_v55, %v1809_v38  ;;  %1934 = vrot.lane.b32.xlu2 %v5550_v26, %s3364_s19  ;;  %v1141_v61 = vmul.f32 %v3830_v53, %v1124_v4  ;;  %v1729_v48 = vadd.f32 %v1713_v28, %v7046_v14  ;;  %v1224_v47 = vmul.f32 %v3835_v50, %v1207_v45  ;;  %v5587_v4 = vld [vmem:[#allocation2 + $0x3a] sm:$0xff] }
 0x542   : >> { %v1939_v25 = vpop.permute.xlu0 %1938  ;;  %v1614_v43 = vadd.f32 %v1598_v30, %v5244_v59  ;;  %v1584_v60 = vsel %vm328_vm1, %v7047_v7, 0.0  ;;  %v1699_v1 = vsel %vm329_vm2, %v7048_v35, 0.0  ;;  %v1961_v23 = vsel %vm328_vm1, %v1933_v12, 0.0  ;;  %v7049_v59 = vld [vmem:[#allocation46_spill] sm:$0xff]  ;;  %v7050_v45 = vld [vmem:[#allocation95_spill] sm:$0xff] }
 0x543   : >> { %v1751_v55 = vpop.permute.xlu2 %1750  ;;  %v5564_v38 = vadd.f32 %v1975_v11, %v1908_v19  ;;  %v1272_v11 = vadd.f32 %v5276_v37, %v1237_v63  ;;  %v1895_v14 = vmul.f32 %v5253_v18, %v1878_v17  ;;  %v1157_v28 = vadd.f32 %v1141_v61, %v1058_v42  ;;  %v3073_v12 = vld [vmem:[#allocation2 + $0x7f] sm:$0xff]  ;;  %v5603_v42 = vpop.permute.xlu1 %1954 }
 0x544   : >> { %v1779_v10 = vsel %vm330_vm3, %v1751_v55, 0.0  ;;  %v885_v30 = vadd.f32 %v7049_v59, %v5497_v46  ;;  %v1018_v55 = vsel %vm330_vm3, %v7050_v45, 0.0  ;;  %v1259_v37 = vmul.f32 %v3073_v12, %v3842_v24  ;;  %v7052_v45 = vld [vmem:[#allocation121_spill] sm:$0xff] }
 0x545   : >> { %v1796_v33 = vmul.f32 %v4856_v15, %v1779_v10  ;;  %v7051_v10 = vld [vmem:[#allocation117_spill] sm:$0xff]  ;;  %v1716_v63 = vmul.f32 %v4813_v6, %v1699_v1  ;;  %v1240_v46 = vadd.f32 %v1224_v47, %v1157_v28  ;;  %v1978_v17 = vmul.f32 %v5542_v0, %v1961_v23  ;;  %v7053_v1 = vld [vmem:[#allocation40_spill] sm:$0xff] }
 0x546   : >> { %v1405_v7 = vsel %vm330_vm3, %v7051_v10, 0.0  ;;  %v1601_v35 = vmul.f32 %v4757_v20, %v1584_v60  ;;  %v737_v10 = vsel %vm327_vm0, %v7052_v45, 0.0  ;;  %v1355_v47 = vadd.f32 %v5494_v40, %v1272_v11  ;;  %v7057_v45 = vld [vmem:[#allocation124_spill] sm:$0xff] }
 0x547   : >> { %v1812_v19 = vadd.f32 %v1796_v33, %v1729_v48  ;;  %v1342_v48 = vmul.f32 %v4632_v27, %v1325_v3  ;;  %v1534_v33 = vadd.f32 %v1518_v54, %v1435_v32  ;;  %v1649_v28 = vadd.f32 %v7053_v1, %v1614_v43  ;;  %v7056_v3 = vld [vmem:[#allocation35_spill] sm:$0xff] }
 0x548   : >> { %2232 = vrot.lane.b32.xlu0 %v5534_v51, %s6757_s17  ;;  %2439 = vrot.lane.b32.xlu1 %v5587_v4, %s3362_s30  ;;  %v1881_v32 = vsel %vm327_vm0, %v7056_v3, 0.0  ;;  %v820_v40 = vsel %vm328_vm1, %v7057_v45, 0.0  ;;  %v1275_v11 = vadd.f32 %v1259_v37, %v1240_v46  ;;  %v7058_v1 = vld [vmem:[#allocation159_spill] sm:$0xff]  ;;  %v1964_v3 = vsel %vm328_vm1, %v1939_v25, 0.0  ;;  %v7059_v46 = vld [vmem:[#allocation126_spill] sm:$0xff] }
 0x549   : >> { %v1911_v61 = vadd.f32 %v1895_v14, %v1812_v19  ;;  %1940 = vrot.lane.b32.xlu2 %v5362_v56, %s3364_s19  ;;  %v1422_v14 = vmul.f32 %v4657_v52, %v1405_v7  ;;  %v7055_v19 = vld [vmem:[#allocation141_spill] sm:$0xff]  ;;  %v1732_v43 = vadd.f32 %v1716_v63, %v1649_v28  ;;  %v1617_v7 = vadd.f32 %v1601_v35, %v1534_v33  ;;  %v5638_v63 = vld [vmem:[#allocation2 + $0x52] sm:$0xff]  ;;  %v7060_v35 = vld [vmem:[#allocation140_spill] sm:$0xff] }
 0x54a   : >> { %v1945_v59 = vpop.permute.xlu0 %1944  ;;  %v1504_v54 = vsel %vm327_vm0, %v7055_v19, 0.0  ;;  %v1702_v19 = vsel %vm329_vm2, %v7058_v1, 0.0  ;;  %v952_v37 = vmul.f32 %v3807_v31, %v5357_v44  ;;  %v837_v33 = vmul.f32 %v3786_v62, %v820_v40 }
 0x54b   : >> { %v1757_v12 = vpop.permute.xlu2 %1756  ;;  %v5615_v23 = vadd.f32 %v1978_v17, %v1911_v61  ;;  %v754_v61 = vmul.f32 %v3780_v58, %v737_v10  ;;  %v1438_v51 = vadd.f32 %v1422_v14, %v1355_v47  ;;  %v1587_v58 = vsel %vm328_vm1, %v7059_v46, 0.0 }
 0x54c   : >> { %v1782_v60 = vsel %vm330_vm3, %v1757_v12, 0.0  ;;  %v1521_v12 = vmul.f32 %v4710_v49, %v1504_v54  ;;  %v1408_v25 = vsel %vm330_vm3, %v7060_v35, 0.0  ;;  %v1719_v10 = vmul.f32 %v4813_v6, %v1702_v19  ;;  %v7061_v54 = vld [vmem:[#allocation18_spill] sm:$0xff]  ;;  %v5664_v19 = vpop.permute.xlu1 %2046  ;;  %v7065_v35 = vld [vmem:[#allocation85_spill] sm:$0xff] }
 0x54d   : >> { %7054 = vst [vmem:[#allocation63_spill] sm:$0xff] %v5615_v23  ;;  %v1799_v17 = vmul.f32 %v4856_v15, %v1782_v60  ;;  %v1898_v23 = vmul.f32 %v5253_v18, %v1881_v32  ;;  %v1358_v47 = vadd.f32 %v1342_v48, %v1275_v11  ;;  %v1981_v44 = vmul.f32 %v5542_v0, %v1964_v3  ;;  %v7062_v60 = vld [vmem:[#allocation34_spill] sm:$0xff]  ;;  %v7063_v48 = vld [vmem:[#allocation29_spill] sm:$0xff] }
 0x54e   : >> { %v968_v62 = vadd.f32 %v952_v37, %v885_v30  ;;  %v1035_v14 = vmul.f32 %v3820_v41, %v1018_v55  ;;  %v770_v32 = vadd.f32 %v7061_v54, %v754_v61  ;;  %v1507_v40 = vsel %vm327_vm0, %v7062_v60, 0.0  ;;  %v7067_v54 = vld [vmem:[#allocation105_spill] sm:$0xff] }
 0x54f   : >> { %v1815_v45 = vadd.f32 %v1799_v17, %v1732_v43  ;;  %v1537_v17 = vadd.f32 %v1521_v12, %v1438_v51  ;;  %v1425_v1 = vmul.f32 %v4657_v52, %v1408_v25  ;;  %v1652_v11 = vadd.f32 %v7063_v48, %v1617_v7  ;;  %v7069_v48 = vld [vmem:[#allocation125_spill] sm:$0xff] }
 0x550   : >> { %2238 = vrot.lane.b32.xlu0 %v5587_v4, %s6757_s17  ;;  %2445 = vrot.lane.b32.xlu1 %v5638_v63, %s3362_s30  ;;  %v1604_v30 = vmul.f32 %v4757_v20, %v1587_v58  ;;  %v853_v55 = vadd.f32 %v837_v33, %v770_v32  ;;  %v1524_v46 = vmul.f32 %v4710_v49, %v1507_v40  ;;  %v1200_v25 = vsel %vm328_vm1, %v7065_v35, 0.0  ;;  %v7066_v58 = vld [vmem:[#allocation26_spill] sm:$0xff] }
 0x551   : >> { %v1914_v28 = vadd.f32 %v1898_v23, %v1815_v45  ;;  %1946 = vrot.lane.b32.xlu2 %v5427_v9, %s3364_s19  ;;  %v7064_v45 = vld [vmem:[#allocation52_spill] sm:$0xff]  ;;  %v1735_v51 = vadd.f32 %v1719_v10, %v1652_v11  ;;  %v1441_v12 = vadd.f32 %v1425_v1, %v1358_v47  ;;  %v1705_v33 = vsel %vm329_vm2, %v7066_v58, 0.0  ;;  %v5688_v40 = vld [vmem:[#allocation2 + $0x6a] sm:$0xff] }
 0x552   : >> { %v1951_v43 = vpop.permute.xlu0 %1950  ;;  %v1884_v61 = vsel %vm327_vm0, %v7064_v45, 0.0  ;;  %v938_v10 = vsel %vm329_vm2, %v7067_v54, 0.0  ;;  %v1620_v47 = vadd.f32 %v1604_v30, %v1537_v17  ;;  %v7068_v1 = vld [vmem:[#allocation129_spill] sm:$0xff]  ;;  %v7070_v11 = vld [vmem:[#allocation44_spill] sm:$0xff]  ;;  %v1722_v17 = vmul.f32 %v4813_v6, %v1705_v33 }
 0x553   : >> { %v1763_v23 = vpop.permute.xlu2 %1762  ;;  %v5666_v3 = vadd.f32 %v1981_v44, %v1914_v28  ;;  %v1051_v44 = vadd.f32 %v1035_v14, %v968_v62  ;;  %v1967_v28 = vsel %vm328_vm1, %v1945_v59, 0.0  ;;  %v1901_v32 = vmul.f32 %v5253_v18, %v1884_v61 }
 0x554   : >> { %v1785_v37 = vsel %vm330_vm3, %v1763_v23, 0.0  ;;  %v1590_v62 = vsel %vm328_vm1, %v7068_v1, 0.0  ;;  %v888_v14 = vadd.f32 %v5250_v21, %v853_v55  ;;  %v1021_v59 = vsel %vm330_vm3, %v7069_v48, 0.0  ;;  %v7071_v21 = vld [vmem:[#allocation39_spill] sm:$0xff]  ;;  %v7072_v55 = vld [vmem:[#allocation33_spill] sm:$0xff]  ;;  %v7075_v48 = vld [vmem:[#allocation38_spill] sm:$0xff] }
 0x555   : >> { %v1802_v7 = vmul.f32 %v4856_v15, %v1785_v37  ;;  %v1639_v23 = vmul.f32 %v7070_v11, %v4621_v16  ;;  %v1540_v30 = vadd.f32 %v1524_v46, %v1441_v12  ;;  %v1984_v45 = vmul.f32 %v5542_v0, %v1967_v28  ;;  %v7074_v28 = vld [vmem:[#allocation15_spill] sm:$0xff] }
 0x556   : >> { %v1265_v37 = vadd.f32 %v7072_v55, %v7071_v21  ;;  %v955_v35 = vmul.f32 %v3807_v31, %v938_v10  ;;  %v1607_v54 = vmul.f32 %v4757_v20, %v1590_v62  ;;  %v1038_v1 = vmul.f32 %v3820_v41, %v1021_v59  ;;  %v5723_v41 = vpop.permute.xlu1 %2052  ;;  %v7076_v59 = vld [vmem:[#allocation83_spill] sm:$0xff] }
 0x557   : >> { %v1818_v60 = vadd.f32 %v1802_v7, %v1735_v51  ;;  %v7073_v51 = vld [vmem:[#allocation42_spill] sm:$0xff]  ;;  %v1655_v33 = vadd.f32 %v1639_v23, %v1620_v47  ;;  %v1120_v23 = vsel %vm327_vm0, %v7076_v59, 0.0  ;;  %v1970_v21 = vsel %vm328_vm1, %v1951_v43, 0.0  ;;  %v7081_v59 = vld [vmem:[#allocation107_spill] sm:$0xff] }
 0x558   : >> { %2244 = vrot.lane.b32.xlu0 %v5638_v63, %s6757_s17  ;;  %2451 = vrot.lane.b32.xlu1 %v5688_v40, %s3362_s30  ;;  %v1150_v7 = vadd.f32 %v7073_v51, %v1051_v44  ;;  %v1887_v44 = vsel %vm327_vm0, %v7075_v48, 0.0  ;;  %v971_v10 = vadd.f32 %v955_v35, %v888_v14  ;;  %v1623_v11 = vadd.f32 %v1607_v54, %v1540_v30  ;;  %v5735_v30 = vld [vmem:[#allocation2 + $0x82] sm:$0xff]  ;;  %v7078_v51 = vld [vmem:[#allocation54_spill] sm:$0xff]  ;;  %v7079_v54 = vld [vmem:[#allocation47_spill] sm:$0xff] }
 0x559   : >> { %v1917_v61 = vadd.f32 %v1901_v32, %v1818_v60  ;;  %1952 = vrot.lane.b32.xlu2 %v5480_v57, %s3364_s19  ;;  %v1332_v32 = vmul.f32 %v4632_v27, %v7074_v28  ;;  %v1217_v60 = vmul.f32 %v3835_v50, %v1200_v25  ;;  %v1738_v62 = vadd.f32 %v1722_v17, %v1655_v33  ;;  %v7077_v25 = vld [vmem:[#allocation98_spill] sm:$0xff]  ;;  %v3074_v33 = vld [vmem:[#allocation2 + $0x47] sm:$0xff]  ;;  %v7080_v28 = vld [vmem:[#allocation31_spill] sm:$0xff] }
 0x55a   : >> { %v1957_v58 = vpop.permute.xlu0 %1956  ;;  %v1054_v55 = vadd.f32 %v1038_v1, %v971_v10  ;;  %v1904_v14 = vmul.f32 %v5253_v18, %v1887_v44  ;;  %v1642_v35 = vmul.f32 %v7078_v51, %v4621_v16  ;;  %v1708_v43 = vsel %vm329_vm2, %v7080_v28, 0.0  ;;  %v5752_v44 = vld [vmem:[#allocation2 + $0x9] sm:$0xff] }
 0x55b   : >> { %v1769_v12 = vpop.permute.xlu2 %1768  ;;  %v5713_v46 = vadd.f32 %v1984_v45, %v1917_v61  ;;  %v1233_v45 = vadd.f32 %v1217_v60, %v1150_v7  ;;  %v1318_v61 = vsel %vm329_vm2, %v7077_v25, 0.0  ;;  %v1398_v7 = vsel %vm330_vm3, %v7079_v54, 0.0 }
 0x55c   : >> { %v1788_v31 = vsel %vm330_vm3, %v1769_v12, 0.0  ;;  %v1252_v12 = vmul.f32 %v3074_v33, %v3842_v24  ;;  %v1137_v1 = vmul.f32 %v3830_v53, %v1120_v23  ;;  %v1987_v60 = vmul.f32 %v5542_v0, %v1970_v21 }
 0x55d   : >> { %v1805_v47 = vmul.f32 %v4856_v15, %v1788_v31  ;;  %v1658_v31 = vadd.f32 %v1642_v35, %v1623_v11  ;;  %v1348_v10 = vadd.f32 %v1332_v32, %v1265_v37  ;;  %v1203_v25 = vsel %vm328_vm1, %v7081_v59, 0.0  ;;  %v7082_v37 = vld [vmem:[#allocation61_spill] sm:$0xff] }
 0x55e   : >> { %v1415_v53 = vmul.f32 %v4657_v52, %v1398_v7  ;;  %v1153_v23 = vadd.f32 %v1137_v1, %v1054_v55  ;;  %v1725_v21 = vmul.f32 %v4813_v6, %v1708_v43  ;;  %v1497_v32 = vsel %vm327_vm0, %v7082_v37, 0.0  ;;  %v7083_v11 = vld [vmem:[#allocation65_spill] sm:$0xff] }
 0x55f   : >> { %v1821_v17 = vadd.f32 %v1805_v47, %v1738_v62  ;;  %v1268_v62 = vadd.f32 %v1252_v12, %v1233_v45  ;;  %v1335_v47 = vmul.f32 %v4632_v27, %v1318_v61  ;;  %v1401_v45 = vsel %vm330_vm3, %v7083_v11, 0.0  ;;  %v7084_v35 = vld [vmem:[#allocation69_spill] sm:$0xff] }
 0x560   : >> { %2250 = vrot.lane.b32.xlu0 %v5688_v40, %s6757_s17  ;;  %2457 = vrot.lane.b32.xlu1 %v5735_v30, %s3362_s30  ;;  %v1890_v61 = vsel %vm327_vm0, %v5241_v22, 0.0  ;;  %v1580_v54 = vsel %vm328_vm1, %v7084_v35, 0.0  ;;  %v1220_v7 = vmul.f32 %v3835_v50, %v1203_v25  ;;  %v1741_v33 = vadd.f32 %v1725_v21, %v1658_v31  ;;  %v5805_v21 = vld [vmem:[#allocation2 + $0x21] sm:$0xff] }
 0x561   : >> { %v1920_v48 = vadd.f32 %v1904_v14, %v1821_v17  ;;  %2044 = vrot.lane.b32.xlu2 %v5752_v44, %s3362_s30  ;;  %v1431_v28 = vadd.f32 %v1415_v53, %v1348_v10  ;;  %v1351_v43 = vadd.f32 %v1335_v47, %v1268_v62  ;;  %v1973_v1 = vsel %vm328_vm1, %v1957_v58, 0.0  ;;  %v7085_v10 = vld [vmem:[#allocation128_spill] sm:$0xff]  ;;  %v7089_v35 = vld [vmem:[#allocation137_spill] sm:$0xff] }
 0x562   : >> { %v5760_v51 = vpop.permute.xlu0 %2048  ;;  %v1236_v22 = vadd.f32 %v1220_v7, %v1153_v23  ;;  %v1418_v50 = vmul.f32 %v4657_v52, %v1401_v45  ;;  %v1597_v31 = vmul.f32 %v4757_v20, %v1580_v54  ;;  %v1321_v62 = vsel %vm329_vm2, %v7085_v10, 0.0  ;;  %v5799_v58 = vld [vmem:[#allocation2 + $0x1a] sm:$0xff] }
 0x563   : >> { %v1775_v14 = vpop.permute.xlu2 %1774  ;;  %v5765_v17 = vadd.f32 %v1987_v60, %v1920_v48  ;;  %v1907_v60 = vmul.f32 %v5253_v18, %v1890_v61  ;;  %v5789_v48 = vpop.permute.xlu1 %2058  ;;  %7086 = vst [vmem:[#allocation23_spill] sm:$0xff] %v5799_v58  ;;  %v3077_v47 = vld [vmem:[#allocation2 + $0x5f] sm:$0xff]  ;;  %v1990_v53 = vmul.f32 %v5542_v0, %v1973_v1  ;;  %v1698_v54 = vsel %vm329_vm2, %v7089_v35, 0.0 }
 0x564   : >> { %v1791_v55 = vsel %vm330_vm3, %v1775_v14, 0.0  ;;  %v1514_v14 = vmul.f32 %v4710_v49, %v1497_v32  ;;  %v1255_v25 = vmul.f32 %v3077_v47, %v3842_v24  ;;  %v7087_v32 = vld [vmem:[#allocation88_spill] sm:$0xff]  ;;  %v1434_v45 = vadd.f32 %v1418_v50, %v1351_v43  ;;  %v7091_v10 = vld [vmem:[#allocation87_spill] sm:$0xff] }
 0x565   : >> { %v1808_v12 = vmul.f32 %v4856_v15, %v1791_v55  ;;  %v1500_v11 = vsel %vm327_vm0, %v7087_v32, 0.0  ;;  %v7088_v61 = vld [vmem:[#allocation48_spill] sm:$0xff]  ;;  %v1960_v43 = vsel %vm328_vm1, %v5313_v34, 0.0  ;;  %v1715_v47 = vmul.f32 %v4813_v6, %v1698_v54  ;;  %v7092_v32 = vld [vmem:[#allocation37_spill] sm:$0xff]  ;;  %v5853_v54 = vld [vmem:[#allocation2 + $0x32] sm:$0xff] }
 0x566   : >> { %v1530_v37 = vadd.f32 %v1514_v14, %v1431_v28  ;;  %v1583_v55 = vsel %vm328_vm1, %v7088_v61, 0.0  ;;  %v1271_v7 = vadd.f32 %v1255_v25, %v1236_v22  ;;  %v7090_v14 = vld [vmem:[#allocation32_spill] sm:$0xff]  ;;  %v5840_v25 = vstv %s5785_s7  ;;  %v7093_v61 = vld [vmem:[#allocation109_spill] sm:$0xff]  ;;  %s2390_s7 = sadd.s32 22, %s3756_s18 }
 0x567   : >> { %v1824_v59 = vadd.f32 %v1808_v12, %v1741_v33  ;;  %v1338_v33 = vmul.f32 %v4632_v27, %v1321_v62  ;;  %v1781_v50 = vsel %vm330_vm3, %v7090_v14, 0.0  ;;  %v1600_v22 = vmul.f32 %v4757_v20, %v1583_v55  ;;  %v3079_v62 = vld [vmem:[#allocation2 + $0x30] sm:$0xff] }
 0x568   : >> { %2256 = vrot.lane.b32.xlu0 %v5735_v30, %s6757_s17  ;;  %2514 = vrot.lane.b32.xlu1 %v5799_v58, %s3361_s9  ;;  %v1613_v1 = vadd.f32 %v1597_v31, %v1530_v37  ;;  %v1404_v31 = vsel %vm330_vm3, %v7091_v10, 0.0  ;;  %v1632_v34 = vmul.f32 %v3079_v62, %v4621_v16  ;;  %v1503_v55 = vsel %vm327_vm0, %v7093_v61, 0.0  ;;  %v7094_v10 = vld [vmem:[#allocation36_spill] sm:$0xff]  ;;  %v7096_v61 = vld [vmem:[#allocation51_spill] sm:$0xff] }
 0x569   : >> { %v1923_v23 = vadd.f32 %v1907_v60, %v1824_v59  ;;  %2050 = vrot.lane.b32.xlu2 %v5805_v21, %s3362_s30  ;;  %v1517_v59 = vmul.f32 %v4710_v49, %v1500_v11  ;;  %v1520_v62 = vmul.f32 %v4710_v49, %v1503_v55 }
 0x56a   : >> { %v2055_v24 = vpop.permute.xlu0 %2054  ;;  %v1648_v35 = vadd.f32 %v1632_v34, %v1613_v1 }
 0x56b   : >> { %v1848_v12 = vpop.permute.xlu2 %1847  ;;  %v5821_v28 = vadd.f32 %v1990_v53, %v1923_v23  ;;  %v1354_v53 = vadd.f32 %v1338_v33, %v1271_v7  ;;  %v1977_v23 = vmul.f32 %v5542_v0, %v1960_v43  ;;  %v1533_v37 = vadd.f32 %v1517_v59, %v1434_v45  ;;  %v5858_v33 = vpop.permute.xlu1 %2064  ;;  %v5860_v43 = vld [vmem:[#allocation2 + $0x39] sm:$0xff] }
 0x56c   : >> { %v1877_v60 = vsel %vm327_vm0, %v1848_v12, 0.0  ;;  %v1798_v12 = vmul.f32 %v4856_v15, %v1781_v50  ;;  %v1421_v45 = vmul.f32 %v4657_v52, %v1404_v31  ;;  %v1731_v14 = vadd.f32 %v1715_v47, %v1648_v35  ;;  %v3083_v50 = vld [vmem:[#allocation2 + $0x48] sm:$0xff] }
 0x56d   : >> { %v1894_v27 = vmul.f32 %v5253_v18, %v1877_v60  ;;  %v2078_v60 = vsel %vm329_vm2, %v5760_v51, 0.0  ;;  %v1616_v7 = vadd.f32 %v1600_v22, %v1533_v37  ;;  %v5864_v51 = vld [vmem:[#allocation2 + $0x19] sm:$0xff]  ;;  %v1586_v52 = vsel %vm328_vm1, %v7094_v10, 0.0 }
 0x56e   : >> { %v2012_v59 = vmul.f32 %v5864_v51, %v5840_v25  ;;  %v5873_v22 = vstv %s5815_s29  ;;  %v1437_v34 = vadd.f32 %v1421_v45, %v1354_v53  ;;  %v1963_v35 = vsel %vm328_vm1, %v7096_v61, 0.0  ;;  %s2426_s29 = sld [smem:[#allocation8 + %s2425_s20]]  ;;  %s3169_s20 = scalar_lea.hbm (%p6579_p4), %s6697_s6, 256 }
 0x56f   : >> { %v1910_v11 = vadd.f32 %v1894_v27, %v7092_v32  ;;  %v1635_v27 = vmul.f32 %v3083_v50, %v4621_v16  ;;  %v1814_v50 = vadd.f32 %v1798_v12, %v1731_v14  ;;  %v1603_v49 = vmul.f32 %v4757_v20, %v1586_v52  ;;  %v5898_v20 = vld [vmem:[#allocation2 + $0x4a] sm:$0xff] }
 0x570   : >> { %2313 = vrot.lane.b32.xlu0 %v5799_v58, %s3364_s19  ;;  %2520 = vrot.lane.b32.xlu1 %v5853_v54, %s3361_s9  ;;  %v1980_v45 = vmul.f32 %v5542_v0, %v1963_v35  ;;  %v2081_v14 = vsel %vm329_vm2, %v2055_v24, 0.0  ;;  %v5902_v52 = vld [vmem:[#allocation2 + $0x51] sm:$0xff] }
 0x571   : >> { %v1993_v1 = vadd.f32 %v1977_v23, %v1910_v11  ;;  %2056 = vrot.lane.b32.xlu2 %v5860_v43, %s3362_s30  ;;  %v2095_v23 = vmul.f32 %v5873_v22, %v2078_v60  ;;  %v7095_v11 = vld [vmem:[#allocation142_spill] sm:$0xff]  ;;  %v1651_v58 = vadd.f32 %v1635_v27, %v1616_v7  ;;  %v2098_v35 = vmul.f32 %v5873_v22, %v2081_v14 }
 0x572   : >> { %v2061_v31 = vpop.permute.xlu0 %2060  ;;  %v1701_v47 = vsel %vm329_vm2, %v7095_v11, 0.0  ;;  %v7097_v11 = vld [vmem:[#allocation28_spill] sm:$0xff] }
 0x573   : >> { %v1854_v37 = vpop.permute.xlu2 %1853  ;;  %v2028_v32 = vadd.f32 %v2012_v59, %v1993_v1  ;;  %v1718_v60 = vmul.f32 %v4813_v6, %v1701_v47  ;;  %v1536_v1 = vadd.f32 %v1520_v62, %v1437_v34  ;;  %v1784_v12 = vsel %vm330_vm3, %v7097_v11, 0.0  ;;  %v5906_v34 = vld [vmem:[#allocation2 + $0x31] sm:$0xff]  ;;  %v5912_v61 = vpop.permute.xlu1 %2070 }
 0x574   : >> { %v1880_v10 = vsel %vm327_vm0, %v1854_v37, 0.0  ;;  %v2015_v24 = vmul.f32 %v5906_v34, %v5840_v25  ;;  %v1801_v37 = vmul.f32 %v4856_v15, %v1784_v12 }
 0x575   : >> { %v1897_v53 = vmul.f32 %v5253_v18, %v1880_v10  ;;  %v5887_v55 = vadd.f32 %v2095_v23, %v2028_v32  ;;  %v1619_v7 = vadd.f32 %v1603_v49, %v1536_v1  ;;  %v1734_v62 = vadd.f32 %v1718_v60, %v1651_v58  ;;  %v3087_v32 = vld [vmem:[#allocation2 + $0x60] sm:$0xff]  ;;  %v7098_v49 = vld [vmem:[#allocation146_spill] sm:$0xff] }
 0x576   : >> { %v1638_v47 = vmul.f32 %v3087_v32, %v4621_v16  ;;  %v1704_v58 = vsel %vm329_vm2, %v7098_v49, 0.0  ;;  %v7100_v32 = vld [vmem:[#allocation41_spill] sm:$0xff] }
 0x577   : >> { %v1913_v59 = vadd.f32 %v1897_v53, %v1814_v50  ;;  %v1966_v53 = vsel %vm328_vm1, %v5457_v13, 0.0  ;;  %v1817_v1 = vadd.f32 %v1801_v37, %v1734_v62  ;;  %v1721_v11 = vmul.f32 %v4813_v6, %v1704_v58  ;;  %v5939_v6 = vld [vmem:[#allocation2 + $0x69] sm:$0xff] }
 0x578   : >> { %2319 = vrot.lane.b32.xlu0 %v5853_v54, %s3364_s19  ;;  %2526 = vrot.lane.b32.xlu1 %v5898_v20, %s3361_s9  ;;  %v1983_v12 = vmul.f32 %v5542_v0, %v1966_v53  ;;  %v2084_v13 = vsel %vm329_vm2, %v2061_v31, 0.0  ;;  %v1969_v58 = vsel %vm328_vm1, %v5532_v39, 0.0  ;;  %v5962_v39 = vld [vmem:[#allocation2 + $0x7a] sm:$0xff] }
 0x579   : >> { %v1996_v27 = vadd.f32 %v1980_v45, %v1913_v59  ;;  %2062 = vrot.lane.b32.xlu2 %v5902_v52, %s3362_s30  ;;  %v1654_v45 = vadd.f32 %v1638_v47, %v1619_v7  ;;  %v5935_v7 = vld [vmem:[#allocation2 + $0x62] sm:$0xff]  ;;  %v2018_v47 = vmul.f32 %v7100_v32, %v5840_v25 }
 0x57a   : >> { %v2067_v23 = vpop.permute.xlu0 %2066 }
 0x57b   : >> { %v1860_v50 = vpop.permute.xlu2 %1859  ;;  %v2031_v10 = vadd.f32 %v2015_v24, %v1996_v27  ;;  %v7099_v27 = vld [vmem:[#allocation30_spill] sm:$0xff]  ;;  %v1737_v37 = vadd.f32 %v1721_v11, %v1654_v45 }
 0x57c   : >> { %v1883_v60 = vsel %vm327_vm0, %v1860_v50, 0.0  ;;  %v1787_v24 = vsel %vm330_vm3, %v7099_v27, 0.0  ;;  %v2101_v50 = vmul.f32 %v5873_v22, %v2084_v13  ;;  %v5966_v27 = vld [vmem:[#allocation2 + $0x81] sm:$0xff] }
 0x57d   : >> { %v1900_v16 = vmul.f32 %v5253_v18, %v1883_v60  ;;  %v5924_v59 = vadd.f32 %v2098_v35, %v2031_v10  ;;  %v1804_v31 = vmul.f32 %v4856_v15, %v1787_v24  ;;  %v5952_v60 = vpop.permute.xlu1 %2127  ;;  %v1986_v15 = vmul.f32 %v5542_v0, %v1969_v58  ;;  %v7101_v24 = vld [vmem:[#allocation45_spill] sm:$0xff] }
 0x57e   : >> { %v2021_v13 = vmul.f32 %v7101_v24, %v5840_v25 }
 0x57f   : >> { %v1916_v14 = vadd.f32 %v1900_v16, %v1817_v1  ;;  %v1820_v45 = vadd.f32 %v1804_v31, %v1737_v37  ;;  %v1972_v31 = vsel %vm328_vm1, %v5603_v42, 0.0 }
 0x580   : >> { %2325 = vrot.lane.b32.xlu0 %v5898_v20, %s3364_s19  ;;  %2532 = vrot.lane.b32.xlu1 %v5935_v7, %s3361_s9  ;;  %v1989_v58 = vmul.f32 %v5542_v0, %v1972_v31  ;;  %v7103_v31 = vld [vmem:[#allocation71_spill] sm:$0xff] }
 0x581   : >> { %v1999_v62 = vadd.f32 %v1983_v12, %v1916_v14  ;;  %2068 = vrot.lane.b32.xlu2 %v5939_v6, %s3362_s30  ;;  %v2087_v12 = vsel %vm329_vm2, %v2067_v23, 0.0 }
 0x582   : >> { %v2073_v35 = vpop.permute.xlu0 %2072  ;;  %v2104_v23 = vmul.f32 %v5873_v22, %v2087_v12 }
 0x583   : >> { %v1866_v10 = vpop.permute.xlu2 %1865  ;;  %v2034_v49 = vadd.f32 %v2018_v47, %v1999_v62 }
 0x584   : >> { %v1886_v53 = vsel %vm327_vm0, %v1866_v10, 0.0 }
 0x585   : >> { %v1903_v1 = vmul.f32 %v5253_v18, %v1886_v53  ;;  %v5955_v16 = vadd.f32 %v2101_v50, %v2034_v49  ;;  %v5983_v53 = vpop.permute.xlu1 %2133 }
 0x587   : >> { %v1919_v11 = vadd.f32 %v1903_v1, %v1820_v45  ;;  %v7102_v45 = vld [vmem:[#allocation57_spill] sm:$0xff] }
 0x588   : >> { %2331 = vrot.lane.b32.xlu0 %v5935_v7, %s3364_s19  ;;  %2538 = vrot.lane.b32.xlu1 %v5962_v39, %s3361_s9 }
 0x589   : >> { %v2002_v14 = vadd.f32 %v1986_v15, %v1919_v11  ;;  %2074 = vrot.lane.b32.xlu2 %v5966_v27, %s3362_s30  ;;  %v2090_v15 = vsel %vm329_vm2, %v2073_v35, 0.0 }
 0x58a   : >> { %v2130_v62 = vpop.permute.xlu0 %2129  ;;  %v2107_v12 = vmul.f32 %v5873_v22, %v2090_v15 }
 0x58b   : >> { %v1872_v37 = vpop.permute.xlu2 %1871  ;;  %v2037_v47 = vadd.f32 %v2021_v13, %v2002_v14 }
 0x58c   : >> { %v1889_v50 = vsel %vm327_vm0, %v1872_v37, 0.0 }
 0x58d   : >> { %v1906_v10 = vmul.f32 %v5253_v18, %v1889_v50  ;;  %v5979_v49 = vadd.f32 %v2104_v23, %v2037_v47  ;;  %v2024_v18 = vmul.f32 %v5434_v8, %v5840_v25  ;;  %v2011_v47 = vmul.f32 %v5488_v36, %v5840_v25 }
 0x58f   : >> { %v1922_v1 = vadd.f32 %v1906_v10, %v7102_v45  ;;  %v2160_v10 = vsel %vm330_vm3, %v2130_v62, 0.0 }
 0x590   : >> { %2337 = vrot.lane.b32.xlu0 %v5962_v39, %s3364_s19 }
 0x591   : >> { %v2005_v42 = vadd.f32 %v1989_v58, %v1922_v1  ;;  %2131 = vrot.lane.b32.xlu2 %v5864_v51, %s3361_s9  ;;  %v2077_v51 = vsel %vm329_vm2, %v5664_v19, 0.0  ;;  %v6008_v58 = vld [vmem:[#allocation2 + $0x12] sm:$0xff]  ;;  %v6013_v1 = vpop.permute.xlu1 %2139  ;;  %v6017_v19 = vstv %s2126_s12  ;;  %s2620_s12 = sshll.u32 (%p6579_p4), %s3532_s8, 4  ;;  %s2621_s12 = int_to_ptr.vmem [resolvable:$true] %s2620_s12 }
 0x592   : >> { %v2136_v11 = vpop.permute.xlu0 %2135  ;;  %v2094_v45 = vmul.f32 %v5873_v22, %v2077_v51 }
 0x593   : >> { %v1929_v14 = vpop.permute.xlu2 %1928  ;;  %v2040_v13 = vadd.f32 %v2024_v18, %v2005_v42  ;;  %v2177_v42 = vmul.f32 %v6017_v19, %v2160_v10 }
 0x594   : >> { %v1959_v23 = vsel %vm328_vm1, %v1929_v14, 0.0 }
 0x595   : >> { %v1976_v35 = vmul.f32 %v5542_v0, %v1959_v23  ;;  %v5998_v37 = vadd.f32 %v2107_v12, %v2040_v13  ;;  %v2080_v23 = vsel %vm329_vm2, %v5723_v41, 0.0 }
 0x597   : >> { %v1992_v50 = vadd.f32 %v1976_v35, %v7103_v31  ;;  %v7104_v35 = vld [vmem:[#allocation43_spill] sm:$0xff]  ;;  %v6033_v31 = vld [vmem:[#allocation2 + $0x2a] sm:$0xff] }
 0x598   : >> { %2429 = vrot.lane.b32.xlu0 %v6008_v58, %s3362_s30 }
 0x599   : >> { %v2027_v15 = vadd.f32 %v2011_v47, %v1992_v50  ;;  %2137 = vrot.lane.b32.xlu2 %v5906_v34, %s3361_s9  ;;  %v2014_v34 = vmul.f32 %v5550_v26, %v5840_v25  ;;  %v2163_v47 = vsel %vm330_vm3, %v2136_v11, 0.0  ;;  %v2097_v50 = vmul.f32 %v5873_v22, %v2080_v23 }
 0x59a   : >> { %v2142_v36 = vpop.permute.xlu0 %2141  ;;  %v2180_v26 = vmul.f32 %v6017_v19, %v2163_v47 }
 0x59b   : >> { %v1935_v18 = vpop.permute.xlu2 %1934  ;;  %v2110_v62 = vadd.f32 %v2094_v45, %v2027_v15  ;;  %v6040_v45 = vpop.permute.xlu1 %2145 }
 0x59c   : >> { %v1962_v12 = vsel %vm328_vm1, %v1935_v18, 0.0 }
 0x59d   : >> { %v1979_v14 = vmul.f32 %v5542_v0, %v1962_v12  ;;  %v6023_v13 = vadd.f32 %v2177_v42, %v2110_v62  ;;  %v2083_v12 = vsel %vm329_vm2, %v5789_v48, 0.0 }
 0x59f   : >> { %v1995_v51 = vadd.f32 %v1979_v14, %v7104_v35  ;;  %v7105_v14 = vld [vmem:[#allocation24_spill] sm:$0xff] }
 0x5a0   : >> { %2435 = vrot.lane.b32.xlu0 %v6033_v31, %s3362_s30  ;;  %v6056_v35 = vld [vmem:[#allocation2 + $0x42] sm:$0xff] }
 0x5a1   : >> { %v2030_v10 = vadd.f32 %v2014_v34, %v1995_v51  ;;  %2143 = vrot.lane.b32.xlu2 %v7100_v32, %s3361_s9  ;;  %v2017_v32 = vmul.f32 %v5362_v56, %v5840_v25  ;;  %v2166_v34 = vsel %vm330_vm3, %v2142_v36, 0.0  ;;  %v2100_v51 = vmul.f32 %v5873_v22, %v2083_v12 }
 0x5a2   : >> { %v2148_v41 = vpop.permute.xlu0 %2147 }
 0x5a3   : >> { %v1941_v15 = vpop.permute.xlu2 %1940  ;;  %v2113_v42 = vadd.f32 %v2097_v50, %v2030_v10  ;;  %v2183_v50 = vmul.f32 %v6017_v19, %v2166_v34  ;;  %v6066_v36 = vpop.permute.xlu1 %2151  ;;  %v2169_v12 = vsel %vm330_vm3, %v2148_v41, 0.0 }
 0x5a4   : >> { %v1965_v11 = vsel %vm328_vm1, %v1941_v15, 0.0  ;;  %v2186_v34 = vmul.f32 %v6017_v19, %v2169_v12 }
 0x5a5   : >> { %v1982_v18 = vmul.f32 %v5542_v0, %v1965_v11  ;;  %v6046_v62 = vadd.f32 %v2180_v26, %v2113_v42  ;;  %v2086_v11 = vsel %vm329_vm2, %v5858_v33, 0.0 }
 0x5a7   : >> { %v1998_v23 = vadd.f32 %v1982_v18, %v7105_v14  ;;  %v2103_v14 = vmul.f32 %v5873_v22, %v2086_v11 }
 0x5a8   : >> { %2441 = vrot.lane.b32.xlu0 %v6056_v35, %s3362_s30 }
 0x5a9   : >> { %v2033_v47 = vadd.f32 %v2017_v32, %v1998_v23  ;;  %2149 = vrot.lane.b32.xlu2 %v7101_v24, %s3361_s9  ;;  %v2020_v24 = vmul.f32 %v5427_v9, %v5840_v25  ;;  %v6079_v32 = vld [vmem:[#allocation2 + $0x5a] sm:$0xff] }
 0x5aa   : >> { %v2154_v48 = vpop.permute.xlu0 %2153 }
 0x5ab   : >> { %v1947_v56 = vpop.permute.xlu2 %1946  ;;  %v2116_v10 = vadd.f32 %v2100_v51, %v2033_v47 }
 0x5ac   : >> { %v1968_v26 = vsel %vm328_vm1, %v1947_v56, 0.0  ;;  %v6096_v56 = vpop.permute.xlu1 %2157 }
 0x5ad   : >> { %v1985_v15 = vmul.f32 %v5542_v0, %v1968_v26  ;;  %v6069_v42 = vadd.f32 %v2183_v50, %v2116_v10  ;;  %v2089_v50 = vsel %vm329_vm2, %v5912_v61, 0.0  ;;  %v2172_v26 = vsel %vm330_vm3, %v2154_v48, 0.0 }
 0x5ae   : >> { %v2159_v48 = vsel %vm330_vm3, %v5952_v60, 0.0 }
 0x5af   : >> { %v2001_v18 = vadd.f32 %v1985_v15, %v5446_v5  ;;  %v7106_v15 = vld [vmem:[#allocation60_spill] sm:$0xff] }
 0x5b0   : >> { %2447 = vrot.lane.b32.xlu0 %v6079_v32, %s3362_s30 }
 0x5b1   : >> { %v2036_v23 = vadd.f32 %v2020_v24, %v2001_v18  ;;  %2155 = vrot.lane.b32.xlu2 %v5434_v8, %s3361_s9  ;;  %v2023_v8 = vmul.f32 %v5480_v57, %v5840_v25  ;;  %v2189_v24 = vmul.f32 %v6017_v19, %v2172_v26  ;;  %v2010_v57 = vmul.f32 %v5752_v44, %v5840_v25 }
 0x5b2   : >> { %v2227_v33 = vpop.permute.xlu0 %2226  ;;  %v2176_v44 = vmul.f32 %v6017_v19, %v2159_v48  ;;  %v7109_v48 = vld [vmem:[#allocation64_spill] sm:$0xff] }
 0x5b3   : >> { %v1953_v9 = vpop.permute.xlu2 %1952  ;;  %v2119_v51 = vadd.f32 %v2103_v14, %v2036_v23  ;;  %v2026_v14 = vadd.f32 %v2010_v57, %v5564_v38 }
 0x5b4   : >> { %v1971_v5 = vsel %vm328_vm1, %v1953_v9, 0.0  ;;  %v2258_v9 = vsel %vm327_vm0, %v2227_v33, 0.0  ;;  %v6127_v60 = vpop.permute.xlu1 %2230  ;;  %v2013_v33 = vmul.f32 %v5805_v21, %v5840_v25 }
 0x5b5   : >> { %v1988_v41 = vmul.f32 %v5542_v0, %v1971_v5  ;;  %v6091_v47 = vadd.f32 %v2186_v34, %v2119_v51  ;;  %v2106_v0 = vmul.f32 %v5873_v22, %v2089_v50  ;;  %v6123_v5 = vstv %s2225_s13 }
 0x5b6   : >> { %v2275_v50 = vmul.f32 %v6123_v5, %v2258_v9  ;;  %v2016_v9 = vmul.f32 %v5860_v43, %v5840_v25 }
 0x5b7   : >> { %v2004_v10 = vadd.f32 %v1988_v41, %v5508_v29  ;;  %v7107_v41 = vld [vmem:[#allocation55_spill] sm:$0xff] }
 0x5b8   : >> { %2453 = vrot.lane.b32.xlu0 %v7106_v15, %s3362_s30  ;;  %v2162_v15 = vsel %vm330_vm3, %v5983_v53, 0.0 }
 0x5b9   : >> { %v2039_v11 = vadd.f32 %v2023_v8, %v2004_v10  ;;  %2228 = vrot.lane.b32.xlu2 %v6008_v58, %s6757_s17 }
 0x5ba   : >> { %v2233_v61 = vpop.permute.xlu0 %2232 }
 0x5bb   : >> { %v2045_v29 = vpop.permute.xlu2 %2044  ;;  %v2122_v18 = vadd.f32 %v2106_v0, %v2039_v11  ;;  %v7108_v11 = vld [vmem:[#allocation63_spill] sm:$0xff] }
 0x5bc   : >> { %v2076_v12 = vsel %vm329_vm2, %v2045_v29, 0.0  ;;  %v2261_v29 = vsel %vm327_vm0, %v2233_v61, 0.0 }
 0x5bd   : >> { %v2093_v23 = vmul.f32 %v5873_v22, %v2076_v12  ;;  %v6118_v34 = vadd.f32 %v2189_v24, %v2122_v18  ;;  %v2029_v24 = vadd.f32 %v2013_v33, %v7108_v11  ;;  %v2179_v18 = vmul.f32 %v6017_v19, %v2162_v15 }
 0x5be   : >> { %v2278_v12 = vmul.f32 %v6123_v5, %v2261_v29 }
 0x5bf   : >> { %v2109_v51 = vadd.f32 %v2093_v23, %v2026_v14  ;;  %v6151_v23 = vpop.permute.xlu1 %2236 }
 0x5c0   : >> { %2510 = vrot.lane.b32.xlu0 %v7107_v41, %s3361_s9 }
 0x5c1   : >> { %v2192_v38 = vadd.f32 %v2176_v44, %v2109_v51  ;;  %2234 = vrot.lane.b32.xlu2 %v6033_v31, %s6757_s17  ;;  %v2165_v51 = vsel %vm330_vm3, %v6013_v1, 0.0 }
 0x5c2   : >> { %v2239_v8 = vpop.permute.xlu0 %2238 }
 0x5c3   : >> { %v2051_v10 = vpop.permute.xlu2 %2050  ;;  %v6134_v26 = vadd.f32 %v2275_v50, %v2192_v38  ;;  %v2032_v50 = vadd.f32 %v2016_v9, %v5666_v3  ;;  %v2264_v33 = vsel %vm327_vm0, %v2239_v8, 0.0  ;;  %v2019_v3 = vmul.f32 %v5902_v52, %v5840_v25  ;;  %v6191_v9 = vld [vmem:[#allocation2 + $0x72] sm:$0xff] }
 0x5c4   : >> { %v2079_v0 = vsel %vm329_vm2, %v2051_v10, 0.0  ;;  %v2182_v10 = vmul.f32 %v6017_v19, %v2165_v51  ;;  %v2281_v15 = vmul.f32 %v6123_v5, %v2264_v33  ;;  %v2168_v8 = vsel %vm330_vm3, %v6040_v45, 0.0 }
 0x5c5   : >> { %v2096_v57 = vmul.f32 %v5873_v22, %v2079_v0  ;;  %v2185_v52 = vmul.f32 %v6017_v19, %v2168_v8 }
 0x5c7   : >> { %v2112_v21 = vadd.f32 %v2096_v57, %v2029_v24  ;;  %v6181_v29 = vpop.permute.xlu1 %2242 }
 0x5c8   : >> { %2516 = vrot.lane.b32.xlu0 %v7109_v48, %s3361_s9 }
 0x5c9   : >> { %v2195_v14 = vadd.f32 %v2179_v18, %v2112_v21  ;;  %2240 = vrot.lane.b32.xlu2 %v6056_v35, %s6757_s17  ;;  %v2035_v18 = vadd.f32 %v2019_v3, %v5713_v46  ;;  %v6214_v3 = vld [vmem:[#allocation2 + $0xa] sm:$0xff] }
 0x5ca   : >> { %v2245_v53 = vpop.permute.xlu0 %2244 }
 0x5cb   : >> { %v2057_v44 = vpop.permute.xlu2 %2056  ;;  %v6155_v61 = vadd.f32 %v2278_v12, %v2195_v14  ;;  %v2267_v48 = vsel %vm327_vm0, %v2245_v53, 0.0 }
 0x5cc   : >> { %v2082_v41 = vsel %vm329_vm2, %v2057_v44, 0.0  ;;  %v2284_v45 = vmul.f32 %v6123_v5, %v2267_v48  ;;  %v2022_v44 = vmul.f32 %v5939_v6, %v5840_v25 }
 0x5cd   : >> { %v2099_v38 = vmul.f32 %v5873_v22, %v2082_v41  ;;  %v2171_v41 = vsel %vm330_vm3, %v6066_v36, 0.0 }
 0x5ce   : >> { %v2188_v6 = vmul.f32 %v6017_v19, %v2171_v41 }
 0x5cf   : >> { %v2115_v43 = vadd.f32 %v2099_v38, %v2032_v50  ;;  %v2038_v38 = vadd.f32 %v2022_v44, %v5765_v17 }
 0x5d0   : >> { %2522 = vrot.lane.b32.xlu0 %v5587_v4, %s3361_s9 }
 0x5d1   : >> { %v2198_v0 = vadd.f32 %v2182_v10, %v2115_v43  ;;  %2246 = vrot.lane.b32.xlu2 %v6079_v32, %s6757_s17  ;;  %v6209_v43 = vpop.permute.xlu1 %2248 }
 0x5d2   : >> { %v2251_v1 = vpop.permute.xlu0 %2250 }
 0x5d3   : >> { %v2063_v11 = vpop.permute.xlu2 %2062  ;;  %v6174_v24 = vadd.f32 %v2281_v15, %v2198_v0  ;;  %v2270_v10 = vsel %vm327_vm0, %v2251_v1, 0.0  ;;  %v2025_v1 = vmul.f32 %v5966_v27, %v5840_v25 }
 0x5d4   : >> { %v2085_v57 = vsel %vm329_vm2, %v2063_v11, 0.0  ;;  %v2287_v36 = vmul.f32 %v6123_v5, %v2270_v10 }
 0x5d5   : >> { %v2102_v21 = vmul.f32 %v5873_v22, %v2085_v57  ;;  %v2174_v57 = vsel %vm330_vm3, %v6096_v56, 0.0 }
 0x5d6   : >> { %v2191_v25 = vmul.f32 %v6017_v19, %v2174_v57 }
 0x5d7   : >> { %v2118_v12 = vadd.f32 %v2102_v21, %v2035_v18  ;;  %v2041_v21 = vadd.f32 %v2025_v1, %v5821_v28 }
 0x5d8   : >> { %2528 = vrot.lane.b32.xlu0 %v5638_v63, %s3361_s9 }
 0x5d9   : >> { %v2201_v14 = vadd.f32 %v2185_v52, %v2118_v12  ;;  %2252 = vrot.lane.b32.xlu2 %v6191_v9, %s6757_s17  ;;  %s2307_s17 = sadd.s32 21, %s3756_s18  ;;  %v2255_v12 = vpop.permute.xlu1 %2254  ;;  %s2619_s18 = scalar_lea.hbm (%p6579_p4), %s6697_s6, %s2821_s4 }
 0x5da   : >> { %v2257_v46 = vpop.permute.xlu0 %2256  ;;  %s2308_s16 = sld [smem:[#allocation8 + %s2307_s17]]  ;;  %s2622_s5 = sshll.u32 (%p6579_p4), %s2619_s18, 4  ;;  %s2623_s5 = int_to_ptr.hbm [resolvable:$true] %s2622_s5 }
 0x5db   : >> { %v2069_v51 = vpop.permute.xlu2 %2068  ;;  %v6197_v53 = vadd.f32 %v2284_v45, %v2201_v14  ;;  %v2273_v52 = vsel %vm327_vm0, %v2257_v46, 0.0  ;;  %v6236_v14 = vld [vmem:[#allocation2 + $0x22] sm:$0xff]  ;;  %v2260_v46 = vsel %vm327_vm0, %v6127_v60, 0.0  ;;  %s3163_s13 = sshra.s32 (%p6579_p4), %s2623_s5, 4  ;;  %s3164_s13 = int_to_ptr.hbm [resolvable:$true] %s3163_s13 }
 0x5dc   : >> { %v2088_v50 = vsel %vm329_vm2, %v2069_v51, 0.0  ;;  %v2290_v56 = vmul.f32 %v6123_v5, %v2273_v52  ;;  %s3165_s17 = scalar_lea.hbm (%p6579_p4), %s3164_s13, 128  ;;  %p3170_p5 = scmp.lt.s32.totalorder (%p6579_p4), %s3164_s13, %s6697_s6 }
 0x5dd   : >> { %v2105_v33 = vmul.f32 %v5873_v22, %v2088_v50  ;;  %p3166_p6 = scmp.ne.s32.totalorder (%p6579_p4), %s3164_s13, %s3165_s17  ;;  %p3171_p8 = scmp.lt.s32.totalorder (%p6579_p4), %s3169_s20, %s3165_s17 }
 0x5df   : >> { %v2121_v15 = vadd.f32 %v2105_v33, %v2038_v38  ;;  %v2277_v38 = vmul.f32 %v6123_v5, %v2260_v46  ;;  %p3167_p0 = pnand (%p6579_p4), %p3166_p6, %p3457_p11  ;;  %p3172_p9 = por (%p6579_p4), %p3171_p8, %p3170_p5 }
 0x5e0   : >> { %2534 = vrot.lane.b32.xlu0 %v5688_v40, %s3361_s9  ;;  %v6252_v10 = vstv %s2308_s16 }
 0x5e1   : >> { %v2204_v0 = vadd.f32 %v2188_v6, %v2121_v15  ;;  %2309 = vrot.lane.b32.xlu2 %v6214_v3, %s3364_s19  ;;  %p3168_p3 = pneg (%p6579_p4), %p3167_p0 }
 0x5e2   : >> { %v2314_v17 = vpop.permute.xlu0 %2313 }
 0x5e3   : >> { %v2075_v11 = vpop.permute.xlu2 %2074  ;;  %v6220_v8 = vadd.f32 %v2287_v36, %v2204_v0  ;;  %v2343_v50 = vsel %vm328_vm1, %v2314_v17, 0.0  ;;  %v2312_v36 = vpop.permute.xlu1 %2311  ;;  %v2263_v17 = vsel %vm327_vm0, %v6151_v23, 0.0  ;;  %p3173_p10 = pnand (%p6579_p4), %p3172_p9, %p3168_p3 }
 0x5e4   : >> { %v2091_v18 = vsel %vm329_vm2, %v2075_v11, 0.0  ;;  %v2360_v6 = vmul.f32 %v6252_v10, %v2343_v50 }
 0x5e5   : >> { %v2108_v48 = vmul.f32 %v5873_v22, %v2091_v18  ;;  %v2280_v18 = vmul.f32 %v6123_v5, %v2263_v17 }
 0x5e7   : >> { %v2124_v27 = vadd.f32 %v2108_v48, %v2041_v21 }
 0x5e8   : >> { %2540 = vrot.lane.b32.xlu0 %v5735_v30, %s3361_s9 }
 0x5e9   : >> { %v2207_v45 = vadd.f32 %v2191_v25, %v2124_v27  ;;  %2315 = vrot.lane.b32.xlu2 %v6236_v14, %s3364_s19  ;;  %v2266_v27 = vsel %vm327_vm0, %v6181_v29, 0.0 }
 0x5ea   : >> { %v2320_v28 = vpop.permute.xlu0 %2319 }
 0x5eb   : >> { %v2132_v22 = vpop.permute.xlu2 %2131  ;;  %v6240_v44 = vadd.f32 %v2290_v56, %v2207_v45  ;;  %v2346_v57 = vsel %vm328_vm1, %v2320_v28, 0.0  ;;  %v2318_v45 = vpop.permute.xlu1 %2317 }
 0x5ec   : >> { %v2161_v51 = vsel %vm330_vm3, %v2132_v22, 0.0  ;;  %v2363_v21 = vmul.f32 %v6252_v10, %v2346_v57  ;;  %v2283_v22 = vmul.f32 %v6123_v5, %v2266_v27  ;;  %v2272_v57 = vsel %vm327_vm0, %v2255_v12, 0.0  ;;  %v7110_v12 = vld [vmem:[#allocation23_spill] sm:$0xff] }
 0x5ed   : >> { %v2178_v41 = vmul.f32 %v6017_v19, %v2161_v51 }
 0x5ef   : >> { %v2194_v33 = vadd.f32 %v2178_v41, %v5887_v55 }
 0x5f1   : >> { %v2293_v15 = vadd.f32 %v2277_v38, %v2194_v33  ;;  %2321 = vrot.lane.b32.xlu2 %v5587_v4, %s3364_s19  ;;  %v2269_v38 = vsel %vm327_vm0, %v6209_v43, 0.0 }
 0x5f2   : >> { %v2326_v60 = vpop.permute.xlu0 %2325 }
 0x5f3   : >> { %v2138_v0 = vpop.permute.xlu2 %2137  ;;  %v6257_v1 = vadd.f32 %v2360_v6, %v2293_v15  ;;  %v2349_v28 = vsel %vm328_vm1, %v2326_v60, 0.0  ;;  %v2324_v15 = vpop.permute.xlu1 %2323 }
 0x5f4   : >> { %v2164_v55 = vsel %vm330_vm3, %v2138_v0, 0.0  ;;  %v2366_v46 = vmul.f32 %v6252_v10, %v2349_v28 }
 0x5f5   : >> { %v2181_v11 = vmul.f32 %v6017_v19, %v2164_v55 }
 0x5f7   : >> { %v2197_v4 = vadd.f32 %v2181_v11, %v5924_v59 }
 0x5f9   : >> { %v2296_v48 = vadd.f32 %v2280_v18, %v2197_v4  ;;  %2327 = vrot.lane.b32.xlu2 %v5638_v63, %s3364_s19 }
 0x5fa   : >> { %v2332_v52 = vpop.permute.xlu0 %2331 }
 0x5fb   : >> { %v2144_v23 = vpop.permute.xlu2 %2143  ;;  %v6272_v25 = vadd.f32 %v2363_v21, %v2296_v48  ;;  %v2352_v6 = vsel %vm328_vm1, %v2332_v52, 0.0  ;;  %v2289_v21 = vmul.f32 %v6123_v5, %v2272_v57  ;;  %v2330_v48 = vpop.permute.xlu1 %2329 }
 0x5fc   : >> { %v2167_v56 = vsel %vm330_vm3, %v2144_v23, 0.0  ;;  %v2369_v0 = vmul.f32 %v6252_v10, %v2352_v6 }
 0x5fd   : >> { %v2184_v59 = vmul.f32 %v6017_v19, %v2167_v56 }
 0x5ff   : >> { %v2200_v63 = vadd.f32 %v2184_v59, %v5955_v16  ;;  %v2342_v59 = vsel %vm328_vm1, %v2312_v36, 0.0 }
 0x601   : >> { %v2299_v51 = vadd.f32 %v2283_v22, %v2200_v63  ;;  %2333 = vrot.lane.b32.xlu2 %v5688_v40, %s3364_s19  ;;  %v2286_v40 = vmul.f32 %v6123_v5, %v2269_v38  ;;  %v2359_v22 = vmul.f32 %v6252_v10, %v2342_v59 }
 0x602   : >> { %v2338_v29 = vpop.permute.xlu0 %2337 }
 0x603   : >> { %v2150_v41 = vpop.permute.xlu2 %2149  ;;  %v6287_v50 = vadd.f32 %v2366_v46, %v2299_v51 }
 0x604   : >> { %v2170_v33 = vsel %vm330_vm3, %v2150_v41, 0.0  ;;  %v6335_v41 = vstv %s2426_s29 }
 0x605   : >> { %v2187_v16 = vmul.f32 %v6017_v19, %v2170_v33  ;;  %v2336_v33 = vpop.permute.xlu1 %2335 }
 0x607   : >> { %v2203_v60 = vadd.f32 %v2187_v16, %v5979_v49  ;;  %v2355_v49 = vsel %vm328_vm1, %v2338_v29, 0.0 }
 0x608   : >> { %v2372_v52 = vmul.f32 %v6252_v10, %v2355_v49 }
 0x609   : >> { %v2302_v17 = vadd.f32 %v2286_v40, %v2203_v60  ;;  %2339 = vrot.lane.b32.xlu2 %v5735_v30, %s3364_s19  ;;  %s2391_s19 = sld [smem:[#allocation8 + %s2390_s7]]  ;;  %v2345_v40 = vsel %vm328_vm1, %v2318_v45, 0.0 }
 0x60a   : >> { %v2430_v43 = vpop.permute.xlu0 %2429 }
 0x60b   : >> { %v2156_v55 = vpop.permute.xlu2 %2155  ;;  %v6302_v11 = vadd.f32 %v2369_v0, %v2302_v17  ;;  %v2460_v46 = vsel %vm329_vm2, %v2430_v43, 0.0  ;;  %v2362_v43 = vmul.f32 %v6252_v10, %v2345_v40 }
 0x60c   : >> { %v2173_v18 = vsel %vm330_vm3, %v2156_v55, 0.0  ;;  %v2477_v16 = vmul.f32 %v6335_v41, %v2460_v46 }
 0x60d   : >> { %v2190_v4 = vmul.f32 %v6017_v19, %v2173_v18 }
 0x60f   : >> { %v2206_v30 = vadd.f32 %v2190_v4, %v5998_v37  ;;  %v6329_v51 = vstv %s2391_s19 }
 0x610   : >> { %v2394_v36 = vmul.f32 %v6008_v58, %v6329_v51  ;;  %v2397_v45 = vmul.f32 %v6033_v31, %v6329_v51 }
 0x611   : >> { %v2305_v23 = vadd.f32 %v2289_v21, %v2206_v30  ;;  %2431 = vrot.lane.b32.xlu2 %v7110_v12, %s3362_s30 }
 0x612   : >> { %v2436_v27 = vpop.permute.xlu0 %2435 }
 0x613   : >> { %v2229_v19 = vpop.permute.xlu2 %2228  ;;  %v6318_v56 = vadd.f32 %v2372_v52, %v2305_v23  ;;  %v2463_v57 = vsel %vm329_vm2, %v2436_v27, 0.0  ;;  %v2348_v52 = vsel %vm328_vm1, %v2324_v15, 0.0  ;;  %v2428_v23 = vpop.permute.xlu1 %2427 }
 0x614   : >> { %v2259_v28 = vsel %vm327_vm0, %v2229_v19, 0.0  ;;  %v2480_v49 = vmul.f32 %v6335_v41, %v2463_v57  ;;  %v2365_v19 = vmul.f32 %v6252_v10, %v2348_v52 }
 0x615   : >> { %v2276_v37 = vmul.f32 %v6123_v5, %v2259_v28 }
 0x617   : >> { %v2292_v63 = vadd.f32 %v2276_v37, %v6023_v13 }
 0x619   : >> { %v2375_v29 = vadd.f32 %v2359_v22, %v2292_v63  ;;  %2437 = vrot.lane.b32.xlu2 %v5853_v54, %s3362_s30  ;;  %v2351_v22 = vsel %vm328_vm1, %v2330_v48, 0.0  ;;  %v2354_v48 = vsel %vm328_vm1, %v2336_v33, 0.0 }
 0x61a   : >> { %v6337_v38 = vpop.permute.xlu0 %2441 }
 0x61b   : >> { %v2235_v13 = vpop.permute.xlu2 %2234  ;;  %v2410_v6 = vadd.f32 %v2394_v36, %v2375_v29  ;;  %v2368_v29 = vmul.f32 %v6252_v10, %v2351_v22 }
 0x61c   : >> { %v2262_v60 = vsel %vm327_vm0, %v2235_v13, 0.0 }
 0x61d   : >> { %v2279_v0 = vmul.f32 %v6123_v5, %v2262_v60  ;;  %v6345_v17 = vadd.f32 %v2477_v16, %v2410_v6 }
 0x61f   : >> { %v2295_v55 = vadd.f32 %v2279_v0, %v6046_v62  ;;  %v2371_v0 = vmul.f32 %v6252_v10, %v2354_v48 }
 0x621   : >> { %v2378_v18 = vadd.f32 %v2362_v43, %v2295_v55  ;;  %2443 = vrot.lane.b32.xlu2 %v5898_v20, %s3362_s30 }
 0x622   : >> { %v6355_v4 = vpop.permute.xlu0 %2447 }
 0x623   : >> { %v2241_v21 = vpop.permute.xlu2 %2240  ;;  %v2413_v30 = vadd.f32 %v2397_v45, %v2378_v18 }
 0x624   : >> { %v2265_v62 = vsel %vm327_vm0, %v2241_v21, 0.0 }
 0x625   : >> { %v2282_v12 = vmul.f32 %v6123_v5, %v2265_v62  ;;  %v6363_v27 = vadd.f32 %v2480_v49, %v2413_v30 }
 0x627   : >> { %v2298_v59 = vadd.f32 %v2282_v12, %v6069_v42  ;;  %v2434_v42 = vpop.permute.xlu1 %2433 }
 0x629   : >> { %v6367_v28 = vadd.f32 %v2365_v19, %v2298_v59  ;;  %2449 = vrot.lane.b32.xlu2 %v5935_v7, %s3362_s30 }
 0x62a   : >> { %v6371_v37 = vpop.permute.xlu0 %2453 }
 0x62b   : >> { %v2247_v15 = vpop.permute.xlu2 %2246 }
 0x62c   : >> { %v2268_v63 = vsel %vm327_vm0, %v2247_v15, 0.0  ;;  %v2462_v15 = vsel %vm329_vm2, %v2434_v42, 0.0 }
 0x62d   : >> { %v2285_v46 = vmul.f32 %v6123_v5, %v2268_v63 }
 0x62f   : >> { %v2301_v36 = vadd.f32 %v2285_v46, %v6091_v47  ;;  %v2440_v43 = vpop.permute.xlu1 %2439 }
 0x631   : >> { %v6380_v16 = vadd.f32 %v2368_v29, %v2301_v36  ;;  %2455 = vrot.lane.b32.xlu2 %v5962_v39, %s3362_s30  ;;  %s2509_s30 = sld [smem:[#allocation8 + %s2508_s21]]  ;;  %v2479_v29 = vmul.f32 %v6335_v41, %v2462_v15 }
 0x632   : >> { %v2511_v13 = vpop.permute.xlu0 %2510 }
 0x633   : >> { %v2253_v6 = vpop.permute.xlu2 %2252  ;;  %v2542_v21 = vsel %vm330_vm3, %v2511_v13, 0.0 }
 0x634   : >> { %v2271_v40 = vsel %vm327_vm0, %v2253_v6, 0.0 }
 0x635   : >> { %v2288_v60 = vmul.f32 %v6123_v5, %v2271_v40  ;;  %v2459_v5 = vsel %vm329_vm2, %v2428_v23, 0.0 }
 0x637   : >> { %v2304_v47 = vadd.f32 %v2288_v60, %v6118_v34  ;;  %v2393_v34 = vmul.f32 %v6214_v3, %v6329_v51  ;;  %v6409_v52 = vstv %s2509_s30  ;;  %v2446_v62 = vpop.permute.xlu1 %2445 }
 0x638   : >> { %v2559_v12 = vmul.f32 %v6409_v52, %v2542_v21 }
 0x639   : >> { %v6392_v55 = vadd.f32 %v2371_v0, %v2304_v47  ;;  %2512 = vrot.lane.b32.xlu2 %v6008_v58, %s3361_s9  ;;  %v2476_v58 = vmul.f32 %v6335_v41, %v2459_v5  ;;  %v2465_v0 = vsel %vm329_vm2, %v2440_v43, 0.0  ;;  %v3099_v47 = vld [vmem:[#allocation2 + $0x3a] sm:$0xff] }
 0x63a   : >> { %v2517_v18 = vpop.permute.xlu0 %2516 }
 0x63b   : >> { %v2310_v57 = vpop.permute.xlu2 %2309  ;;  %v2545_v46 = vsel %vm330_vm3, %v2517_v18, 0.0 }
 0x63c   : >> { %v2341_v33 = vsel %vm328_vm1, %v2310_v57, 0.0  ;;  %v2562_v13 = vmul.f32 %v6409_v52, %v2545_v46  ;;  %v2399_v57 = vmul.f32 %v3099_v47, %v6329_v51 }
 0x63d   : >> { %v2358_v45 = vmul.f32 %v6252_v10, %v2341_v33 }
 0x63f   : >> { %v2374_v49 = vadd.f32 %v2358_v45, %v6134_v26  ;;  %v2452_v40 = vpop.permute.xlu1 %2451  ;;  %v2482_v45 = vmul.f32 %v6335_v41, %v2465_v0 }
 0x641   : >> { %v2409_v30 = vadd.f32 %v2393_v34, %v2374_v49  ;;  %2518 = vrot.lane.b32.xlu2 %v6033_v31, %s3361_s9  ;;  %v2396_v31 = vmul.f32 %v6236_v14, %v6329_v51 }
 0x642   : >> { %v2523_v22 = vpop.permute.xlu0 %2522 }
 0x643   : >> { %v2492_v23 = vadd.f32 %v2476_v58, %v2409_v30  ;;  %v2316_v19 = vpop.permute.xlu2 %2315  ;;  %v2548_v18 = vsel %vm330_vm3, %v2523_v22, 0.0 }
 0x644   : >> { %v2344_v3 = vsel %vm328_vm1, %v2316_v19, 0.0  ;;  %v2565_v49 = vmul.f32 %v6409_v52, %v2548_v18  ;;  %v3100_v19 = vld [vmem:[#allocation2 + $0x52] sm:$0xff] }
 0x645   : >> { %v6414_v26 = vadd.f32 %v2559_v12, %v2492_v23   ;;  %v2361_v59 = vmul.f32 %v6252_v10, %v2344_v3  ;;  %v2468_v12 = vsel %vm329_vm2, %v2446_v62, 0.0  ;;  %v2402_v3 = vmul.f32 %v3100_v19, %v6329_v51 }
 0x646   : >> { %v2485_v22 = vmul.f32 %v6335_v41, %v2468_v12 }
 0x647   : >> { %v2377_v63 = vadd.f32 %v2361_v59, %v6155_v61  ;;  %v2458_v23 = vpop.permute.xlu1 %2457  ;;  %2591 = vst [vmem:[%s3532_s8] sm:$0xff] (%p6579_p4), %v6414_v26 }
 0x649   : >> { %v2412_v36 = vadd.f32 %v2396_v31, %v2377_v63  ;;  %2524 = vrot.lane.b32.xlu2 %v6056_v35, %s3361_s9 }
 0x64a   : >> { %v2529_v5 = vpop.permute.xlu0 %2528 }
 0x64b   : >> { %v2495_v6 = vadd.f32 %v2479_v29, %v2412_v36  ;;  %v2322_v48 = vpop.permute.xlu2 %2321  ;;  %v2551_v15 = vsel %vm330_vm3, %v2529_v5, 0.0 }
 0x64c   : >> { %v2347_v42 = vsel %vm328_vm1, %v2322_v48, 0.0  ;;  %v2568_v63 = vmul.f32 %v6409_v52, %v2551_v15 }
 0x64d   : >> { %v6430_v14 = vadd.f32 %v2562_v13, %v2495_v6   ;;  %v2364_v61 = vmul.f32 %v6252_v10, %v2347_v42  ;;  %v2471_v6 = vsel %vm329_vm2, %v2452_v40, 0.0  ;;  %v3101_v42 = vld [vmem:[#allocation2 + $0x6a] sm:$0xff] }
 0x64e   : >> { %v2488_v47 = vmul.f32 %v6335_v41, %v2471_v6  ;;  %v2398_v6 = vmul.f32 %v5853_v54, %v6329_v51  ;;  %v2401_v54 = vmul.f32 %v5898_v20, %v6329_v51  ;;  %v2404_v20 = vmul.f32 %v5935_v7, %v6329_v51 }
 0x64f   : >> { %v7111_v60 = vmov %v6430_v14  ;;  %v2380_v33 = vadd.f32 %v2364_v61, %v6174_v24  ;;  %v2405_v14 = vmul.f32 %v3101_v42, %v6329_v51  ;;  %v2407_v7 = vmul.f32 %v5962_v39, %v6329_v51 }
 0x650   : > { %2594 = vst [vmem:[%s3532_s8 + $0x18] sm:$0xff] (%p6579_p4), %v7111_v60 }
 0x651   : >> { %v2415_v34 = vadd.f32 %v2399_v57, %v2380_v33  ;;  %2530 = vrot.lane.b32.xlu2 %v6079_v32, %s3361_s9  ;;  %v2515_v57 = vpop.permute.xlu1 %2514 }
 0x652   : >> { %v2535_v46 = vpop.permute.xlu0 %2534 }
 0x653   : >> { %v2498_v21 = vadd.f32 %v2482_v45, %v2415_v34  ;;  %v2328_v58 = vpop.permute.xlu2 %2327  ;;  %v2554_v0 = vsel %vm330_vm3, %v2535_v46, 0.0 }
 0x654   : >> { %v2350_v43 = vsel %vm328_vm1, %v2328_v58, 0.0  ;;  %v2571_v18 = vmul.f32 %v6409_v52, %v2554_v0  ;;  %v3102_v58 = vld [vmem:[#allocation2 + $0x82] sm:$0xff] }
 0x655   : >> { %v6445_v13 = vadd.f32 %v2565_v49, %v2498_v21   ;;  %v2367_v24 = vmul.f32 %v6252_v10, %v2350_v43  ;;  %v2408_v43 = vmul.f32 %v3102_v58, %v6329_v51 }
 0x657   : >> { %v7112_v30 = vmov %v6445_v13  ;;  %v2383_v59 = vadd.f32 %v2367_v24, %v6197_v53 }
 0x658   : > { %2597 = vst [vmem:[%s3532_s8 + $0x30] sm:$0xff] (%p6579_p4), %v7112_v30 }
 0x659   : >> { %v2418_v31 = vadd.f32 %v2402_v3, %v2383_v59  ;;  %2536 = vrot.lane.b32.xlu2 %v6191_v9, %s3361_s9  ;;  %v2521_v59 = vpop.permute.xlu1 %2520 }
 0x65a   : >> { %v2541_v40 = vpop.permute.xlu0 %2540 }
 0x65b   : >> { %v2501_v29 = vadd.f32 %v2485_v22, %v2418_v31  ;;  %v2334_v62 = vpop.permute.xlu2 %2333  ;;  %v2557_v12 = vsel %vm330_vm3, %v2541_v40, 0.0  ;;  %v3103_v31 = vld [vmem:[#allocation2 + $0x1a] sm:$0xff]  ;;  %v2417_v40 = vadd.f32 %v2401_v54, %v6287_v50  ;;  %v2420_v50 = vadd.f32 %v2404_v20, %v6302_v11 }
 0x65c   : >> { %v2353_v36 = vsel %vm328_vm1, %v2334_v62, 0.0  ;;  %v2574_v15 = vmul.f32 %v6409_v52, %v2557_v12  ;;  %v2423_v11 = vadd.f32 %v2407_v7, %v6318_v56  ;;  %v2406_v20 = vmul.f32 %v6191_v9, %v6329_v51 }
 0x65d   : >> { %v6460_v13 = vadd.f32 %v2568_v63, %v2501_v29   ;;  %v2370_v53 = vmul.f32 %v6252_v10, %v2353_v36 }
 0x65f   : >> { %v7113_v48 = vmov %v6460_v13  ;;  %v2386_v61 = vadd.f32 %v2370_v53, %v6220_v8  ;;  %v2474_v8 = vsel %vm329_vm2, %v2458_v23, 0.0  ;;  %v2544_v23 = vsel %vm330_vm3, %v2515_v57, 0.0 }
 0x660   : >> { %v2491_v19 = vmul.f32 %v6335_v41, %v2474_v8  ;;  %v2561_v36 = vmul.f32 %v6409_v52, %v2544_v23  ;;  %2600 = vst [vmem:[%s3532_s8 + $0x48] sm:$0xff] (%p6579_p4), %v7113_v48 }
 0x661   : >> { %v2421_v33 = vadd.f32 %v2405_v14, %v2386_v61  ;;  %v2547_v14 = vsel %vm330_vm3, %v2521_v59, 0.0  ;;  %v2527_v0 = vpop.permute.xlu1 %2526 }
 0x662   : >> { %v2564_v57 = vmul.f32 %v6409_v52, %v2547_v14 }
 0x663   : >> { %v2504_v45 = vadd.f32 %v2488_v47, %v2421_v33  ;;  %v2340_v5 = vpop.permute.xlu2 %2339 }
 0x664   : >> { %v2356_v34 = vsel %vm328_vm1, %v2340_v5, 0.0  ;;  %v2550_v5 = vsel %vm330_vm3, %v2527_v0, 0.0 }
 0x665   : >> { %v6473_v49 = vadd.f32 %v2571_v18, %v2504_v45   ;;  %v2373_v21 = vmul.f32 %v6252_v10, %v2356_v34  ;;  %v2395_v10 = vmul.f32 %v3103_v31, %v6329_v51 }
 0x667   : >> { %v2389_v24 = vadd.f32 %v2373_v21, %v6240_v44  ;;  %v2411_v29 = vadd.f32 %v2395_v10, %v6257_v1  ;;  %v2414_v1 = vadd.f32 %v2398_v6, %v6272_v25  ;;  %v2567_v21 = vmul.f32 %v6409_v52, %v2550_v5  ;;  %2603 = vst [vmem:[%s3532_s8 + $0x60] sm:$0xff] (%p6579_p4), %v6473_v49 }
 0x668   : >> { %v7121_v7 = vmov %v6473_v49 }
 0x669   : >> { %v2424_v3 = vadd.f32 %v2408_v43, %v2389_v24  ;;  %v2533_v8 = vpop.permute.xlu1 %2532 }
 0x66a   : >> { %v2553_v12 = vsel %vm330_vm3, %v2533_v8, 0.0 }
 0x66b   : >> { %v2507_v22 = vadd.f32 %v2491_v19, %v2424_v3  ;;  %v2432_v63 = vpop.permute.xlu2 %2431  ;;  %v2570_v59 = vmul.f32 %v6409_v52, %v2553_v12 }
 0x66c   : >> { %v2461_v44 = vsel %vm329_vm2, %v2432_v63, 0.0 }
 0x66d   : >> { %v6489_v46 = vadd.f32 %v2574_v15, %v2507_v22   ;;  %v2478_v62 = vmul.f32 %v6335_v41, %v2461_v44 }
 0x66f   : >> { %v2494_v13 = vadd.f32 %v2478_v62, %v2411_v29  ;;  %2606 = vst [vmem:[%s3532_s8 + $0x78] sm:$0xff] (%p6579_p4), %v6489_v46 }
 0x671   : >> { %v6494_v53 = vadd.f32 %v2561_v36, %v2494_v13   ;;  %v2539_v22 = vpop.permute.xlu1 %2538 }
 0x672   : >> { %v2556_v63 = vsel %vm330_vm3, %v2539_v22, 0.0 }
 0x673   : >> { %v2438_v42 = vpop.permute.xlu2 %2437  ;;  %v2573_v29 = vmul.f32 %v6409_v52, %v2556_v63  ;;  %2593 = vst [vmem:[%s3532_s8 + $0x10] sm:$0xff] (%p6579_p4), %v6494_v53 }
 0x674   : >> { %v2464_v61 = vsel %vm329_vm2, %v2438_v42, 0.0 }
 0x675   : >> { %v2481_v47 = vmul.f32 %v6335_v41, %v2464_v61 }
 0x677   : >> { %v2497_v33 = vadd.f32 %v2481_v47, %v2414_v1  ;;  %v2400_v1 = vmul.f32 %v6056_v35, %v6329_v51  ;;  %v2466_v47 = vsel %vm329_vm2, %v6337_v38, 0.0  ;;  %v2469_v35 = vsel %vm329_vm2, %v6355_v4, 0.0 }
 0x678   : >> { %v2422_v4 = vadd.f32 %v2406_v20, %v6392_v55 }
 0x679   : >> { %v6505_v14 = vadd.f32 %v2564_v57, %v2497_v33   ;;  %v2416_v57 = vadd.f32 %v2400_v1, %v6367_v28  ;;  %v2483_v33 = vmul.f32 %v6335_v41, %v2466_v47  ;;  %v2486_v28 = vmul.f32 %v6335_v41, %v2469_v35 }
 0x67b   : >> { %v7114_v45 = vmov %v6505_v14  ;;  %v2444_v18 = vpop.permute.xlu2 %2443 }
 0x67c   : >> { %v2467_v34 = vsel %vm329_vm2, %v2444_v18, 0.0  ;;  %v2499_v18 = vadd.f32 %v2483_v33, %v2416_v57  ;;  %2596 = vst [vmem:[%s3532_s8 + $0x28] sm:$0xff] (%p6579_p4), %v7114_v45 }
 0x67d   : >> { %v2484_v25 = vmul.f32 %v6335_v41, %v2467_v34 }
 0x67f   : >> { %v2500_v58 = vadd.f32 %v2484_v25, %v2417_v40 }
 0x681   : >> { %v6516_v43 = vadd.f32 %v2567_v21, %v2500_v58  }
 0x683   : >> { %v2450_v24 = vpop.permute.xlu2 %2449  ;;  %2599 = vst [vmem:[%s3532_s8 + $0x40] sm:$0xff] (%p6579_p4), %v6516_v43 }
 0x684   : >> { %v2470_v19 = vsel %vm329_vm2, %v2450_v24, 0.0 }
 0x685   : >> { %v2487_v3 = vmul.f32 %v6335_v41, %v2470_v19 }
 0x687   : >> { %v2503_v15 = vadd.f32 %v2487_v3, %v2420_v50  ;;  %v7133_v3 = vmov %v6414_v26 }
 0x689   : >> { %v6527_v8 = vadd.f32 %v2570_v59, %v2503_v15  }
 0x68b   : >> { %v7115_v31 = vmov %v6527_v8  ;;  %v2456_v10 = vpop.permute.xlu2 %2455 }
 0x68c   : >> { %v2473_v23 = vsel %vm329_vm2, %v2456_v10, 0.0  ;;  %v7124_v10 = vmov %v7113_v48  ;;  %2602 = vst [vmem:[%s3532_s8 + $0x58] sm:$0xff] (%p6579_p4), %v7115_v31 }
 0x68d   : >> { %v2490_v44 = vmul.f32 %v6335_v41, %v2473_v23 }
 0x68f   : >> { %v2506_v62 = vadd.f32 %v2490_v44, %v2423_v11  ;;  %v7125_v11 = vmov %v6516_v43 }
 0x691   : >> { %v6538_v5 = vadd.f32 %v2573_v29, %v2506_v62  }
 0x693   : >> { %v7116_v36 = vmov %v6538_v5  ;;  %v2513_v13 = vpop.permute.xlu2 %2512 }
 0x694   : >> { %v2543_v39 = vsel %vm330_vm3, %v2513_v13, 0.0  ;;  %v7127_v13 = vmov %v7112_v30  ;;  %2605 = vst [vmem:[%s3532_s8 + $0x70] sm:$0xff] (%p6579_p4), %v7116_v36 }
 0x695   : >> { %v2560_v6 = vmul.f32 %v6409_v52, %v2543_v39 }
 0x697   : >> { %v2576_v42 = vadd.f32 %v2560_v6, %v6345_v17  }
 0x699   : > { %2592 = vst [vmem:[%s3532_s8 + $0x8] sm:$0xff] (%p6579_p4), %v2576_v42 }
 0x69b   : >> { %v2519_v14 = vpop.permute.xlu2 %2518 }
 0x69c   : >> { %v2546_v61 = vsel %vm330_vm3, %v2519_v14, 0.0  ;;  %v7128_v14 = vmov %v7114_v45 }
 0x69d   : >> { %v2563_v56 = vmul.f32 %v6409_v52, %v2546_v61 }
 0x69f   : >> { %v2579_v0 = vadd.f32 %v2563_v56, %v6363_v27   ;;  %v2403_v27 = vmul.f32 %v6079_v32, %v6329_v51  ;;  %v2472_v32 = vsel %vm329_vm2, %v6371_v37, 0.0 }
 0x6a1   : >> { %v2419_v38 = vadd.f32 %v2403_v27, %v6380_v16  ;;  %v2489_v16 = vmul.f32 %v6335_v41, %v2472_v32  ;;  %v7129_v15 = vmov %v2579_v0  ;;  %2595 = vst [vmem:[%s3532_s8 + $0x20] sm:$0xff] (%p6579_p4), %v2579_v0 }
 0x6a3   : >> { %v2525_v17 = vpop.permute.xlu2 %2524  ;;  %v2502_v21 = vadd.f32 %v2486_v28, %v2419_v38  ;;  %v2505_v19 = vadd.f32 %v2489_v16, %v2422_v4  ;;  %v7118_v4 = vmov %v6489_v46  ;;  %v7130_v16 = vmov %v7111_v60 }
 0x6a4   : >> { %v2549_v54 = vsel %vm330_vm3, %v2525_v17, 0.0  ;;  %v7131_v17 = vmov %v6494_v53 }
 0x6a5   : >> { %v2566_v5 = vmul.f32 %v6409_v52, %v2549_v54 }
 0x6a7   : >> { %v2582_v34 = vadd.f32 %v2566_v5, %v2499_v18   ;;  %v7119_v5 = vmov %v7116_v36  ;;  %v7132_v18 = vmov %v2576_v42 }
 0x6a9   : > { %2598 = vst [vmem:[%s3532_s8 + $0x38] sm:$0xff] (%p6579_p4), %v2582_v34 }
 0x6ab   : >> { %v2531_v40 = vpop.permute.xlu2 %2530 }
 0x6ac   : >> { %v2552_v25 = vsel %vm330_vm3, %v2531_v40, 0.0 }
 0x6ad   : >> { %v2569_v8 = vmul.f32 %v6409_v52, %v2552_v25 }
 0x6af   : >> { %v2585_v58 = vadd.f32 %v2569_v8, %v2502_v21   ;;  %v7122_v8 = vmov %v7115_v31 }
 0x6b1   : >> { %v7123_v9 = vmov %v2585_v58  ;;  %2601 = vst [vmem:[%s3532_s8 + $0x50] sm:$0xff] (%p6579_p4), %v2585_v58 }
 0x6b3   : >> { %v2537_v24 = vpop.permute.xlu2 %2536 }
 0x6b4   : >> { %v2555_v12 = vsel %vm330_vm3, %v2537_v24, 0.0 }
 0x6b5   : >> { %v2572_v50 = vmul.f32 %v6409_v52, %v2555_v12  ;;  %v7126_v12 = vmov %v2582_v34  ;;  %337 = sbr.rel (!%p6579_p4) target bundleno = 71 (0x47), region = 108 }
 0x6b7   : >> { %v2588_v59 = vadd.f32 %v2572_v50, %v2505_v19  }
 0x6b9   : >> { %v7120_v6 = vmov %v2588_v59  ;;  %2604 = vst [vmem:[%s3532_s8 + $0x68] sm:$0xff] (%p6579_p4), %v2588_v59 }
 0x6ba   : > { %3176 = shalt.err (!%p3173_p10)
}
 0x6bb   : > { %s3365_s27 = smov 128   ;;  %s3366_s8 = smov 8  }
 0x6bc   : > { %2834 = dma.vmem_to_hbm [thread:$0]  (%p3457_p11), %s2621_s12, 2048, %s2623_s5, %s2608_s22, %s3365_s27, %s3365_s27, %s3366_s8  }
 0x6bd PF: > { %s2637_s21 = sand.u32 1, %s3275_s23   ;;  %p7134_p1 = scmp.ge.s32.totalorder %s3287_s26, 2 }
 0x6be   : > { %s2638_s30 = scalar_lea.sflag [#allocation6], %s2637_s21 }
 0x6bf   : > { %p2845_p2 = pnand %p7134_p1, %p3461_p12 }
 0x6c1   : > { %p2846_p7 = pneg %p2845_p2 }
 0x6c3   : > { %3270 = dma.done.wait (%p2846_p7), %s2638_s30, 2048  }
 0x6c4   : > { %3272 = vsyncadd (%p2846_p7), %s2638_s30, 4294965248  ;;  %s7135_s9 = sld [smem:[#allocation13_spill]]  ;;  %p21_p13 = scmp.ge.s32.totalorder %s3430_s28, 4  }
 0x6c5   : > { %s7136_s23 = smov %s3279_s24  ;;  %s7137_s24 = smov %s3283_s25 }
 0x6c6   : > { %s7139_s26 = smov %s3430_s28  ;;  %23 = sbr.rel (!%p21_p13) target bundleno = 9 (0x9), region = 119 }
 0x6ca   : > { %s7138_s25 = smov %s7135_s9 }
 0x6cb   :  { %2644 = vsyncpa [#allocation5], 1 }
 0x6cc   :  { %2646 = vsyncpa [#allocation5 + $0x1], 1 }
 0x6cd   :  { %2647 = vsyncpa [#allocation6], 1 }
 0x6ce   :  { %2649 = vsyncpa [#allocation6 + $0x1], 1 }
 0x6cf   :  { %2650 = vsyncpa [#allocation7], 1 }
 0x6d0   :  { %2652 = vsyncpa [#allocation7 + $0x1], 1 }

</bundles_post_ra>
